<compile_context>
chip_gen: v5e
topology: v5e:2x2
jax: 0.10.0
libtpu: 0.0.40
codegen_flags: <defaults>
</compile_context>

<pallas_src>
import math

import jax
import jax.numpy as jnp
from jax.experimental import pallas as pl
from jax.experimental.pallas import tpu as pltpu

NUM_CLASSES = 81   # COCO: 80 classes + background, as in Yolact
HIDDEN = 128       # head hidden width (128 keeps the MXU contraction fully dense)
NCORES = 2         # leading "parallel" grid axis -> both TensorCores on v7x


def _round_up(x, m):
    return ((x + m - 1) // m) * m


def _make_kernel(num_classes):
    """Fused net-forward + MultiBoxLoss kernel over one row tile."""

    def kernel(x_ref, w1_ref, b1_ref, wh_ref, bh_ref, gt_ref, acc_ref):
        i = pl.program_id(1)   # step along the row ("arbitrary") axis

        # Grid-resident per-core accumulator: zero once, accumulate every step.
        @pl.when(i == 0)
        def _init():
            acc_ref[...] = jnp.zeros_like(acc_ref)

        # ---- net forward: 1x1 conv -> ReLU -> fused [loc | conf] head (MXU) ----
        h = jnp.dot(x_ref[...], w1_ref[...], preferred_element_type=jnp.float32)
        h = jnp.maximum(h + b1_ref[...], 0.0)
        y = jnp.dot(h.astype(wh_ref.dtype), wh_ref[...],
                    preferred_element_type=jnp.float32)
        y = y + bh_ref[...]                       # (TM, HEAD_P) = [loc(4) | conf(C) | pad]

        # ---- packed targets: lanes 0..3 = encoded box, lane 4 = label (-1 => pad row) ----
        gt = gt_ref[...]                                            # (TM, 8) f32
        col8 = jax.lax.broadcasted_iota(jnp.int32, gt.shape, dimension=1)
        label = jnp.sum(jnp.where(col8 == 4, gt, 0.0), axis=1, keepdims=True)  # (TM, 1)
        valid = (label >= 0.0).astype(jnp.float32)                  # real prior
        pos = (label > 0.0).astype(jnp.float32)                     # positive prior (0 = bg)

        # ---- smooth-L1 localization loss over positive priors ----
        y8 = y[:, 0:8]                                              # loc preds live in lanes 0..3
        diff = jnp.where(col8 < 4, y8 - gt, 0.0)
        adiff = jnp.abs(diff)
        sl1 = jnp.where(adiff < 1.0, 0.5 * diff * diff, adiff - 0.5)
        loc_row = jnp.sum(sl1, axis=1, keepdims=True) * pos         # (TM, 1)

        # ---- softmax cross-entropy conf loss over valid priors ----
        # TODO(synk): real MultiBoxLoss applies OHEM hard-negative mining (3:1);
        # here the CE term is summed over all valid priors.
        col = jax.lax.broadcasted_iota(jnp.int32, y.shape, dimension=1)
        is_conf = jnp.logical_and(col >= 4, col < 4 + num_classes)
        logits = jnp.where(is_conf, y, -1e30)                       # mask loc / padded lanes
        m = jnp.max(logits, axis=1, keepdims=True)
        lse = m + jnp.log(jnp.sum(jnp.exp(logits - m), axis=1, keepdims=True))
        gold_col = label.astype(jnp.int32) + 4                      # (TM, 1)
        gold = jnp.sum(jnp.where(col == gold_col, y, 0.0), axis=1, keepdims=True)
        ce_row = (lse - gold) * valid                               # (TM, 1)

        # ---- fused accumulator: lane 0 = loss_B, lane 1 = loss_C, lane 2 = num_pos ----
        lane = jax.lax.broadcasted_iota(jnp.int32, acc_ref.shape, dimension=1)
        partial = jnp.where(lane == 0, jnp.sum(loc_row, axis=0, keepdims=True),
                  jnp.where(lane == 1, jnp.sum(ce_row, axis=0, keepdims=True),
                  jnp.where(lane == 2, jnp.sum(pos, axis=0, keepdims=True), 0.0)))
        acc_ref[...] += partial

    return kernel


def init_params(key, c_in, hidden=HIDDEN, num_classes=NUM_CLASSES):
    k1, k2, k3, k4, k5, k6 = jax.random.split(key, 6)
    s1 = 1.0 / math.sqrt(c_in)
    s2 = 1.0 / math.sqrt(hidden)
    return {
        "w1": jax.random.normal(k1, (c_in, hidden), jnp.float32) * s1,
        "b1": jax.random.normal(k2, (hidden,), jnp.float32) * 0.01,
        "w_loc": jax.random.normal(k3, (hidden, 4), jnp.float32) * s2,
        "b_loc": jax.random.normal(k4, (4,), jnp.float32) * 0.01,
        "w_conf": jax.random.normal(k5, (hidden, num_classes), jnp.float32) * s2,
        "b_conf": jax.random.normal(k6, (num_classes,), jnp.float32) * 0.01,
    }


def net_loss_forward(params, images, gt_boxes, gt_labels, num_classes=NUM_CLASSES):
    """NetLoss.forward analogue: run the net and return the loss dict {'B','C'}."""
    # TODO(synk): masks / num_crowds (mask, lincomb and semantic-seg losses) are not
    # modeled; only the box ('B') and confidence ('C') terms of MultiBoxLoss are produced.
    B, C_in, H, W = images.shape
    hidden = params["w1"].shape[1]
    N = B * H * W

    # Row tiling: up to 1024 rows/step; a leading grid axis of size NCORES shards rows
    # across TensorCores on v7x and is a harmless serial loop on single-TC v5e/v6e.
    rows_per_core = _round_up(pl.cdiv(N, NCORES), 8)
    TM = min(1024, rows_per_core)
    N_pad = _round_up(N, NCORES * TM)
    steps = N_pad // (NCORES * TM)

    # Keep x near its native channel width: only round C_in up to a sublane multiple
    # (f32) when C_in << 128; wide backbones use bf16 with 128-multiple lanes.
    small_cin = C_in < 128
    in_dt = jnp.float32 if small_cin else jnp.bfloat16
    CIN_P = _round_up(C_in, 8) if small_cin else _round_up(C_in, 128)
    HID_P = _round_up(hidden, 128)
    head = 4 + num_classes
    HEAD_P = _round_up(head, 128)

    # NCHW -> NHWC -> (N, C_in): the 1x1 heads become plain MXU matmuls.
    x = jnp.transpose(images, (0, 2, 3, 1)).reshape(N, C_in).astype(in_dt)
    x_p = jnp.pad(x, ((0, N_pad - N), (0, CIN_P - C_in)))

    w1_p = jnp.pad(params["w1"].astype(in_dt),
                   ((0, CIN_P - C_in), (0, HID_P - hidden)))
    b1_p = jnp.pad(params["b1"], (0, HID_P - hidden)).reshape(1, HID_P)
    wh_p = jnp.pad(jnp.concatenate([params["w_loc"], params["w_conf"]], axis=1),
                   ((0, HID_P - hidden), (0, HEAD_P - head))).astype(jnp.bfloat16)
    bh_p = jnp.pad(jnp.concatenate([params["b_loc"], params["b_conf"]]),
                   (0, HEAD_P - head)).reshape(1, HEAD_P)

    # Packed targets: one 8-lane f32 stream [box(4) | label(1) | 0 0 0].  Padded rows
    # carry label = -1 so they are neutralized inside the kernel.
    gt = jnp.concatenate(
        [gt_boxes.astype(jnp.float32),
         gt_labels.astype(jnp.float32)[:, None],
         jnp.zeros((N, 3), jnp.float32)], axis=1)
    if N_pad > N:
        pad_rows = jnp.zeros((N_pad - N, 8), jnp.float32).at[:, 4].set(-1.0)
        gt = jnp.concatenate([gt, pad_rows], axis=0)

    def row_map(p, i):
        return (p * steps + i, 0)

    def stream_spec(shape):
        # Deeper pipelining on the streaming inputs once there are enough grid steps.
        if steps > 2:
            return pl.BlockSpec(shape, row_map, pipeline_mode=pl.Buffered(3))
        return pl.BlockSpec(shape, row_map)

    def const_spec(shape):
        return pl.BlockSpec(shape, lambda p, i: (0, 0))

    grid = (NCORES, steps)
    kernel = _make_kernel(num_classes)

    flops = 2 * N_pad * (CIN_P * HID_P + HID_P * HEAD_P)
    bytes_accessed = int(
        x_p.size * x_p.dtype.itemsize + gt.size * 4
        + w1_p.size * w1_p.dtype.itemsize + b1_p.size * 4
        + wh_p.size * 2 + bh_p.size * 4 + NCORES * 8 * 128 * 4)
    cost = pl.CostEstimate(flops=flops, transcendentals=N_pad * HEAD_P,
                           bytes_accessed=bytes_accessed)

    out = pl.pallas_call(
        kernel,
        out_shape=jax.ShapeDtypeStruct((NCORES * 8, 128), jnp.float32),
        grid=grid,
        in_specs=[
            stream_spec((TM, CIN_P)),          # image rows (streamed)
            const_spec((CIN_P, HID_P)),        # conv weight (grid-invariant)
            const_spec((1, HID_P)),            # conv bias
            const_spec((HID_P, HEAD_P)),       # fused [loc|conf] weight (bf16)
            const_spec((1, HEAD_P)),           # fused [loc|conf] bias
            stream_spec((TM, 8)),              # packed [box|label] targets (streamed)
        ],
        # One (8,128) loss-accumulator block per core, resident across the row axis.
        out_specs=pl.BlockSpec((8, 128), lambda p, i: (p, 0)),
        compiler_params=pltpu.CompilerParams(
            dimension_semantics=("parallel", "arbitrary"),
            vmem_limit_bytes=32 * 1024 * 1024,
        ),
        cost_estimate=cost,
    )(x_p, w1_p, b1_p, wh_p, bh_p, gt)

    acc = out.reshape(NCORES, 8, 128)[:, 0, :]           # (NCORES, 128); lanes 0/1/2 used
    loss_b = jnp.sum(acc[:, 0])
    loss_c = jnp.sum(acc[:, 1])
    num_pos = jnp.maximum(jnp.sum(acc[:, 2]), 1.0)       # guard num_pos == 0
    return {"B": loss_b / num_pos, "C": loss_c / num_pos}


def net_loss_reference(params, images, gt_boxes, gt_labels, num_classes=NUM_CLASSES):
    """Pure-JAX reference matching the kernel's mixed-precision path."""
    B, C_in, H, W = images.shape
    x = jnp.transpose(images, (0, 2, 3, 1)).reshape(-1, C_in)
    in_dt = jnp.float32 if C_in < 128 else jnp.bfloat16
    h = jnp.dot(x.astype(in_dt), params["w1"].astype(in_dt),
                preferred_element_type=jnp.float32,
                precision=jax.lax.Precision.HIGHEST)
    h = jnp.maximum(h + params["b1"][None, :], 0.0)
    hb = h.astype(jnp.bfloat16)
    loc = jnp.dot(hb, params["w_loc"].astype(jnp.bfloat16),
                  preferred_element_type=jnp.float32) + params["b_loc"][None, :]
    conf = jnp.dot(hb, params["w_conf"].astype(jnp.bfloat16),
                   preferred_element_type=jnp.float32) + params["b_conf"][None, :]
    pos = (gt_labels > 0).astype(jnp.float32)
    d = loc - gt_boxes
    ad = jnp.abs(d)
    sl1 = jnp.where(ad < 1.0, 0.5 * d * d, ad - 0.5).sum(axis=1)
    loss_b = jnp.sum(sl1 * pos)
    lse = jax.nn.logsumexp(conf, axis=1)
    gold = jnp.take_along_axis(conf, gt_labels[:, None], axis=1)[:, 0]
    loss_c = jnp.sum(lse - gold)
    npos = jnp.maximum(jnp.sum(pos), 1.0)
    return {"B": loss_b / npos, "C": loss_c / npos}


if __name__ == "__main__":
    key = jax.random.PRNGKey(0)
    k_img, k_box, k_lbl, k_par = jax.random.split(key, 4)

    B, C_in, H, W = 2, 4, 16, 16           # small demo shapes; N = B*H*W = 512 priors
    images = jax.random.normal(k_img, (B, C_in, H, W), jnp.float32)
    N = B * H * W
    gt_boxes = jax.random.normal(k_box, (N, 4), jnp.float32)       # synthetic encoded targets
    gt_labels = jax.random.randint(k_lbl, (N,), 0, NUM_CLASSES)    # 0 == background

    params = init_params(k_par, C_in)

    loss_fn = jax.jit(lambda p, im, gb, gl: net_loss_forward(p, im, gb, gl))
    losses = jax.block_until_ready(loss_fn(params, images, gt_boxes, gt_labels))

    ref = net_loss_reference(params, images, gt_boxes, gt_labels)
    for k in ("B", "C"):
        a, b = float(losses[k]), float(ref[k])
        assert math.isfinite(a), (k, a)
        # mixed f32-MXU / bf16 paths: allow 1% relative tolerance on the scalar losses
        assert abs(a - b) <= 1e-2 * max(1.0, abs(b)), (k, a, b)

    print("KERNEL_OK")
</pallas_src>

<mosaic_0001>
module attributes {stable_mosaic.version = 11 : i64} {
  func.func @kernel(%arg0: i32, %arg1: i32, %arg2: memref<256x8xf32, #tpu.memory_space<vmem>>, %arg3: memref<8x128xf32, #tpu.memory_space<vmem>>, %arg4: memref<1x128xf32, #tpu.memory_space<vmem>>, %arg5: memref<128x128xbf16, #tpu.memory_space<vmem>>, %arg6: memref<1x128xf32, #tpu.memory_space<vmem>>, %arg7: memref<256x8xf32, #tpu.memory_space<vmem>>, %arg8: memref<8x128xf32, #tpu.memory_space<vmem>>) attributes {dimension_semantics = [#tpu.dimension_semantics<parallel>, #tpu.dimension_semantics<arbitrary>], iteration_bounds = array<i64: 2, 1>, scalar_prefetch = 0 : i64, scratch_operands = 0 : i64, tpu.core_type = #tpu.core_type<tc>, window_params = [{transform_indices = @transform_0, window_bounds = array<i64: 256, 8>}, {pipeline_mode = #tpu.pipeline_mode<synchronous>, transform_indices = @transform_1, window_bounds = array<i64: 8, 128>}, {pipeline_mode = #tpu.pipeline_mode<synchronous>, transform_indices = @transform_2, window_bounds = array<i64: 1, 128>}, {pipeline_mode = #tpu.pipeline_mode<synchronous>, transform_indices = @transform_3, window_bounds = array<i64: 128, 128>}, {pipeline_mode = #tpu.pipeline_mode<synchronous>, transform_indices = @transform_4, window_bounds = array<i64: 1, 128>}, {transform_indices = @transform_5, window_bounds = array<i64: 256, 8>}, {transform_indices = @transform_6, window_bounds = array<i64: 8, 128>}]} {
    %c0_i32 = arith.constant 0 : i32
    %0 = arith.cmpi eq, %arg1, %c0_i32 : i32
    %1 = arith.extui %0 : i1 to i32
    %c0_i32_0 = arith.constant 0 : i32
    %2 = arith.cmpi ne, %1, %c0_i32_0 : i32
    scf.if %2 {
      %cst_40 = arith.constant 0.000000e+00 : f32
      %105 = vector.broadcast %cst_40 : f32 to vector<8x128xf32>
      %c0_41 = arith.constant 0 : index
      %c0_42 = arith.constant 0 : index
      %106 = vector.load %arg8[%c0_41, %c0_42] : memref<8x128xf32, #tpu.memory_space<vmem>>, vector<8x128xf32>
      tpu.vector_store %arg8[%c0_41, %c0_42], %105 {strides = array<i32>} : memref<8x128xf32, #tpu.memory_space<vmem>>, vector<8x128xf32>,
    } else {
    }
    %c0 = arith.constant 0 : index
    %c0_1 = arith.constant 0 : index
    %3 = vector.load %arg2[%c0, %c0_1] : memref<256x8xf32, #tpu.memory_space<vmem>>, vector<256x8xf32>
    %c0_2 = arith.constant 0 : index
    %c0_3 = arith.constant 0 : index
    %4 = vector.load %arg3[%c0_2, %c0_3] : memref<8x128xf32, #tpu.memory_space<vmem>>, vector<8x128xf32>
    %cst = arith.constant dense<0.000000e+00> : vector<256x128xf32>
    %5 = tpu.matmul %3, %4, %cst {dimension_numbers = #tpu.dot_dimension_numbers<[1], [0], [0], [1], [0, 0, 1, 1], [], []>} : vector<256x8xf32>, vector<8x128xf32>, vector<256x128xf32> -> vector<256x128xf32>
    %c0_4 = arith.constant 0 : index
    %c0_5 = arith.constant 0 : index
    %6 = vector.load %arg4[%c0_4, %c0_5] : memref<1x128xf32, #tpu.memory_space<vmem>>, vector<1x128xf32>
    %7 = vector.broadcast %6 : vector<1x128xf32> to vector<256x128xf32>
    %8 = arith.addf %5, %7 : vector<256x128xf32>
    %cst_6 = arith.constant 0.000000e+00 : f32
    %9 = vector.broadcast %cst_6 : f32 to vector<256x128xf32>
    %10 = arith.maximumf %8, %9 : vector<256x128xf32>
    %11 = arith.truncf %10 : vector<256x128xf32> to vector<256x128xbf16>
    %c0_7 = arith.constant 0 : index
    %c0_8 = arith.constant 0 : index
    %12 = vector.load %arg5[%c0_7, %c0_8] : memref<128x128xbf16, #tpu.memory_space<vmem>>, vector<128x128xbf16>
    %cst_9 = arith.constant dense<0.000000e+00> : vector<256x128xf32>
    %13 = tpu.matmul %11, %12, %cst_9 {dimension_numbers = #tpu.dot_dimension_numbers<[1], [0], [0], [1], [0, 0, 1, 1], [], []>} : vector<256x128xbf16>, vector<128x128xbf16>, vector<256x128xf32> -> vector<256x128xf32>
    %c0_10 = arith.constant 0 : index
    %c0_11 = arith.constant 0 : index
    %14 = vector.load %arg6[%c0_10, %c0_11] : memref<1x128xf32, #tpu.memory_space<vmem>>, vector<1x128xf32>
    %15 = vector.broadcast %14 : vector<1x128xf32> to vector<256x128xf32>
    %16 = arith.addf %13, %15 : vector<256x128xf32>
    %c0_12 = arith.constant 0 : index
    %c0_13 = arith.constant 0 : index
    %17 = vector.load %arg7[%c0_12, %c0_13] : memref<256x8xf32, #tpu.memory_space<vmem>>, vector<256x8xf32>
    %18 = tpu.iota {dimensions = array<i32: 1>} : vector<256x8xi32>
    %c4_i32 = arith.constant 4 : i32
    %19 = vector.broadcast %c4_i32 : i32 to vector<256x8xi32>
    %20 = arith.cmpi eq, %18, %19 : vector<256x8xi32>
    %cst_14 = arith.constant 0.000000e+00 : f32
    %21 = vector.broadcast %cst_14 : f32 to vector<256x8xf32>
    %22 = arith.select %20, %17, %21 : vector<256x8xi1>, vector<256x8xf32>
    %cst_15 = arith.constant dense<0.000000e+00> : vector<256xf32>
    %23 = vector.multi_reduction <add>, %22, %cst_15 [1] : vector<256x8xf32> to vector<256xf32>
    %24 = vector.shape_cast %23 : vector<256xf32> to vector<256x1xf32>
    %cst_16 = arith.constant 0.000000e+00 : f32
    %25 = vector.broadcast %cst_16 : f32 to vector<256x1xf32>
    %26 = arith.cmpf oge, %24, %25 : vector<256x1xf32>
    %27 = arith.extui %26 : vector<256x1xi1> to vector<256x1xi32>
    %28 = arith.sitofp %27 : vector<256x1xi32> to vector<256x1xf32>
    %cst_17 = arith.constant 0.000000e+00 : f32
    %29 = vector.broadcast %cst_17 : f32 to vector<256x1xf32>
    %30 = arith.cmpf ogt, %24, %29 : vector<256x1xf32>
    %31 = arith.extui %30 : vector<256x1xi1> to vector<256x1xi32>
    %32 = arith.sitofp %31 : vector<256x1xi32> to vector<256x1xf32>
    %33 = vector.extract_strided_slice %16 {offsets = [0, 0], sizes = [256, 8], strides = [1, 1]} : vector<256x128xf32> to vector<256x8xf32>
    %c4_i32_18 = arith.constant 4 : i32
    %34 = vector.broadcast %c4_i32_18 : i32 to vector<256x8xi32>
    %35 = arith.cmpi slt, %18, %34 : vector<256x8xi32>
    %36 = arith.subf %33, %17 : vector<256x8xf32>
    %cst_19 = arith.constant 0.000000e+00 : f32
    %37 = vector.broadcast %cst_19 : f32 to vector<256x8xf32>
    %38 = arith.select %35, %36, %37 : vector<256x8xi1>, vector<256x8xf32>
    %39 = math.absf %38 : vector<256x8xf32>
    %cst_20 = arith.constant 1.000000e+00 : f32
    %40 = vector.broadcast %cst_20 : f32 to vector<256x8xf32>
    %41 = arith.cmpf olt, %39, %40 : vector<256x8xf32>
    %cst_21 = arith.constant 5.000000e-01 : f32
    %42 = vector.broadcast %cst_21 : f32 to vector<256x8xf32>
    %43 = arith.mulf %42, %38 : vector<256x8xf32>
    %44 = arith.mulf %43, %38 : vector<256x8xf32>
    %cst_22 = arith.constant 5.000000e-01 : f32
    %45 = vector.broadcast %cst_22 : f32 to vector<256x8xf32>
    %46 = arith.subf %39, %45 : vector<256x8xf32>
    %47 = arith.select %41, %44, %46 : vector<256x8xi1>, vector<256x8xf32>
    %cst_23 = arith.constant dense<0.000000e+00> : vector<256xf32>
    %48 = vector.multi_reduction <add>, %47, %cst_23 [1] : vector<256x8xf32> to vector<256xf32>
    %49 = vector.shape_cast %48 : vector<256xf32> to vector<256x1xf32>
    %50 = arith.mulf %49, %32 : vector<256x1xf32>
    %51 = tpu.iota {dimensions = array<i32: 1>} : vector<256x128xi32>
    %c4_i32_24 = arith.constant 4 : i32
    %52 = vector.broadcast %c4_i32_24 : i32 to vector<256x128xi32>
    %53 = arith.cmpi sge, %51, %52 : vector<256x128xi32>
    %c85_i32 = arith.constant 85 : i32
    %54 = vector.broadcast %c85_i32 : i32 to vector<256x128xi32>
    %55 = arith.cmpi slt, %51, %54 : vector<256x128xi32>
    %56 = arith.andi %53, %55 : vector<256x128xi1>
    %cst_25 = arith.constant -1.000000e+30 : f32
    %57 = vector.broadcast %cst_25 : f32 to vector<256x128xf32>
    %58 = arith.select %56, %16, %57 : vector<256x128xi1>, vector<256x128xf32>
    %cst_26 = arith.constant dense<0xFF800000> : vector<256xf32>
    %59 = vector.multi_reduction <maximumf>, %58, %cst_26 [1] : vector<256x128xf32> to vector<256xf32>
    %60 = vector.shape_cast %59 : vector<256xf32> to vector<256x1xf32>
    %61 = vector.broadcast %60 : vector<256x1xf32> to vector<256x128xf32>
    %62 = arith.subf %58, %61 : vector<256x128xf32>
    %63 = math.exp %62 : vector<256x128xf32>
    %cst_27 = arith.constant dense<0.000000e+00> : vector<256xf32>
    %64 = vector.multi_reduction <add>, %63, %cst_27 [1] : vector<256x128xf32> to vector<256xf32>
    %65 = vector.shape_cast %64 : vector<256xf32> to vector<256x1xf32>
    %66 = math.log %65 : vector<256x1xf32>
    %67 = arith.addf %60, %66 : vector<256x1xf32>
    %68 = arith.fptosi %24 : vector<256x1xf32> to vector<256x1xi32>
    %c4_i32_28 = arith.constant 4 : i32
    %69 = vector.broadcast %c4_i32_28 : i32 to vector<256x1xi32>
    %70 = arith.addi %68, %69 : vector<256x1xi32>
    %71 = vector.broadcast %70 : vector<256x1xi32> to vector<256x128xi32>
    %72 = arith.cmpi eq, %51, %71 : vector<256x128xi32>
    %cst_29 = arith.constant 0.000000e+00 : f32
    %73 = vector.broadcast %cst_29 : f32 to vector<256x128xf32>
    %74 = arith.select %72, %16, %73 : vector<256x128xi1>, vector<256x128xf32>
    %cst_30 = arith.constant dense<0.000000e+00> : vector<256xf32>
    %75 = vector.multi_reduction <add>, %74, %cst_30 [1] : vector<256x128xf32> to vector<256xf32>
    %76 = vector.shape_cast %75 : vector<256xf32> to vector<256x1xf32>
    %77 = arith.subf %67, %76 : vector<256x1xf32>
    %78 = arith.mulf %77, %28 : vector<256x1xf32>
    %79 = tpu.iota {dimensions = array<i32: 1>} : vector<8x128xi32>
    %c0_i32_31 = arith.constant 0 : i32
    %80 = vector.broadcast %c0_i32_31 : i32 to vector<8x128xi32>
    %81 = arith.cmpi eq, %79, %80 : vector<8x128xi32>
    %cst_32 = arith.constant dense<0.000000e+00> : vector<1xf32>
    %82 = vector.multi_reduction <add>, %50, %cst_32 [0] : vector<256x1xf32> to vector<1xf32>
    %83 = vector.shape_cast %82 : vector<1xf32> to vector<1x1xf32>
    %c1_i32 = arith.constant 1 : i32
    %84 = vector.broadcast %c1_i32 : i32 to vector<8x128xi32>
    %85 = arith.cmpi eq, %79, %84 : vector<8x128xi32>
    %cst_33 = arith.constant dense<0.000000e+00> : vector<1xf32>
    %86 = vector.multi_reduction <add>, %78, %cst_33 [0] : vector<256x1xf32> to vector<1xf32>
    %87 = vector.shape_cast %86 : vector<1xf32> to vector<1x1xf32>
    %c2_i32 = arith.constant 2 : i32
    %88 = vector.broadcast %c2_i32 : i32 to vector<8x128xi32>
    %89 = arith.cmpi eq, %79, %88 : vector<8x128xi32>
    %cst_34 = arith.constant dense<0.000000e+00> : vector<1xf32>
    %90 = vector.multi_reduction <add>, %32, %cst_34 [0] : vector<256x1xf32> to vector<1xf32>
    %91 = vector.shape_cast %90 : vector<1xf32> to vector<1x1xf32>
    %cst_35 = arith.constant 0.000000e+00 : f32
    %92 = vector.shape_cast %91 : vector<1x1xf32> to vector<1x1xf32>
    %93 = vector.broadcast %92 : vector<1x1xf32> to vector<8x128xf32>
    %94 = vector.broadcast %cst_35 : f32 to vector<8x128xf32>
    %95 = arith.select %89, %93, %94 : vector<8x128xi1>, vector<8x128xf32>
    %96 = vector.shape_cast %87 : vector<1x1xf32> to vector<1x1xf32>
    %97 = vector.broadcast %96 : vector<1x1xf32> to vector<8x128xf32>
    %98 = arith.select %85, %97, %95 : vector<8x128xi1>, vector<8x128xf32>
    %99 = vector.shape_cast %83 : vector<1x1xf32> to vector<1x1xf32>
    %100 = vector.broadcast %99 : vector<1x1xf32> to vector<8x128xf32>
    %101 = arith.select %81, %100, %98 : vector<8x128xi1>, vector<8x128xf32>
    %c0_36 = arith.constant 0 : index
    %c0_37 = arith.constant 0 : index
    %102 = vector.load %arg8[%c0_36, %c0_37] : memref<8x128xf32, #tpu.memory_space<vmem>>, vector<8x128xf32>
    %103 = arith.addf %102, %101 : vector<8x128xf32>
    %c0_38 = arith.constant 0 : index
    %c0_39 = arith.constant 0 : index
    %104 = vector.load %arg8[%c0_38, %c0_39] : memref<8x128xf32, #tpu.memory_space<vmem>>, vector<8x128xf32>
    tpu.vector_store %arg8[%c0_38, %c0_39], %103 {strides = array<i32>} : memref<8x128xf32, #tpu.memory_space<vmem>>, vector<8x128xf32>,
    return
  }
  func.func @transform_0(%arg0: i32, %arg1: i32) -> (i32, i32) {
    %c1_i32 = arith.constant 1 : i32
    %0 = arith.muli %arg0, %c1_i32 : i32
    %1 = arith.addi %0, %arg1 : i32
    %c0_i32 = arith.constant 0 : i32
    %c0_i32_0 = arith.constant 0 : i32
    return %1, %c0_i32 : i32, i32
  }
  func.func @transform_1(%arg0: i32, %arg1: i32) -> (i32, i32) {
    %c0_i32 = arith.constant 0 : i32
    %c0_i32_0 = arith.constant 0 : i32
    %c0_i32_1 = arith.constant 0 : i32
    return %c0_i32, %c0_i32_0 : i32, i32
  }
  func.func @transform_2(%arg0: i32, %arg1: i32) -> (i32, i32) {
    %c0_i32 = arith.constant 0 : i32
    %c0_i32_0 = arith.constant 0 : i32
    %c0_i32_1 = arith.constant 0 : i32
    return %c0_i32, %c0_i32_0 : i32, i32
  }
  func.func @transform_3(%arg0: i32, %arg1: i32) -> (i32, i32) {
    %c0_i32 = arith.constant 0 : i32
    %c0_i32_0 = arith.constant 0 : i32
    %c0_i32_1 = arith.constant 0 : i32
    return %c0_i32, %c0_i32_0 : i32, i32
  }
  func.func @transform_4(%arg0: i32, %arg1: i32) -> (i32, i32) {
    %c0_i32 = arith.constant 0 : i32
    %c0_i32_0 = arith.constant 0 : i32
    %c0_i32_1 = arith.constant 0 : i32
    return %c0_i32, %c0_i32_0 : i32, i32
  }
  func.func @transform_5(%arg0: i32, %arg1: i32) -> (i32, i32) {
    %c1_i32 = arith.constant 1 : i32
    %0 = arith.muli %arg0, %c1_i32 : i32
    %1 = arith.addi %0, %arg1 : i32
    %c0_i32 = arith.constant 0 : i32
    %c0_i32_0 = arith.constant 0 : i32
    return %1, %c0_i32 : i32, i32
  }
  func.func @transform_6(%arg0: i32, %arg1: i32) -> (i32, i32) {
    %c0_i32 = arith.constant 0 : i32
    %c0_i32_0 = arith.constant 0 : i32
    return %arg0, %c0_i32 : i32, i32
  }
}

</mosaic_0001>

<bundles_post_ra>
// kernel: _lambda_.1
= control target key start
LH: loop header
LB: loop body
LE: loop exit
PB: predicated region body
PF: predicated region fallthrough
CT: control target
= control target key end

     0   :  { %s2897_s21 = smov 0   ;;  %s2899_s22 = smov 0   ;;  %s4479_s0 = inlined_call_operand.vmem [shape: f32[512,8], index: 0, kind: input, shape index: {}]   ;;  %s4480_s1 = inlined_call_operand.vmem [shape: f32[8,128], index: 1, kind: input, shape index: {}]   ;;  %s4481_s2 = inlined_call_operand.vmem [shape: f32[1,128], index: 2, kind: input, shape index: {}]   ;;  %s4482_s3 = inlined_call_operand.vmem [shape: bf16[128,128], index: 3, kind: input, shape index: {}]   ;;  %s4483_s4 = inlined_call_operand.vmem [shape: f32[1,128], index: 4, kind: input, shape index: {}]   ;;  %s4484_s5 = inlined_call_operand.vmem [shape: f32[512,8], index: 5, kind: input, shape index: {}]   ;;  %s4485_s6 = inlined_call_operand.vmem [shape: f32[16,128], index: 6, kind: output, shape index: {}]  }
   0x1   :  { %s2901_s23 = smov 0  }
   0x2 LB: > { %s28_s24 = sadd.s32 1, %s2855_s22  ;;  %p2305_p0 = scmp.ge.s32.totalorder %s2859_s23, 1  ;;  %s2859_s23 = sphi %s2901_s23, %s16_s23   ;;  %s2855_s22 = sphi %s2899_s22, %s4743_s22   ;;  %s2851_s21 = sphi %s2897_s21, %s4742_s21  }
   0x3   : > { %p30_p1 = scmp.ge.s32.totalorder %s28_s24, 2  ;;  %p244_p2 = scmp.lt.s32.totalorder %s2859_s23, 3 }
   0x5   : > { %s4745_s24 = smov (%p30_p1, %s28_s24), 0  ;;  %p245_p3 = pnand %p2305_p0, %p244_p2 }
   0x7   : > { %248 = sbr.rel (%p245_p3) target bundleno = 849 (0x351), region = 44 }
   0xc   : > { %v337_v0 = vld [vmem:[%s4480_s1] sm:$0xff]  ;;  %s2306_s27 = sshll.u32 %s2851_s21, 5  ;;  %vm342_vm0 = vcmask 64512   ;;  %v2480_v21 = vld [vmem:[%s4482_s3 + $0x38] sm:$0xff]  ;;  %v2479_v24 = vld [vmem:[%s4482_s3 + $0x30] sm:$0xff]  ;;  %v789_v30 = vlaneseq  ;;  %p296_p5 = scmp.lt.s32.totalorder %s2851_s21, 1 }
   0xd   : > { %454 = vmatpush.msra.mxu0 %v337_v0  ;;  %2481 = vmatpush.msra.mxu3 %v337_v0  ;;  %p282_p4 = scmp.lt.s32.totalorder %s2306_s27, 63  ;;  %v2478_v25 = vld [vmem:[%s4482_s3 + $0x28] sm:$0xff]  ;;  %v2477_v28 = vld [vmem:[%s4482_s3 + $0x20] sm:$0xff]  ;;  %v2476_v29 = vld [vmem:[%s4482_s3 + $0x18] sm:$0xff] }
   0xe   : > { %668 = vmatpush.bf16.msra.mxu1 %v2480_v21  ;;  %2482 = vmatpush.bf16.msra.mxu2 %v2480_v21  ;;  %v3003_v33 = vand.u32 127, %v789_v30  ;;  %v2475_v34 = vld [vmem:[%s4482_s3 + $0x10] sm:$0xff]  ;;  %v2474_v41 = vld [vmem:[%s4482_s3 + $0x8] sm:$0xff]  ;;  %v2473_v47 = vld [vmem:[%s4482_s3] sm:$0xff]  ;;  %s4749_s21 = smov (!%p296_p5, %s2851_s21), 1 }
   0xf   : > { %s4747_s27 = smov (!%p282_p4, %s2306_s27), 63  ;;  %2483 = vmatpush.bf16.msrb.mxu3 %v2480_v21  ;;  %s2310_s13 = sshll.u32 %s4749_s21, 3 }
  0x10   : > { %s2307_s28 = sshll.u32 %s4747_s27, 3  ;;  %vm791_vm1 = vcmp.eq.s32.totalorder %v3003_v33, 4  ;;  %s299_s16 = scalar_lea.vmem %s4485_s6, %s2310_s13 }
  0x11   : > { %s2929_s7 = scalar_lea.vmem %s4479_s0, %s2307_s28  ;;  %s2999_s20 = scalar_lea.vmem %s4484_s5, %s2307_s28 }
  0x12   : > { %v305_v1 = vld [vmem:[%s2929_s7] sm:$0xff]  ;;  %v323_v2 = vld [vmem:[%s2929_s7 + $0x90] sm:$0xff]  ;;  %v306_v3 = vld [vmem:[%s2929_s7 + $0x8] sm:$0xff]  ;;  %669 = vmatpush.bf16.msra.mxu1 %v2479_v24  ;;  %2484 = vmatpush.bf16.msra.mxu2 %v2479_v24 }
  0x13   : > { %2311 = vmatmul.msk.f32.vlgmr.msra.gmra.mxu0 %vm342_vm0, %v305_v1  ;;  %2329 = vmatmul.msk.f32.vlgmr.msra.gmra.mxu3 %vm342_vm0, %v323_v2  ;;  %v324_v4 = vld [vmem:[%s2929_s7 + $0x98] sm:$0xff]  ;;  %v307_v5 = vld [vmem:[%s2929_s7 + $0x10] sm:$0xff]  ;;  %v325_v6 = vld [vmem:[%s2929_s7 + $0xa0] sm:$0xff] }
  0x14   : > { %v308_v7 = vld [vmem:[%s2929_s7 + $0x18] sm:$0xff]  ;;  %v326_v8 = vld [vmem:[%s2929_s7 + $0xa8] sm:$0xff]  ;;  %v309_v9 = vld [vmem:[%s2929_s7 + $0x20] sm:$0xff]  ;;  %2485 = vmatpush.bf16.msrb.mxu3 %v2479_v24 }
  0x15   : > { %v327_v10 = vld [vmem:[%s2929_s7 + $0xb0] sm:$0xff]  ;;  %v310_v11 = vld [vmem:[%s2929_s7 + $0x28] sm:$0xff]  ;;  %v328_v12 = vld [vmem:[%s2929_s7 + $0xb8] sm:$0xff] }
  0x16   : > { %v311_v13 = vld [vmem:[%s2929_s7 + $0x30] sm:$0xff]  ;;  %v329_v14 = vld [vmem:[%s2929_s7 + $0xc0] sm:$0xff]  ;;  %v312_v15 = vld [vmem:[%s2929_s7 + $0x38] sm:$0xff]  ;;  %670 = vmatpush.bf16.msra.mxu1 %v2478_v25  ;;  %2486 = vmatpush.bf16.msra.mxu2 %v2478_v25 }
  0x17   : > { %v330_v16 = vld [vmem:[%s2929_s7 + $0xc8] sm:$0xff]  ;;  %v313_v17 = vld [vmem:[%s2929_s7 + $0x40] sm:$0xff]  ;;  %v331_v18 = vld [vmem:[%s2929_s7 + $0xd0] sm:$0xff] }
  0x18   : > { %v314_v19 = vld [vmem:[%s2929_s7 + $0x48] sm:$0xff]  ;;  %v332_v20 = vld [vmem:[%s2929_s7 + $0xd8] sm:$0xff]  ;;  %v315_v22 = vld [vmem:[%s2929_s7 + $0x50] sm:$0xff]  ;;  %2487 = vmatpush.bf16.msrb.mxu3 %v2478_v25 }
  0x19   : > { %v333_v23 = vld [vmem:[%s2929_s7 + $0xe0] sm:$0xff]  ;;  %v316_v26 = vld [vmem:[%s2929_s7 + $0x58] sm:$0xff]  ;;  %v334_v27 = vld [vmem:[%s2929_s7 + $0xe8] sm:$0xff] }
  0x1a   : > { %671 = vmatpush.bf16.msra.mxu1 %v2477_v28  ;;  %2488 = vmatpush.bf16.msra.mxu2 %v2477_v28  ;;  %v317_v31 = vld [vmem:[%s2929_s7 + $0x60] sm:$0xff]  ;;  %v335_v32 = vld [vmem:[%s2929_s7 + $0xf0] sm:$0xff]  ;;  %v318_v42 = vld [vmem:[%s2929_s7 + $0x68] sm:$0xff] }
  0x1b   : > { %2312 = vmatmul.msk.f32.gmra.mxu0 %vm342_vm0, %v306_v3  ;;  %2330 = vmatmul.msk.f32.gmra.mxu3 %vm342_vm0, %v324_v4  ;;  %v3009_v35 = vld [vmem:[%s2999_s20] sm:$0xff]  ;;  %v3019_v38 = vld [vmem:[%s2999_s20 + $0x10] sm:$0xff]  ;;  %v336_v43 = vld [vmem:[%s2929_s7 + $0xf8] sm:$0xff] }
  0x1c   : > { %2489 = vmatpush.bf16.msrb.mxu3 %v2477_v28  ;;  %v792_v36 = vsel %vm791_vm1, %v3009_v35, 0.0  ;;  %v794_v39 = vsel %vm791_vm1, %v3019_v38, 0.0  ;;  %v3031_v44 = vld [vmem:[%s2999_s20 + $0x20] sm:$0xff]  ;;  %v3041_v48 = vld [vmem:[%s2999_s20 + $0x8] sm:$0xff]  ;;  %v3050_v51 = vld [vmem:[%s2999_s20 + $0x18] sm:$0xff] }
  0x1d   : > { %v824_v37 = vsel %vm342_vm0, %v792_v36, 0.0  ;;  %v830_v40 = vsel %vm342_vm0, %v794_v39, 0.0  ;;  %v796_v45 = vsel %vm791_vm1, %v3031_v44, 0.0  ;;  %v793_v49 = vsel %vm791_vm1, %v3041_v48, 0.0  ;;  %v319_v54 = vld [vmem:[%s2929_s7 + $0x70] sm:$0xff]  ;;  %v3058_v55 = vld [vmem:[%s2999_s20 + $0x28] sm:$0xff] }
  0x1e   : > { %672 = vmatpush.bf16.msra.mxu1 %v2476_v29  ;;  %2490 = vmatpush.bf16.msra.mxu2 %v2476_v29  ;;  %v836_v46 = vsel %vm342_vm0, %v796_v45, 0.0  ;;  %v827_v50 = vsel %vm342_vm0, %v793_v49, 0.0  ;;  %v795_v52 = vsel %vm791_vm1, %v3050_v51, 0.0  ;;  %v797_v56 = vsel %vm791_vm1, %v3058_v55, 0.0  ;;  %v3065_v58 = vld [vmem:[%s2999_s20 + $0x30] sm:$0xff]  ;;  %v3073_v61 = vld [vmem:[%s2999_s20 + $0x38] sm:$0xff] }
  0x1f   : > { %825 = vadd.xlane.f32.xlu0 %v824_v37  ;;  %831 = vadd.xlane.f32.xlu1 %v830_v40  ;;  %v833_v53 = vsel %vm342_vm0, %v795_v52, 0.0  ;;  %v839_v57 = vsel %vm342_vm0, %v797_v56, 0.0  ;;  %v798_v59 = vsel %vm791_vm1, %v3065_v58, 0.0  ;;  %v799_v62 = vsel %vm791_vm1, %v3073_v61, 0.0  ;;  %v320_v0 = vld [vmem:[%s2929_s7 + $0x78] sm:$0xff]  ;;  %v765_v1 = vld [vmem:[%s2999_s20 + $0x40] sm:$0xff] }
  0x20   : > { %2491 = vmatpush.bf16.msrb.mxu3 %v2476_v29  ;;  %837 = vadd.xlane.f32.xlu2 %v836_v46  ;;  %v842_v60 = vsel %vm342_vm0, %v798_v59, 0.0  ;;  %v845_v63 = vsel %vm342_vm0, %v799_v62, 0.0  ;;  %v800_v2 = vsel %vm791_vm1, %v765_v1, 0.0  ;;  %v766_v4 = vld [vmem:[%s2999_s20 + $0x48] sm:$0xff]  ;;  %v772_v30 = vld [vmem:[%s2999_s20 + $0x78] sm:$0xff]  ;;  %v773_v37 = vld [vmem:[%s2999_s20 + $0x80] sm:$0xff] }
  0x21   : > { %v848_v3 = vsel %vm342_vm0, %v800_v2, 0.0  ;;  %v322_v25 = vld [vmem:[%s2929_s7 + $0x88] sm:$0xff] }
  0x22   : > { %673 = vmatpush.bf16.msra.mxu1 %v2475_v34  ;;  %2492 = vmatpush.bf16.msra.mxu2 %v2475_v34 }
  0x23   : > { %2313 = vmatmul.msk.f32.gmra.mxu0 %vm342_vm0, %v307_v5  ;;  %2331 = vmatmul.msk.f32.gmra.mxu3 %vm342_vm0, %v325_v6  ;;  %v801_v5 = vsel %vm791_vm1, %v766_v4, 0.0 }
  0x24   : > { %2493 = vmatpush.bf16.msrb.mxu3 %v2475_v34  ;;  %v851_v6 = vsel %vm342_vm0, %v801_v5, 0.0  ;;  %v807_v34 = vsel %vm791_vm1, %v772_v30, 0.0  ;;  %v782_v30 = vld [vmem:[%s2999_s20 + $0xc8] sm:$0xff] }
  0x25   : > { %v869_v36 = vsel %vm342_vm0, %v807_v34, 0.0 }
  0x26   : > { %674 = vmatpush.bf16.msra.mxu1 %v2474_v41  ;;  %2494 = vmatpush.bf16.msra.mxu2 %v2474_v41 }
  0x27   : > { %828 = vadd.xlane.f32.xlu0 %v827_v50  ;;  %834 = vadd.xlane.f32.xlu1 %v833_v53 }
  0x28   : > { %2495 = vmatpush.bf16.msrb.mxu3 %v2474_v41  ;;  %840 = vadd.xlane.f32.xlu2 %v839_v57  ;;  %v808_v41 = vsel %vm791_vm1, %v773_v37, 0.0 }
  0x2a   : > { %675 = vmatpush.bf16.msra.mxu1 %v2473_v47  ;;  %2496 = vmatpush.bf16.msra.mxu2 %v2473_v47 }
  0x2b   : > { %2314 = vmatmul.msk.f32.gmra.mxu0 %vm342_vm0, %v308_v7  ;;  %2332 = vmatmul.msk.f32.gmra.mxu3 %vm342_vm0, %v326_v8  ;;  %v767_v7 = vld [vmem:[%s2999_s20 + $0x50] sm:$0xff] }
  0x2c   : > { %2497 = vmatpush.bf16.msrb.mxu3 %v2473_v47  ;;  %v802_v8 = vsel %vm791_vm1, %v767_v7, 0.0  ;;  %v774_v47 = vld [vmem:[%s2999_s20 + $0x88] sm:$0xff] }
  0x2d   : > { %v809_v52 = vsel %vm791_vm1, %v774_v47, 0.0  ;;  %v778_v7 = vld [vmem:[%s2999_s20 + $0xa8] sm:$0xff] }
  0x2e   : > { %v875_v53 = vsel %vm342_vm0, %v809_v52, 0.0 }
  0x2f   : > { %843 = vadd.xlane.f32.xlu0 %v842_v60  ;;  %846 = vadd.xlane.f32.xlu1 %v845_v63  ;;  %v776_v60 = vld [vmem:[%s2999_s20 + $0x98] sm:$0xff] }
  0x30   : > { %849 = vadd.xlane.f32.xlu2 %v848_v3  ;;  %v811_v62 = vsel %vm791_vm1, %v776_v60, 0.0  ;;  %v777_v3 = vld [vmem:[%s2999_s20 + $0xa0] sm:$0xff] }
  0x31   : > { %v812_v5 = vsel %vm791_vm1, %v777_v3, 0.0 }
  0x33   : > { %2315 = vmatmul.msk.f32.gmra.mxu0 %vm342_vm0, %v309_v9  ;;  %2333 = vmatmul.msk.f32.gmra.mxu3 %vm342_vm0, %v327_v10  ;;  %v854_v9 = vsel %vm342_vm0, %v802_v8, 0.0 }
  0x37   : > { %852 = vadd.xlane.f32.xlu0 %v851_v6  ;;  %855 = vadd.xlane.f32.xlu1 %v854_v9  ;;  %v884_v6 = vsel %vm342_vm0, %v812_v5, 0.0 }
  0x3b   : > { %2316 = vmatmul.msk.f32.gmra.mxu0 %vm342_vm0, %v310_v11  ;;  %2334 = vmatmul.msk.f32.gmra.mxu3 %vm342_vm0, %v328_v12  ;;  %v321_v11 = vld [vmem:[%s2929_s7 + $0x80] sm:$0xff]  ;;  %v768_v12 = vld [vmem:[%s2999_s20 + $0x58] sm:$0xff] }
  0x43   : > { %2317 = vmatmul.msk.f32.gmra.mxu0 %vm342_vm0, %v311_v13  ;;  %2335 = vmatmul.msk.f32.gmra.mxu3 %vm342_vm0, %v329_v14  ;;  %v803_v13 = vsel %vm791_vm1, %v768_v12, 0.0  ;;  %v779_v12 = vld [vmem:[%s2999_s20 + $0xb0] sm:$0xff] }
  0x44   : > { %v857_v14 = vsel %vm342_vm0, %v803_v13, 0.0 }
  0x45   : > { %858 = vadd.xlane.f32.xlu2 %v857_v14 }
  0x4b   : > { %2318 = vmatmul.msk.f32.gmra.mxu0 %vm342_vm0, %v312_v15  ;;  %2336 = vmatmul.msk.f32.gmra.mxu3 %vm342_vm0, %v330_v16  ;;  %v769_v15 = vld [vmem:[%s2999_s20 + $0x60] sm:$0xff] }
  0x4c   : > { %v3102_v16 = vld [vmem:[%s4481_s2] ss:$0 sm:$0xff] }
  0x53   : > { %2319 = vmatmul.msk.f32.gmra.mxu0 %vm342_vm0, %v313_v17  ;;  %2337 = vmatmul.msk.f32.gmra.mxu3 %vm342_vm0, %v331_v18  ;;  %v804_v17 = vsel %vm791_vm1, %v769_v15, 0.0  ;;  %v814_v15 = vsel %vm791_vm1, %v779_v12, 0.0 }
  0x54   : > { %v860_v18 = vsel %vm342_vm0, %v804_v17, 0.0 }
  0x55   : > { %861 = vadd.xlane.f32.xlu0 %v860_v18  ;;  %v890_v18 = vsel %vm342_vm0, %v814_v15, 0.0 }
  0x5b   : > { %2320 = vmatmul.msk.f32.gmra.mxu0 %vm342_vm0, %v314_v19  ;;  %2338 = vmatmul.msk.f32.gmra.mxu3 %vm342_vm0, %v332_v20  ;;  %v770_v19 = vld [vmem:[%s2999_s20 + $0x68] sm:$0xff] }
  0x5c   : > { %v805_v20 = vsel %vm791_vm1, %v770_v19, 0.0 }
  0x5d   : > { %870 = vadd.xlane.f32.xlu0 %v869_v36 }
  0x63   : > { %2321 = vmatmul.msk.f32.gmra.mxu0 %vm342_vm0, %v315_v22  ;;  %2339 = vmatmul.msk.f32.gmra.mxu3 %vm342_vm0, %v333_v23  ;;  %v863_v22 = vsel %vm342_vm0, %v805_v20, 0.0 }
  0x64   : > { %864 = vadd.xlane.f32.xlu1 %v863_v22 }
  0x6b   : > { %2322 = vmatmul.msk.f32.gmra.mxu0 %vm342_vm0, %v316_v26  ;;  %2340 = vmatmul.msk.f32.gmra.mxu3 %vm342_vm0, %v334_v27  ;;  %v771_v26 = vld [vmem:[%s2999_s20 + $0x70] sm:$0xff] }
  0x6c   : > { %v806_v28 = vsel %vm791_vm1, %v771_v26, 0.0  ;;  %v781_v26 = vld [vmem:[%s2999_s20 + $0xc0] sm:$0xff] }
  0x6d   : > { %v866_v29 = vsel %vm342_vm0, %v806_v28, 0.0 }
  0x6e   : > { %867 = vadd.xlane.f32.xlu2 %v866_v29 }
  0x73   : > { %2323 = vmatmul.msk.f32.gmra.mxu0 %vm342_vm0, %v317_v31  ;;  %2341 = vmatmul.msk.f32.gmra.mxu3 %vm342_vm0, %v335_v32 }
  0x76   : > { %876 = vadd.xlane.f32.xlu2 %v875_v53 }
  0x7b   : > { %2324 = vmatmul.msk.f32.gmra.mxu0 %vm342_vm0, %v318_v42  ;;  %2342 = vmatmul.msk.f32.gmra.mxu3 %vm342_vm0, %v336_v43  ;;  %v872_v43 = vsel %vm342_vm0, %v808_v41, 0.0 }
  0x7c   : > { %873 = vadd.xlane.f32.xlu1 %v872_v43  ;;  %v784_v43 = vld [vmem:[%s2999_s20 + $0xd8] sm:$0xff] }
  0x7d   : > { %v819_v47 = vsel %vm791_vm1, %v784_v43, 0.0 }
  0x7e   : > { %885 = vadd.xlane.f32.xlu2 %v884_v6 }
  0x83   : > { %2325 = vmatmul.msk.f32.gmra.mxu0 %vm342_vm0, %v319_v54  ;;  %v775_v54 = vld [vmem:[%s2999_s20 + $0x90] sm:$0xff] }
  0x84   : > { %v810_v56 = vsel %vm791_vm1, %v775_v54, 0.0 }
  0x85   : > { %v878_v59 = vsel %vm342_vm0, %v810_v56, 0.0 }
  0x86   : > { %879 = vadd.xlane.f32.xlu0 %v878_v59 }
  0x8b   : > { %2326 = vmatmul.msk.f32.gmra.mxu0 %vm342_vm0, %v320_v0  ;;  %v881_v0 = vsel %vm342_vm0, %v811_v62, 0.0 }
  0x8c   : > { %882 = vadd.xlane.f32.xlu1 %v881_v0 }
  0x90   : > { %v456_v10 = vpop.f32.mrf.mxu0 }
  0x91   : > { %v457_v23 = vadd.f32 %v3102_v16, %v456_v10  ;;  %v813_v10 = vsel %vm791_vm1, %v778_v7, 0.0 }
  0x93   : > { %2327 = vmatmul.msk.f32.gmra.mxu0 %vm342_vm0, %v321_v11  ;;  %v552_v31 = vmax.f32 %v457_v23, 0.0  ;;  %v887_v11 = vsel %vm342_vm0, %v813_v10, 0.0 }
  0x94   : > { %888 = vadd.xlane.f32.xlu0 %v887_v11  ;;  %891 = vadd.xlane.f32.xlu1 %v890_v18 }
  0x96   : > { %v510_v21 = vpop.f32.mrf.mxu3 }
  0x97   : > { %v511_v39 = vadd.f32 %v3102_v16, %v510_v21  ;;  %v780_v21 = vld [vmem:[%s2999_s20 + $0xb8] sm:$0xff] }
  0x98   : > { %v459_v24 = vpop.f32.mrf.mxu0 }
  0x99   : > { %v460_v27 = vadd.f32 %v3102_v16, %v459_v24  ;;  %v570_v49 = vmax.f32 %v511_v39, 0.0  ;;  %v815_v24 = vsel %vm791_vm1, %v780_v21, 0.0  ;;  %v783_v39 = vld [vmem:[%s2999_s20 + $0xd0] sm:$0xff] }
  0x9a   : > { %v818_v41 = vsel %vm791_vm1, %v783_v39, 0.0 }
  0x9b   : > { %v553_v32 = vmax.f32 %v460_v27, 0.0  ;;  %2328 = vmatmul.msk.f32.gmra.mxu0 %vm342_vm0, %v322_v25  ;;  %v893_v25 = vsel %vm342_vm0, %v815_v24, 0.0  ;;  %v816_v27 = vsel %vm791_vm1, %v781_v26, 0.0 }
  0x9c   : > { %894 = vadd.xlane.f32.xlu2 %v893_v25  ;;  %v896_v29 = vsel %vm342_vm0, %v816_v27, 0.0 }
  0x9d   : > { %v584_v40 = vpack.c.bf16 %v553_v32, %v552_v31  ;;  %897 = vadd.xlane.f32.xlu0 %v896_v29  ;;  %v817_v31 = vsel %vm791_vm1, %v782_v30, 0.0 }
  0x9e   : > { %v513_v42 = vpop.f32.mrf.mxu3  ;;  %v899_v34 = vsel %vm342_vm0, %v817_v31, 0.0 }
  0x9f   : > { %v514_v45 = vadd.f32 %v3102_v16, %v513_v42  ;;  %676 = vmatmul.bf16.vlgmr.msra.gmra.mxu1 %v584_v40  ;;  %900 = vadd.xlane.f32.xlu1 %v899_v34  ;;  %v902_v42 = vsel %vm342_vm0, %v818_v41, 0.0 }
  0xa0   : > { %v462_v46 = vpop.f32.mrf.mxu0 }
  0xa1   : > { %v571_v50 = vmax.f32 %v514_v45, 0.0  ;;  %v463_v1 = vadd.f32 %v3102_v16, %v462_v46 }
  0xa3   : > { %v3137_v57 = vpack.c.bf16 %v571_v50, %v570_v49  ;;  %v554_v8 = vmax.f32 %v463_v1, 0.0  ;;  %v905_v49 = vsel %vm342_vm0, %v819_v47, 0.0  ;;  %v785_v50 = vld [vmem:[%s2999_s20 + $0xe0] sm:$0xff] }
  0xa4   : > { %903 = vadd.xlane.f32.xlu2 %v902_v42  ;;  %v820_v54 = vsel %vm791_vm1, %v785_v50, 0.0 }
  0xa5   : > { %906 = vadd.xlane.f32.xlu0 %v905_v49  ;;  %v908_v59 = vsel %vm342_vm0, %v820_v54, 0.0 }
  0xa6   : > { %v516_v63 = vpop.f32.mrf.mxu3 }
  0xa7   : > { %v517_v13 = vadd.f32 %v3102_v16, %v516_v63  ;;  %909 = vadd.xlane.f32.xlu1 %v908_v59  ;;  %v786_v63 = vld [vmem:[%s2999_s20 + $0xe8] sm:$0xff] }
  0xa8   : > { %v465_v2 = vpop.f32.mrf.mxu0 }
  0xa9   : > { %v466_v4 = vadd.f32 %v3102_v16, %v465_v2  ;;  %v572_v22 = vmax.f32 %v517_v13, 0.0  ;;  %v821_v2 = vsel %vm791_vm1, %v786_v63, 0.0 }
  0xaa   : > { %v911_v3 = vsel %vm342_vm0, %v821_v2, 0.0  ;;  %v3227_v2 = vpop.xlane.xlu1 %831 }
  0xab   : > { %v555_v9 = vmax.f32 %v466_v4, 0.0  ;;  %v3195_v4 = vld [vmem:[%s2999_s20 + $0xf0] sm:$0xff]  ;;  %4556 = vst [vmem:[#allocation3_spill] sm:$0xff] %v3227_v2  ;;  %vm1018_vm4 = vcmp.gt.f32.partialorder %v3227_v2, 0.0 }
  0xac   : > { %v822_v5 = vsel %vm791_vm1, %v3195_v4, 0.0  ;;  %912 = vadd.xlane.f32.xlu2 %v911_v3 }
  0xad   : > { %v585_v14 = vpack.c.bf16 %v555_v9, %v554_v8  ;;  %v914_v7 = vsel %vm342_vm0, %v822_v5, 0.0  ;;  %v788_v8 = vld [vmem:[%s2999_s20 + $0xf8] sm:$0xff] }
  0xae   : > { %v519_v17 = vpop.f32.mrf.mxu3  ;;  %915 = vadd.xlane.f32.xlu0 %v914_v7  ;;  %v823_v9 = vsel %vm791_vm1, %v788_v8, 0.0  ;;  %v3230_v8 = vpop.xlane.xlu2 %837  ;;  %vm1497_vm1 = vcmp.ge.s32.totalorder %v3003_v33, 4 }
  0xaf   : > { %v520_v19 = vadd.f32 %v3102_v16, %v519_v17  ;;  %681 = vmatmul.bf16.gmra.mxu1 %v585_v14  ;;  %v917_v11 = vsel %vm342_vm0, %v823_v9, 0.0  ;;  %4557 = vst [vmem:[#allocation4_spill] sm:$0xff] %v3230_v8  ;;  %vm1020_vm6 = vcmp.gt.f32.partialorder %v3230_v8, 0.0 }
  0xb0   : > { %v468_v20 = vpop.f32.mrf.mxu0  ;;  %918 = vadd.xlane.f32.xlu1 %v917_v11 }
  0xb1   : > { %v573_v23 = vmax.f32 %v520_v19, 0.0  ;;  %v469_v36 = vadd.f32 %v3102_v16, %v468_v20 }
  0xb3   : > { %v3167_v28 = vpack.c.bf16 %v573_v23, %v572_v22  ;;  %v556_v45 = vmax.f32 %v469_v36, 0.0 }
  0xb6   : > { %v522_v32 = vpop.f32.mrf.mxu3 }
  0xb7   : > { %v523_v52 = vadd.f32 %v3102_v16, %v522_v32 }
  0xb8   : > { %v471_v37 = vpop.f32.mrf.mxu0 }
  0xb9   : > { %v472_v40 = vadd.f32 %v3102_v16, %v471_v37  ;;  %v574_v0 = vmax.f32 %v523_v52, 0.0 }
  0xbb   : > { %v557_v46 = vmax.f32 %v472_v40, 0.0 }
  0xbd   : > { %v586_v53 = vpack.c.bf16 %v557_v46, %v556_v45 }
  0xbe   : > { %v525_v56 = vpop.f32.mrf.mxu3 }
  0xbf   : > { %v526_v60 = vadd.f32 %v3102_v16, %v525_v56  ;;  %686 = vmatmul.bf16.gmra.mxu1 %v586_v53 }
  0xc0   : > { %v474_v62 = vpop.f32.mrf.mxu0 }
  0xc1   : > { %v575_v1 = vmax.f32 %v526_v60, 0.0  ;;  %v475_v12 = vadd.f32 %v3102_v16, %v474_v62 }
  0xc3   : > { %v3200_v6 = vpack.c.bf16 %v575_v1, %v574_v0  ;;  %v558_v15 = vmax.f32 %v475_v12, 0.0  ;;  %v3223_v0 = vpop.xlane.xlu0 %825 }
  0xc4   : > { %4555 = vst [vmem:[#allocation2_spill] sm:$0xff] %v3223_v0  ;;  %vm1016_vm2 = vcmp.gt.f32.partialorder %v3223_v0, 0.0  ;;  %vm2498_vm10 = vcmp.lt.s32.totalorder %v3223_v0, 0 }
  0xc6   : > { %v528_v10 = vpop.f32.mrf.mxu3 }
  0xc7   : > { %v529_v18 = vadd.f32 %v3102_v16, %v528_v10 }
  0xc8   : > { %v477_v13 = vpop.f32.mrf.mxu0 }
  0xc9   : > { %v478_v14 = vadd.f32 %v3102_v16, %v477_v13  ;;  %v576_v23 = vmax.f32 %v529_v18, 0.0  ;;  %v3237_v18 = vpop.xlane.xlu1 %834 }
  0xca   : > { %4559 = vst [vmem:[#allocation6_spill] sm:$0xff] %v3237_v18  ;;  %vm1019_vm5 = vcmp.gt.f32.partialorder %v3237_v18, 0.0 }
  0xcb   : > { %v559_v17 = vmax.f32 %v478_v14, 0.0  ;;  %v3233_v12 = vpop.xlane.xlu0 %828 }
  0xcc   : > { %4558 = vst [vmem:[#allocation5_spill] sm:$0xff] %v3233_v12  ;;  %vm1017_vm3 = vcmp.gt.f32.partialorder %v3233_v12, 0.0  ;;  %vm2503_vm14 = vcmp.lt.s32.totalorder %v3233_v12, 0 }
  0xcd   : > { %v587_v19 = vpack.c.bf16 %v559_v17, %v558_v15 }
  0xce   : > { %v531_v20 = vpop.f32.mrf.mxu3 }
  0xcf   : > { %v532_v21 = vadd.f32 %v3102_v16, %v531_v20  ;;  %691 = vmatmul.bf16.gmra.mxu1 %v587_v19 }
  0xd0   : > { %v480_v22 = vpop.f32.mrf.mxu0 }
  0xd1   : > { %v577_v24 = vmax.f32 %v532_v21, 0.0  ;;  %v481_v27 = vadd.f32 %v3102_v16, %v480_v22  ;;  %v4488_v22 = vmov 0.0  }
  0xd3   : > { %v3211_v25 = vpack.c.bf16 %v577_v24, %v576_v23  ;;  %v560_v31 = vmax.f32 %v481_v27, 0.0  ;;  %v3241_v23 = vsel %vm1016_vm2, 1.0, %v4488_v22  ;;  %v3243_v24 = vpop.xlane.xlu2 %840  ;;  %v3247_v27 = vsel %vm1017_vm3, 1.0, %v4488_v22 }
  0xd4   : > { %4560 = vst [vmem:[#allocation7_spill] sm:$0xff] %v3243_v24  ;;  %vm1021_vm7 = vcmp.gt.f32.partialorder %v3243_v24, 0.0  ;;  %vm1498_vm2 = vcmp.lt.s32.totalorder %v3003_v33, 85 }
  0xd6   : > { %v534_v26 = vpop.f32.mrf.mxu3 }
  0xd7   : > { %v535_v34 = vadd.f32 %v3102_v16, %v534_v26 }
  0xd8   : > { %v483_v29 = vpop.f32.mrf.mxu0 }
  0xd9   : > { %v484_v30 = vadd.f32 %v3102_v16, %v483_v29  ;;  %v578_v41 = vmax.f32 %v535_v34, 0.0  ;;  %v2185_v29 = vadd.f32 %v3247_v27, %v3241_v23 }
  0xdb   : > { %v561_v32 = vmax.f32 %v484_v30, 0.0  ;;  %v3253_v30 = vsel %vm1018_vm4, 1.0, %v4488_v22 }
  0xdc   : > { %v2186_v34 = vadd.f32 %v3253_v30, %v2185_v29 }
  0xdd   : > { %v588_v36 = vpack.c.bf16 %v561_v32, %v560_v31  ;;  %v3257_v32 = vpop.xlane.xlu0 %843 }
  0xde   : > { %v537_v37 = vpop.f32.mrf.mxu3  ;;  %4561 = vst [vmem:[#allocation8_spill] sm:$0xff] %v3257_v32  ;;  %vm1022_vm8 = vcmp.gt.f32.partialorder %v3257_v32, 0.0 }
  0xdf   : > { %v538_v39 = vadd.f32 %v3102_v16, %v537_v37  ;;  %696 = vmatmul.bf16.gmra.mxu1 %v588_v36  ;;  %v3261_v36 = vsel %vm1019_vm5, 1.0, %v4488_v22  ;;  %vm3333_vm5 = vmand %vm1497_vm1, %vm1498_vm2  ;;  %vm2518_vm2 = vcmp.lt.s32.totalorder %v3230_v8, 0 }
  0xe0   : > { %v486_v40 = vpop.f32.mrf.mxu0 }
  0xe1   : > { %v579_v42 = vmax.f32 %v538_v39, 0.0  ;;  %v487_v46 = vadd.f32 %v3102_v16, %v486_v40  ;;  %v2187_v39 = vadd.f32 %v3261_v36, %v2186_v34  ;;  %v3266_v40 = vsel %vm1020_vm6, 1.0, %v4488_v22 }
  0xe2   : > { %vm1112_vm6 = vcmp.lt.s32.totalorder %v3003_v33, 4 }
  0xe3   : > { %v3217_v43 = vpack.c.bf16 %v579_v42, %v578_v41  ;;  %v562_v50 = vmax.f32 %v487_v46, 0.0  ;;  %v2188_v46 = vadd.f32 %v3266_v40, %v2187_v39  ;;  %v3323_v39 = vld [vmem:[%s4483_s4] ss:$0 sm:$0xff] }
  0xe6   : > { %v540_v45 = vpop.f32.mrf.mxu3 }
  0xe7   : > { %v541_v53 = vadd.f32 %v3102_v16, %v540_v45  ;;  %v3269_v45 = vpop.xlane.xlu1 %846 }
  0xe8   : > { %v489_v47 = vpop.f32.mrf.mxu0  ;;  %4562 = vst [vmem:[#allocation9_spill] sm:$0xff] %v3269_v45  ;;  %vm1023_vm9 = vcmp.gt.f32.partialorder %v3269_v45, 0.0 }
  0xe9   : > { %v490_v49 = vadd.f32 %v3102_v16, %v489_v47  ;;  %v580_v62 = vmax.f32 %v541_v53, 0.0  ;;  %v3274_v47 = vsel %vm1021_vm7, 1.0, %v4488_v22 }
  0xea   : > { %v2189_v53 = vadd.f32 %v3274_v47, %v2188_v46 }
  0xeb   : > { %v563_v52 = vmax.f32 %v490_v49, 0.0 }
  0xed   : > { %v589_v54 = vpack.c.bf16 %v563_v52, %v562_v50  ;;  %v3276_v50 = vpop.xlane.xlu2 %849  ;;  %v2499_v52 = vceil.f32 %v3223_v0 }
  0xee   : > { %v543_v56 = vpop.f32.mrf.mxu3  ;;  %4563 = vst [vmem:[#allocation10_spill] sm:$0xff] %v3276_v50  ;;  %vm1024_vm11 = vcmp.gt.f32.partialorder %v3276_v50, 0.0 }
  0xef   : > { %v544_v59 = vadd.f32 %v3102_v16, %v543_v56  ;;  %701 = vmatmul.bf16.gmra.mxu1 %v589_v54  ;;  %v2500_v56 = vfloor.f32 %v3223_v0  ;;  %v4578_v0 = vmov 0.0  }
  0xf0   : > { %v492_v60 = vpop.f32.mrf.mxu0 }
  0xf1   : > { %v581_v63 = vmax.f32 %v544_v59, 0.0  ;;  %v493_v5 = vadd.f32 %v3102_v16, %v492_v60  ;;  %v3283_v59 = vsel %vm1022_vm8, 1.0, %v4488_v22 }
  0xf2   : > { %v2190_v60 = vadd.f32 %v3283_v59, %v2189_v53 }
  0xf3   : > { %v3225_v1 = vpack.c.bf16 %v581_v63, %v580_v62  ;;  %v564_v10 = vmax.f32 %v493_v5, 0.0  ;;  %v3289_v62 = vsel %vm1023_vm9, 1.0, %v4488_v22 }
  0xf4   : > { %v2191_v5 = vadd.f32 %v3289_v62, %v2190_v60 }
  0xf6   : > { %v546_v3 = vpop.f32.mrf.mxu3 }
  0xf7   : > { %v547_v13 = vadd.f32 %v3102_v16, %v546_v3  ;;  %v3292_v3 = vpop.xlane.xlu0 %852 }
  0xf8   : > { %v495_v7 = vpop.f32.mrf.mxu0  ;;  %4564 = vst [vmem:[#allocation11_spill] sm:$0xff] %v3292_v3  ;;  %vm1025_vm12 = vcmp.gt.f32.partialorder %v3292_v3, 0.0 }
  0xf9   : > { %v496_v9 = vadd.f32 %v3102_v16, %v495_v7  ;;  %v582_v20 = vmax.f32 %v547_v13, 0.0  ;;  %v2501_v7 = vsel %vm2498_vm10, %v2499_v52, %v2500_v56 }
  0xfb   : > { %v565_v11 = vmax.f32 %v496_v9, 0.0  ;;  %v3296_v9 = vsel %vm1024_vm11, 1.0, %v4488_v22  ;;  %vm2508_vm11 = vcmp.lt.s32.totalorder %v3227_v2, 0 }
  0xfc   : > { %v2192_v13 = vadd.f32 %v3296_v9, %v2191_v5 }
  0xfd   : > { %v590_v14 = vpack.c.bf16 %v565_v11, %v564_v10  ;;  %v3298_v10 = vpop.xlane.xlu1 %855  ;;  %v2502_v11 = vcvt.f32.s32 %v2501_v7 }
  0xfe   : > { %v549_v15 = vpop.f32.mrf.mxu3  ;;  %4565 = vst [vmem:[#allocation12_spill] sm:$0xff] %v3298_v10  ;;  %vm1026_vm13 = vcmp.gt.f32.partialorder %v3298_v10, 0.0 }
  0xff   : > { %v550_v17 = vadd.f32 %v3102_v16, %v549_v15  ;;  %706 = vmatmul.bf16.gmra.mxu1 %v590_v14  ;;  %v2504_v15 = vceil.f32 %v3233_v12  ;;  %v3326_v46 = vpop.xlane.xlu0 %861 }
 0x100   : > { %v498_v19 = vpop.f32.mrf.mxu0  ;;  %4567 = vst [vmem:[#allocation14_spill] sm:$0xff] %v3326_v46  ;;  %vm1028_vm3 = vcmp.gt.f32.partialorder %v3326_v46, 0.0 }
 0x101   : > { %v583_v21 = vmax.f32 %v550_v17, 0.0  ;;  %v499_v31 = vadd.f32 %v3102_v16, %v498_v19  ;;  %v2505_v17 = vfloor.f32 %v3233_v12  ;;  %v3307_v19 = vsel %vm1025_vm12, 1.0, %v4488_v22 }
 0x102   : > { %v3343_v7 = vsel %vm1028_vm3, 1.0, %v4488_v22 }
 0x103   : > { %v599_v26 = vpack.c.bf16 %v583_v21, %v582_v20  ;;  %v566_v41 = vmax.f32 %v499_v31, 0.0  ;;  %v3309_v20 = vpop.xlane.xlu2 %858  ;;  %v2193_v21 = vadd.f32 %v3307_v19, %v2192_v13  ;;  %v1884_v31 = vadd.s32 4, %v2502_v11 }
 0x104   : > { %4566 = vst [vmem:[#allocation13_spill] sm:$0xff] %v3309_v20  ;;  %vm1027_vm15 = vcmp.gt.f32.partialorder %v3309_v20, 0.0 }
 0x105   : > { %751 = vmatmul.bf16.vlgmr.msrb.gmra.mxu3 %v599_v26  ;;  %v3314_v26 = vsel %vm1026_vm13, 1.0, %v4488_v22  ;;  %vm1916_vm4 = vcmp.eq.s32.totalorder %v3003_v33, %v1884_v31  ;;  %v3340_v5 = vpop.xlane.xlu1 %864 }
 0x106   : > { %4570 = vst [vmem:[#allocation15_spill] sm:$0xff] %v3340_v5  ;;  %vm1029_vm7 = vcmp.gt.f32.partialorder %v3340_v5, 0.0 }
 0x108   : > { %v501_v37 = vpop.f32.mrf.mxu0 }
 0x109   : > { %v502_v42 = vadd.f32 %v3102_v16, %v501_v37 }
 0x10b   : > { %v567_v49 = vmax.f32 %v502_v42, 0.0  ;;  %v2194_v42 = vadd.f32 %v3314_v26, %v2193_v21 }
 0x10d   : > { %v591_v54 = vpack.c.bf16 %v567_v49, %v566_v41  ;;  %v2506_v41 = vsel %vm2503_vm14, %v2504_v15, %v2505_v17  ;;  %v3329_v49 = vsel %vm1027_vm15, 1.0, %v4488_v22  ;;  %vm2513_vm15 = vcmp.lt.s32.totalorder %v3237_v18, 0 }
 0x10f   : > { %711 = vmatmul.bf16.vlgmr.msra.gmra.mxu2 %v591_v54  ;;  %v2507_v54 = vcvt.f32.s32 %v2506_v41 }
 0x110   : > { %v504_v63 = vpop.f32.mrf.mxu0 }
 0x111   : > { %v505_v14 = vadd.f32 %v3102_v16, %v504_v63  ;;  %v2195_v63 = vadd.f32 %v3329_v49, %v2194_v42  ;;  %v1885_v15 = vadd.s32 4, %v2507_v54 }
 0x113   : > { %v568_v34 = vmax.f32 %v505_v14, 0.0  ;;  %v2196_v21 = vadd.f32 %v3343_v7, %v2195_v63  ;;  %vm1917_vm9 = vcmp.eq.s32.totalorder %v3003_v33, %v1885_v15  ;;  %v2510_v63 = vfloor.f32 %v3227_v2 }
 0x118   : > { %v507_v29 = vpop.f32.mrf.mxu0 }
 0x119   : > { %v508_v37 = vadd.f32 %v3102_v16, %v507_v29 }
 0x11b   : > { %v569_v52 = vmax.f32 %v508_v37, 0.0 }
 0x11c   : > { %v677_v53 = vpop.f32.mrf.mxu1 }
 0x11d   : > { %v678_v56 = vadd.f32 %v3323_v39, %v677_v53  ;;  %v592_v60 = vpack.c.bf16 %v569_v52, %v568_v34  ;;  %v3358_v34 = vsel %vm1029_vm7, 1.0, %v4488_v22  ;;  %v2509_v53 = vceil.f32 %v3227_v2 }
 0x11e   : > { %4572 = vst [vmem:[#allocation17_spill] sm:$0xff] %v3358_v34  ;;  %v2197_v54 = vadd.f32 %v3358_v34, %v2196_v21 }
 0x11f   : > { %v1113_v11 = vsub.f32 %v678_v56, %v3009_v35  ;;  %716 = vmatmul.bf16.gmra.mxu2 %v592_v60  ;;  %v1948_v13 = vsel %vm1916_vm4, %v678_v56, 0.0  ;;  %v3348_v14 = vsel %vm3333_vm5, %v678_v56, -1e+30  ;;  %v3355_v35 = vpop.xlane.xlu2 %867  ;;  %v3365_v60 = vpop.xlane.xlu0 %870 }
 0x120   : > { %1980 = vadd.xlane.f32.xlu0 %v1948_v13  ;;  %1532 = vmax.xlane.f32.xlu1 %v3348_v14  ;;  %4571 = vst [vmem:[#allocation16_spill] sm:$0xff] %v3355_v35  ;;  %vm1030_vm8 = vcmp.gt.f32.partialorder %v3355_v35, 0.0  ;;  %vm1031_vm12 = vcmp.gt.f32.partialorder %v3365_v60, 0.0 }
 0x121   : > { %v1145_v17 = vsel %vm1112_vm6, %v1113_v11, 0.0  ;;  %4573 = vst [vmem:[#allocation18_spill] sm:$0xff] %v3365_v60  ;;  %v3370_v11 = vsel %vm1030_vm8, 1.0, %v4488_v22  ;;  %v3381_v2 = vsel %vm1031_vm12, 1.0, %v4488_v22 }
 0x122   : > { %v1177_v29 = vand.u32 2147483647, %v1145_v17  ;;  %v1241_v31 = vmul.f32 0.5, %v1145_v17  ;;  %4574 = vst [vmem:[#allocation19_spill] sm:$0xff] %v3370_v11 }
 0x123   : > { %4576 = vst [vmem:[#allocation21_spill] sm:$0xff] %v3381_v2 }
 0x124   : > { %v679_v37 = vpop.f32.mrf.mxu1  ;;  %vm1209_vm10 = vcmp.lt.f32.partialorder %v1177_v29, 1.0  ;;  %v1273_v41 = vmul.f32 %v1241_v31, %v1145_v17  ;;  %v2439_v42 = vadd.f32 -0.5, %v1177_v29  ;;  %v2198_v29 = vadd.f32 %v3370_v11, %v2197_v54 }
 0x125   : > { %v680_v52 = vadd.f32 %v3323_v39, %v679_v37 }
 0x126   : > { %v1337_v56 = vsel %vm1209_vm10, %v1273_v41, %v2439_v42  ;;  %v3378_v41 = vpop.xlane.xlu1 %873  ;;  %v2511_v42 = vsel %vm2508_vm11, %v2509_v53, %v2510_v63  ;;  %v2199_v53 = vadd.f32 %v3381_v2, %v2198_v29 }
 0x127   : > { %v1114_v13 = vsub.f32 %v680_v52, %v3041_v48  ;;  %v1949_v15 = vsel %vm1917_vm9, %v680_v52, 0.0  ;;  %v1369_v17 = vsel %vm342_vm0, %v1337_v56, 0.0  ;;  %4575 = vst [vmem:[#allocation20_spill] sm:$0xff] %v3378_v41  ;;  %v2514_v48 = vceil.f32 %v3237_v18  ;;  %v3389_v22 = vpop.xlane.xlu2 %876 }
 0x128   : > { %1982 = vadd.xlane.f32.xlu1 %v1949_v15  ;;  %1370 = vadd.xlane.f32.xlu2 %v1369_v17  ;;  %vm1032_vm13 = vcmp.gt.f32.partialorder %v3378_v41, 0.0  ;;  %v2512_v12 = vcvt.f32.s32 %v2511_v42  ;;  %4577 = vst [vmem:[#allocation22_spill] sm:$0xff] %v3389_v22  ;;  %vm1033_vm1 = vcmp.gt.f32.partialorder %v3389_v22, 0.0  ;;  %vm2523_vm9 = vcmp.lt.s32.totalorder %v3243_v24, 0 }
 0x129   : > { %v1146_v21 = vsel %vm1112_vm6, %v1114_v13, 0.0  ;;  %v2515_v13 = vfloor.f32 %v3237_v18  ;;  %v3392_v11 = vsel %vm1032_vm13, 1.0, %v4578_v0 }
 0x12a   : > { %v1178_v31 = vand.u32 2147483647, %v1146_v21  ;;  %v1242_v37 = vmul.f32 0.5, %v1146_v21  ;;  %4579 = vst [vmem:[#allocation23_spill] sm:$0xff] %v3392_v11  ;;  %v1886_v42 = vadd.s32 4, %v2512_v12 }
 0x12b   : > { %v2516_v29 = vsel %vm2513_vm15, %v2514_v48, %v2515_v13  ;;  %vm2528_vm15 = vcmp.lt.s32.totalorder %v3257_v32, 0 }
 0x12c   : > { %v682_v56 = vpop.f32.mrf.mxu1  ;;  %vm1210_vm14 = vcmp.lt.f32.partialorder %v1178_v31, 1.0  ;;  %v1274_v15 = vmul.f32 %v1242_v37, %v1146_v21  ;;  %v2440_v17 = vadd.f32 -0.5, %v1178_v31  ;;  %v3399_v31 = vsel %vm3333_vm5, %v680_v52, -1e+30 }
 0x12d   : > { %v683_v54 = vadd.f32 %v3323_v39, %v682_v56  ;;  %v3409_v52 = vsel %vm1033_vm1, 1.0, %v4578_v0  ;;  %vm1918_vm4 = vcmp.eq.s32.totalorder %v3003_v33, %v1886_v42  ;;  %vm2533_vm1 = vcmp.lt.s32.totalorder %v3269_v45, 0 }
 0x12e   : > { %v1338_v63 = vsel %vm1210_vm14, %v1274_v15, %v2440_v17  ;;  %v2520_v17 = vfloor.f32 %v3230_v8  ;;  %4580 = vst [vmem:[#allocation24_spill] sm:$0xff] %v3409_v52 }
 0x12f   : > { %v1115_v34 = vsub.f32 %v683_v54, %v3019_v38  ;;  %721 = vmatmul.bf16.gmra.mxu2 %v3137_v57  ;;  %v1372_v21 = vsel %vm342_vm0, %v1338_v63, 0.0  ;;  %v2519_v38 = vceil.f32 %v3230_v8  ;;  %v2200_v57 = vadd.f32 %v3392_v11, %v2199_v53 }
 0x130   : > { %1373 = vadd.xlane.f32.xlu0 %v1372_v21  ;;  %1534 = vmax.xlane.f32.xlu2 %v3399_v31  ;;  %v2517_v63 = vcvt.f32.s32 %v2516_v29  ;;  %v3418_v2 = vsel %vm3333_vm5, %v683_v54, -1e+30 }
 0x131   : > { %v1147_v37 = vsel %vm1112_vm6, %v1115_v34, 0.0  ;;  %v2201_v34 = vadd.f32 %v3409_v52, %v2200_v57  ;;  %v2521_v18 = vsel %vm2518_vm2, %v2519_v38, %v2520_v17 }
 0x132   : > { %v1179_v56 = vand.u32 2147483647, %v1147_v37  ;;  %v1243_v15 = vmul.f32 0.5, %v1147_v37  ;;  %v1887_v8 = vadd.s32 4, %v2517_v63  ;;  %v2522_v57 = vcvt.f32.s32 %v2521_v18 }
 0x133   : > { %v2525_v18 = vfloor.f32 %v3243_v24 }
 0x134   : > { %v684_v21 = vpop.f32.mrf.mxu1  ;;  %vm1211_vm3 = vcmp.lt.f32.partialorder %v1179_v56, 1.0  ;;  %v1275_v48 = vmul.f32 %v1243_v15, %v1147_v37  ;;  %v2441_v13 = vadd.f32 -0.5, %v1179_v56  ;;  %v1950_v37 = vsel %vm1918_vm4, %v683_v54, 0.0 }
 0x135   : > { %v685_v12 = vadd.f32 %v3323_v39, %v684_v21  ;;  %vm1919_vm7 = vcmp.eq.s32.totalorder %v3003_v33, %v1887_v8  ;;  %v3429_v21 = vpop.xlane.xlu0 %879 }
 0x136   : > { %v1339_v53 = vsel %vm1211_vm3, %v1275_v48, %v2441_v13  ;;  %4583 = vst [vmem:[#allocation25_spill] sm:$0xff] %v3429_v21  ;;  %v1888_v48 = vadd.s32 4, %v2522_v57  ;;  %v3434_v13 = vpop.xlane.xlu1 %882  ;;  %vm1034_vm10 = vcmp.gt.f32.partialorder %v3429_v21, 0.0 }
 0x137   : > { %v1116_v11 = vsub.f32 %v685_v12, %v3050_v51  ;;  %v1375_v29 = vsel %vm342_vm0, %v1339_v53, 0.0  ;;  %4584 = vst [vmem:[#allocation26_spill] sm:$0xff] %v3434_v13  ;;  %v1951_v53 = vsel %vm1919_vm7, %v685_v12, 0.0  ;;  %vm1035_vm11 = vcmp.gt.f32.partialorder %v3434_v13, 0.0 }
 0x138   : > { %1536 = vmax.xlane.f32.xlu0 %v3418_v2  ;;  %1376 = vadd.xlane.f32.xlu1 %v1375_v29  ;;  %v3450_v57 = vsel %vm1034_vm10, 1.0, %v4578_v0  ;;  %v3460_v15 = vsel %vm1035_vm11, 1.0, %v4578_v0  ;;  %vm1920_vm12 = vcmp.eq.s32.totalorder %v3003_v33, %v1888_v48  ;;  %v2534_v48 = vceil.f32 %v3269_v45 }
 0x139   : > { %v1148_v42 = vsel %vm1112_vm6, %v1116_v11, 0.0  ;;  %1984 = vadd.xlane.f32.xlu2 %v1950_v37  ;;  %v2524_v11 = vceil.f32 %v3243_v24  ;;  %v3444_v37 = vsel %vm3333_vm5, %v685_v12, -1e+30  ;;  %4585 = vst [vmem:[#allocation27_spill] sm:$0xff] %v3450_v57  ;;  %vm2538_vm10 = vcmp.lt.s32.totalorder %v3276_v50, 0 }
 0x13a   : > { %v1180_v56 = vand.u32 2147483647, %v1148_v42  ;;  %v1244_v38 = vmul.f32 0.5, %v1148_v42  ;;  %4587 = vst [vmem:[#allocation29_spill] sm:$0xff] %v3460_v15 }
 0x13c   : > { %v687_v51 = vpop.f32.mrf.mxu1  ;;  %vm3425_vm8 = vcmp.lt.f32.partialorder %v1180_v56, 1.0  ;;  %v1276_v17 = vmul.f32 %v1244_v38, %v1148_v42  ;;  %v2442_v63 = vadd.f32 -0.5, %v1180_v56 }
 0x13d   : > { %v688_v54 = vadd.f32 %v3323_v39, %v687_v51  ;;  %v2526_v51 = vsel %vm2523_vm9, %v2524_v11, %v2525_v18 }
 0x13e   : > { %v1340_v8 = vsel %vm3425_vm8, %v1276_v17, %v2442_v63  ;;  %v2529_v17 = vceil.f32 %v3257_v32 }
 0x13f   : > { %v1117_v29 = vsub.f32 %v688_v54, %v3031_v44  ;;  %726 = vmatmul.bf16.gmra.mxu2 %v3167_v28  ;;  %v1378_v42 = vsel %vm342_vm0, %v1340_v8, 0.0  ;;  %v2202_v44 = vadd.f32 %v3450_v57, %v2201_v34  ;;  %v3455_v28 = vpop.xlane.xlu2 %885  ;;  %v2530_v8 = vfloor.f32 %v3257_v32  ;;  %v3496_v32 = vpop.xlane.xlu0 %888 }
 0x140   : > { %1986 = vadd.xlane.f32.xlu0 %v1951_v53  ;;  %1538 = vmax.xlane.f32.xlu1 %v3444_v37  ;;  %4586 = vst [vmem:[#allocation28_spill] sm:$0xff] %v3455_v28  ;;  %vm1036_vm13 = vcmp.gt.f32.partialorder %v3455_v28, 0.0  ;;  %vm1037_vm4 = vcmp.gt.f32.partialorder %v3496_v32, 0.0 }
 0x141   : > { %v1149_v56 = vsel %vm1112_vm6, %v1117_v29, 0.0  ;;  %1379 = vadd.xlane.f32.xlu2 %v1378_v42  ;;  %v2527_v42 = vcvt.f32.s32 %v2526_v51  ;;  %v2203_v11 = vadd.f32 %v3460_v15, %v2202_v44  ;;  %v3470_v24 = vsel %vm1036_vm13, 1.0, %v4578_v0  ;;  %4589 = vst [vmem:[#allocation31_spill] sm:$0xff] %v3496_v32 }
 0x142   : > { %v1181_v12 = vand.u32 2147483647, %v1149_v56  ;;  %v1245_v38 = vmul.f32 0.5, %v1149_v56  ;;  %4588 = vst [vmem:[#allocation30_spill] sm:$0xff] %v3470_v24 }
 0x143   : > { %v1889_v51 = vadd.s32 4, %v2527_v42 }
 0x144   : > { %v689_v63 = vpop.f32.mrf.mxu1  ;;  %vm1213_vm14 = vcmp.lt.f32.partialorder %v1181_v12, 1.0  ;;  %v1277_v53 = vmul.f32 %v1245_v38, %v1149_v56  ;;  %v2443_v34 = vadd.f32 -0.5, %v1181_v12  ;;  %v1952_v56 = vsel %vm1920_vm12, %v688_v54, 0.0 }
 0x145   : > { %v690_v29 = vadd.f32 %v3323_v39, %v689_v63  ;;  %v3478_v12 = vsel %vm3333_vm5, %v688_v54, -1e+30  ;;  %v2531_v38 = vsel %vm2528_vm15, %v2529_v17, %v2530_v8  ;;  %vm1921_vm3 = vcmp.eq.s32.totalorder %v3003_v33, %v1889_v51  ;;  %v3499_v51 = vpop.xlane.xlu1 %891 }
 0x146   : > { %v1341_v18 = vsel %vm1213_vm14, %v1277_v53, %v2443_v34  ;;  %v2532_v34 = vcvt.f32.s32 %v2531_v38  ;;  %4590 = vst [vmem:[#allocation32_spill] sm:$0xff] %v3499_v51  ;;  %vm1038_vm7 = vcmp.gt.f32.partialorder %v3499_v51, 0.0  ;;  %vm2543_vm14 = vcmp.lt.s32.totalorder %v3292_v3, 0 }
 0x147   : > { %v1118_v57 = vsub.f32 %v690_v29, %v3058_v55  ;;  %v1381_v52 = vsel %vm342_vm0, %v1341_v18, 0.0  ;;  %v2204_v55 = vadd.f32 %v3470_v24, %v2203_v11 }
 0x148   : > { %1382 = vadd.xlane.f32.xlu0 %v1381_v52  ;;  %1988 = vadd.xlane.f32.xlu1 %v1952_v56  ;;  %v2535_v52 = vfloor.f32 %v3269_v45  ;;  %v3493_v56 = vsel %vm3333_vm5, %v690_v29, -1e+30  ;;  %v1890_v45 = vadd.s32 4, %v2532_v34 }
 0x149   : > { %v1150_v44 = vsel %vm1112_vm6, %v1118_v57, 0.0  ;;  %1540 = vmax.xlane.f32.xlu2 %v3478_v12 }
 0x14a   : > { %v1182_v63 = vand.u32 2147483647, %v1150_v44  ;;  %v1246_v53 = vmul.f32 0.5, %v1150_v44  ;;  %v2536_v18 = vsel %vm2533_vm1, %v2534_v48, %v2535_v52  ;;  %v3505_v48 = vsel %vm1037_vm4, 1.0, %v4578_v0 }
 0x14b   : > { %4591 = vst [vmem:[#allocation33_spill] sm:$0xff] %v3505_v48  ;;  %vm1922_vm8 = vcmp.eq.s32.totalorder %v3003_v33, %v1890_v45 }
 0x14c   : > { %v692_v54 = vpop.f32.mrf.mxu1  ;;  %vm1214_vm2 = vcmp.lt.f32.partialorder %v1182_v63, 1.0  ;;  %v1278_v17 = vmul.f32 %v1246_v53, %v1150_v44  ;;  %v2444_v8 = vadd.f32 -0.5, %v1182_v63  ;;  %v1953_v44 = vsel %vm1921_vm3, %v690_v29, 0.0 }
 0x14d   : > { %v693_v57 = vadd.f32 %v3323_v39, %v692_v54 }
 0x14e   : > { %v1342_v42 = vsel %vm1214_vm2, %v1278_v17, %v2444_v8  ;;  %v2205_v17 = vadd.f32 %v3505_v48, %v2204_v55  ;;  %v3514_v8 = vpop.xlane.xlu2 %894  ;;  %vm2548_vm2 = vcmp.lt.s32.totalorder %v3298_v10, 0 }
 0x14f   : > { %v1119_v11 = vsub.f32 %v693_v57, %v3065_v58  ;;  %731 = vmatmul.bf16.gmra.mxu2 %v3200_v6  ;;  %v1384_v38 = vsel %vm342_vm0, %v1342_v42, 0.0  ;;  %v2537_v6 = vcvt.f32.s32 %v2536_v18  ;;  %4594 = vst [vmem:[#allocation34_spill] sm:$0xff] %v3514_v8  ;;  %vm1039_vm11 = vcmp.gt.f32.partialorder %v3514_v8, 0.0 }
 0x150   : > { %1542 = vmax.xlane.f32.xlu0 %v3493_v56  ;;  %1385 = vadd.xlane.f32.xlu1 %v1384_v38  ;;  %v3519_v38 = vsel %vm1038_vm7, 1.0, %v4578_v0  ;;  %vm2553_vm7 = vcmp.lt.s32.totalorder %v3309_v20, 0 }
 0x151   : > { %v1151_v58 = vsel %vm1112_vm6, %v1119_v11, 0.0  ;;  %1990 = vadd.xlane.f32.xlu2 %v1953_v44  ;;  %v1891_v18 = vadd.s32 4, %v2537_v6  ;;  %v2539_v11 = vceil.f32 %v3276_v50  ;;  %4595 = vst [vmem:[#allocation35_spill] sm:$0xff] %v3519_v38  ;;  %v3531_v6 = vsel %vm3333_vm5, %v693_v57, -1e+30 }
 0x152   : > { %v1183_v63 = vand.u32 2147483647, %v1151_v58  ;;  %v1247_v53 = vmul.f32 0.5, %v1151_v58 }
 0x153   : > { %vm1923_vm12 = vcmp.eq.s32.totalorder %v3003_v33, %v1891_v18 }
 0x154   : > { %v694_v52 = vpop.f32.mrf.mxu1  ;;  %vm3509_vm9 = vcmp.lt.f32.partialorder %v1183_v63, 1.0  ;;  %v1279_v34 = vmul.f32 %v1247_v53, %v1151_v58  ;;  %v2445_v54 = vadd.f32 -0.5, %v1183_v63  ;;  %v2540_v58 = vfloor.f32 %v3276_v50 }
 0x155   : > { %v695_v42 = vadd.f32 %v3323_v39, %v694_v52  ;;  %v1954_v63 = vsel %vm1922_vm8, %v693_v57, 0.0  ;;  %v2206_v52 = vadd.f32 %v3519_v38, %v2205_v17  ;;  %v2544_v57 = vceil.f32 %v3292_v3 }
 0x156   : > { %v1343_v44 = vsel %vm3509_vm9, %v1279_v34, %v2445_v54  ;;  %v2541_v54 = vsel %vm2538_vm10, %v2539_v11, %v2540_v58  ;;  %v2813_v11 = vld [vmem:[%s2999_s20 + $0x40] sm:$0xff]  ;;  %vm2558_vm10 = vcmp.lt.s32.totalorder %v3326_v46, 0 }
 0x157   : > { %v1120_v55 = vsub.f32 %v695_v42, %v3073_v61  ;;  %v1387_v53 = vsel %vm342_vm0, %v1343_v44, 0.0  ;;  %v3539_v61 = vsel %vm1039_vm11, 1.0, %v4578_v0  ;;  %v2542_v38 = vcvt.f32.s32 %v2541_v54 }
 0x158   : > { %1992 = vadd.xlane.f32.xlu0 %v1954_v63  ;;  %1544 = vmax.xlane.f32.xlu1 %v3531_v6  ;;  %4596 = vst [vmem:[#allocation36_spill] sm:$0xff] %v3539_v61  ;;  %v3544_v44 = vadd.f32 %v3539_v61, %v2206_v52  ;;  %v1955_v52 = vsel %vm1923_vm12, %v695_v42, 0.0 }
 0x159   : > { %v1152_v29 = vsel %vm1112_vm6, %v1120_v55, 0.0  ;;  %1388 = vadd.xlane.f32.xlu2 %v1387_v53  ;;  %v2545_v55 = vfloor.f32 %v3292_v3 }
 0x15a   : > { %v1184_v45 = vand.u32 2147483647, %v1152_v29  ;;  %v1248_v34 = vmul.f32 0.5, %v1152_v29  ;;  %4597 = vst [vmem:[#allocation37_spill] sm:$0xff] %v3544_v44 }
 0x15c   : > { %v697_v63 = vpop.f32.mrf.mxu1  ;;  %vm1216_vm13 = vcmp.lt.f32.partialorder %v1184_v45, 1.0  ;;  %v1280_v17 = vmul.f32 %v1248_v34, %v1152_v29  ;;  %v2446_v50 = vadd.f32 -0.5, %v1184_v45  ;;  %v3556_v29 = vsel %vm3333_vm5, %v695_v42, -1e+30 }
 0x15d   : > { %v698_v53 = vadd.f32 %v3323_v39, %v697_v63  ;;  %v2546_v45 = vsel %vm2543_vm14, %v2544_v57, %v2545_v55  ;;  %v2549_v42 = vceil.f32 %v3298_v10  ;;  %v2550_v57 = vfloor.f32 %v3298_v10  ;;  %v2815_v10 = vld [vmem:[%s2999_s20 + $0x50] sm:$0xff] }
 0x15e   : > { %v1344_v48 = vsel %vm1216_vm13, %v1280_v17, %v2446_v50  ;;  %v1892_v50 = vadd.s32 4, %v2542_v38  ;;  %vm2563_vm13 = vcmp.lt.s32.totalorder %v3340_v5, 0 }
 0x15f   : > { %v1121_v58 = vsub.f32 %v698_v53, %v2813_v11  ;;  %736 = vmatmul.bf16.gmra.mxu2 %v3211_v25  ;;  %v1390_v24 = vsel %vm342_vm0, %v1344_v48, 0.0  ;;  %v2547_v48 = vcvt.f32.s32 %v2546_v45  ;;  %v2814_v11 = vld [vmem:[%s2999_s20 + $0x48] sm:$0xff] }
 0x160   : > { %1391 = vadd.xlane.f32.xlu0 %v1390_v24  ;;  %1994 = vadd.xlane.f32.xlu1 %v1955_v52  ;;  %vm1924_vm1 = vcmp.eq.s32.totalorder %v3003_v33, %v1892_v50 }
 0x161   : > { %v1153_v34 = vsel %vm1112_vm6, %v1121_v58, 0.0  ;;  %1546 = vmax.xlane.f32.xlu2 %v3556_v29  ;;  %v3569_v58 = vsel %vm3333_vm5, %v698_v53, -1e+30  ;;  %v1893_v45 = vadd.s32 4, %v2547_v48 }
 0x162   : > { %v1185_v25 = vand.u32 2147483647, %v1153_v34  ;;  %v1249_v54 = vmul.f32 0.5, %v1153_v34 }
 0x163   : > { %vm1925_vm3 = vcmp.eq.s32.totalorder %v3003_v33, %v1893_v45 }
 0x164   : > { %v699_v63 = vpop.f32.mrf.mxu1  ;;  %vm1217_vm15 = vcmp.lt.f32.partialorder %v1185_v25, 1.0  ;;  %v1281_v18 = vmul.f32 %v1249_v54, %v1153_v34  ;;  %v2447_v24 = vadd.f32 -0.5, %v1185_v25  ;;  %v1956_v34 = vsel %vm1924_vm1, %v698_v53, 0.0 }
 0x165   : > { %v700_v17 = vadd.f32 %v3323_v39, %v699_v63  ;;  %v2551_v25 = vsel %vm2548_vm2, %v2549_v42, %v2550_v57  ;;  %v2554_v53 = vceil.f32 %v3309_v20 }
 0x166   : > { %v1345_v55 = vsel %vm1217_vm15, %v1281_v18, %v2447_v24 }
 0x167   : > { %v1122_v38 = vsub.f32 %v700_v17, %v2814_v11  ;;  %v1393_v52 = vsel %vm342_vm0, %v1345_v55, 0.0  ;;  %v2552_v55 = vcvt.f32.s32 %v2551_v25  ;;  %v1957_v42 = vsel %vm1925_vm3, %v700_v17, 0.0 }
 0x168   : > { %1548 = vmax.xlane.f32.xlu0 %v3569_v58  ;;  %1394 = vadd.xlane.f32.xlu1 %v1393_v52  ;;  %v2555_v52 = vfloor.f32 %v3309_v20  ;;  %v3583_v57 = vsel %vm3333_vm5, %v700_v17, -1e+30  ;;  %v2560_v20 = vfloor.f32 %v3326_v46 }
 0x169   : > { %v1154_v50 = vsel %vm1112_vm6, %v1122_v38, 0.0  ;;  %1996 = vadd.xlane.f32.xlu2 %v1956_v34  ;;  %v1894_v34 = vadd.s32 4, %v2552_v55  ;;  %v2816_v55 = vld [vmem:[%s2999_s20 + $0x58] sm:$0xff] }
 0x16a   : > { %v1186_v54 = vand.u32 2147483647, %v1154_v50  ;;  %v1250_v63 = vmul.f32 0.5, %v1154_v50  ;;  %v2556_v25 = vsel %vm2553_vm7, %v2554_v53, %v2555_v52 }
 0x16b   : > { %vm1926_vm9 = vcmp.eq.s32.totalorder %v3003_v33, %v1894_v34 }
 0x16c   : > { %v702_v18 = vpop.f32.mrf.mxu1  ;;  %vm1218_vm4 = vcmp.lt.f32.partialorder %v1186_v54, 1.0  ;;  %v1282_v24 = vmul.f32 %v1250_v63, %v1154_v50  ;;  %v2448_v11 = vadd.f32 -0.5, %v1186_v54 }
 0x16d   : > { %v703_v48 = vadd.f32 %v3323_v39, %v702_v18 }
 0x16e   : > { %v1346_v44 = vsel %vm1218_vm4, %v1282_v24, %v2448_v11  ;;  %v2557_v24 = vcvt.f32.s32 %v2556_v25  ;;  %v2559_v11 = vceil.f32 %v3326_v46  ;;  %v3604_v25 = vpop.xlane.xlu1 %900  ;;  %v2817_v46 = vld [vmem:[%s2999_s20 + $0x60] sm:$0xff]  ;;  %vm2573_vm4 = vcmp.lt.s32.totalorder %v3365_v60, 0 }
 0x16f   : > { %v1123_v38 = vsub.f32 %v703_v48, %v2815_v10  ;;  %741 = vmatmul.bf16.gmra.mxu2 %v3217_v43  ;;  %v1396_v45 = vsel %vm342_vm0, %v1346_v44, 0.0  ;;  %v3598_v53 = vsel %vm3333_vm5, %v703_v48, -1e+30  ;;  %4598 = vst [vmem:[#allocation38_spill] sm:$0xff] %v3604_v25  ;;  %v2579_v25 = vceil.f32 %v3378_v41 }
 0x170   : > { %1998 = vadd.xlane.f32.xlu0 %v1957_v42  ;;  %1550 = vmax.xlane.f32.xlu1 %v3583_v57 }
 0x171   : > { %v1155_v50 = vsel %vm1112_vm6, %v1123_v38, 0.0  ;;  %1397 = vadd.xlane.f32.xlu2 %v1396_v45  ;;  %v1958_v45 = vsel %vm1926_vm9, %v703_v48, 0.0 }
 0x172   : > { %v1187_v10 = vand.u32 2147483647, %v1155_v50  ;;  %v1251_v43 = vmul.f32 0.5, %v1155_v50 }
 0x174   : > { %v704_v54 = vpop.f32.mrf.mxu1  ;;  %vm1219_vm8 = vcmp.lt.f32.partialorder %v1187_v10, 1.0  ;;  %v1283_v17 = vmul.f32 %v1251_v43, %v1155_v50  ;;  %v2449_v63 = vadd.f32 -0.5, %v1187_v10  ;;  %v1895_v10 = vadd.s32 4, %v2557_v24 }
 0x175   : > { %v705_v44 = vadd.f32 %v3323_v39, %v704_v54  ;;  %v2561_v43 = vsel %vm2558_vm10, %v2559_v11, %v2560_v20  ;;  %vm2578_vm10 = vcmp.lt.s32.totalorder %v3378_v41, 0 }
 0x176   : > { %v1347_v18 = vsel %vm1219_vm8, %v1283_v17, %v2449_v63  ;;  %vm1927_vm12 = vcmp.eq.s32.totalorder %v3003_v33, %v1895_v10  ;;  %vm2568_vm8 = vcmp.lt.s32.totalorder %v3355_v35, 0 }
 0x177   : > { %v1124_v42 = vsub.f32 %v705_v44, %v2816_v55  ;;  %v1399_v38 = vsel %vm342_vm0, %v1347_v18, 0.0  ;;  %v2564_v18 = vceil.f32 %v3340_v5  ;;  %v2565_v55 = vfloor.f32 %v3340_v5 }
 0x178   : > { %1400 = vadd.xlane.f32.xlu0 %v1399_v38  ;;  %2000 = vadd.xlane.f32.xlu1 %v1958_v45  ;;  %v2562_v38 = vcvt.f32.s32 %v2561_v43  ;;  %v3609_v45 = vpop.xlane.xlu0 %897  ;;  %v3615_v20 = vsel %vm3333_vm5, %v705_v44, -1e+30  ;;  %v1959_v11 = vsel %vm1927_vm12, %v705_v44, 0.0 }
 0x179   : > { %v1156_v52 = vsel %vm1112_vm6, %v1124_v42, 0.0  ;;  %1552 = vmax.xlane.f32.xlu2 %v3598_v53  ;;  %4599 = vst [vmem:[#allocation39_spill] sm:$0xff] %v3609_v45  ;;  %v2821_v45 = vld [vmem:[%s2999_s20 + $0x78] sm:$0xff] }
 0x17a   : > { %v1188_v34 = vand.u32 2147483647, %v1156_v52  ;;  %v1252_v50 = vmul.f32 0.5, %v1156_v52  ;;  %4600 = vst [vmem:[#allocation40_spill] sm:$0xff] %v3615_v20 }
 0x17c   : > { %v707_v54 = vpop.f32.mrf.mxu1  ;;  %vm1220_vm11 = vcmp.lt.f32.partialorder %v1188_v34, 1.0  ;;  %v1284_v17 = vmul.f32 %v1252_v50, %v1156_v52  ;;  %v2450_v63 = vadd.f32 -0.5, %v1188_v34  ;;  %v2566_v50 = vsel %vm2563_vm13, %v2564_v18, %v2565_v55 }
 0x17d   : > { %v708_v48 = vadd.f32 %v3323_v39, %v707_v54 }
 0x17e   : > { %v1348_v42 = vsel %vm1220_vm11, %v1284_v17, %v2450_v63  ;;  %v3624_v63 = vpop.xlane.xlu1 %909 }
 0x17f   : > { %v1125_v3 = vsub.f32 %v708_v48, %v2817_v46  ;;  %746 = vmatmul.bf16.gmra.mxu2 %v3225_v1  ;;  %v1402_v24 = vsel %vm342_vm0, %v1348_v42, 0.0  ;;  %v1896_v1 = vadd.s32 4, %v2562_v38  ;;  %4601 = vst [vmem:[#allocation41_spill] sm:$0xff] %v3624_v63  ;;  %v2567_v42 = vcvt.f32.s32 %v2566_v50 }
 0x180   : > { %1554 = vmax.xlane.f32.xlu0 %v3615_v20  ;;  %1403 = vadd.xlane.f32.xlu1 %v1402_v24  ;;  %v2818_v24 = vld [vmem:[%s2999_s20 + $0x68] sm:$0xff]  ;;  %v3630_v38 = vsel %vm3333_vm5, %v708_v48, -1e+30  ;;  %v2580_v20 = vfloor.f32 %v3378_v41 }
 0x181   : > { %v1157_v46 = vsel %vm1112_vm6, %v1125_v3, 0.0  ;;  %2002 = vadd.xlane.f32.xlu2 %v1959_v11  ;;  %vm1928_vm15 = vcmp.eq.s32.totalorder %v3003_v33, %v1896_v1  ;;  %4602 = vst [vmem:[#allocation42_spill] sm:$0xff] %v3630_v38  ;;  %v3634_v11 = vpop.xlane.xlu2 %903  ;;  %v1897_v50 = vadd.s32 4, %v2567_v42 }
 0x182   : > { %v1189_v52 = vand.u32 2147483647, %v1157_v46  ;;  %v1253_v34 = vmul.f32 0.5, %v1157_v46  ;;  %v1960_v3 = vsel %vm1928_vm15, %v708_v48, 0.0  ;;  %4603 = vst [vmem:[#allocation43_spill] sm:$0xff] %v3634_v11 }
 0x183   : > { %vm1929_vm2 = vcmp.eq.s32.totalorder %v3003_v33, %v1897_v50 }
 0x184   : > { %v709_v43 = vpop.f32.mrf.mxu1  ;;  %vm1221_vm14 = vcmp.lt.f32.partialorder %v1189_v52, 1.0  ;;  %v1285_v54 = vmul.f32 %v1253_v34, %v1157_v46  ;;  %v2451_v17 = vadd.f32 -0.5, %v1189_v52  ;;  %v3636_v46 = vpop.xlane.xlu0 %906 }
 0x185   : > { %v710_v10 = vadd.f32 %v3323_v39, %v709_v43  ;;  %4604 = vst [vmem:[#allocation44_spill] sm:$0xff] %v3636_v46 }
 0x186   : > { %v1349_v44 = vsel %vm1221_vm14, %v1285_v54, %v2451_v17  ;;  %v3649_v63 = vpop.xlane.xlu1 %918 }
 0x187   : > { %v1126_v5 = vsub.f32 %v710_v10, %v2818_v24  ;;  %v1405_v18 = vsel %vm342_vm0, %v1349_v44, 0.0  ;;  %4606 = vst [vmem:[#allocation46_spill] sm:$0xff] %v3649_v63  ;;  %v2570_v63 = vfloor.f32 %v3355_v35 }
 0x188   : > { %v752_v55 = vpop.f32.mrf.mxu3  ;;  %2004 = vadd.xlane.f32.xlu0 %v1960_v3  ;;  %1556 = vmax.xlane.f32.xlu1 %v3630_v38 }
 0x189   : > { %v1158_v1 = vsel %vm1112_vm6, %v1126_v5, 0.0  ;;  %v3641_v52 = vadd.f32 %v3323_v39, %v752_v55  ;;  %1406 = vadd.xlane.f32.xlu2 %v1405_v18  ;;  %v1961_v55 = vsel %vm1929_vm2, %v710_v10, 0.0  ;;  %vm2588_vm2 = vcmp.lt.s32.totalorder %v3429_v21, 0 }
 0x18a   : > { %v1190_v34 = vand.u32 2147483647, %v1158_v1  ;;  %v1254_v48 = vmul.f32 0.5, %v1158_v1 }
 0x18b   : > { %4605 = vst [vmem:[#allocation45_spill] sm:$0xff] %v3641_v52  ;;  %v1143_v43 = vsub.f32 %v3641_v52, %v3195_v4  ;;  %v3653_v4 = vsel %vm3333_vm5, %v710_v10, -1e+30 }
 0x18c   : > { %vm1222_vm1 = vcmp.lt.f32.partialorder %v1190_v34, 1.0  ;;  %v1286_v54 = vmul.f32 %v1254_v48, %v1158_v1  ;;  %v2452_v17 = vadd.f32 -0.5, %v1190_v34  ;;  %4607 = vst [vmem:[#allocation47_spill] sm:$0xff] %v3653_v4 }
 0x18d   : > { %v1175_v44 = vsel %vm1112_vm6, %v1143_v43, 0.0 }
 0x18e   : > { %v1350_v24 = vsel %vm1222_vm1, %v1286_v54, %v2452_v17  ;;  %v1207_v5 = vand.u32 2147483647, %v1175_v44  ;;  %v1271_v3 = vmul.f32 0.5, %v1175_v44  ;;  %v3663_v54 = vpop.xlane.xlu2 %912  ;;  %v3665_v17 = vpop.xlane.xlu0 %915  ;;  %vm2583_vm1 = vcmp.lt.s32.totalorder %v3389_v22, 0 }
 0x18f   : > { %v1408_v18 = vsel %vm342_vm0, %v1350_v24, 0.0  ;;  %4611 = vst [vmem:[#allocation49_spill] sm:$0xff] %v3663_v54  ;;  %v2819_v24 = vld [vmem:[%s2999_s20 + $0xf8] sm:$0xff] }
 0x190   : > { %v754_v42 = vpop.f32.mrf.mxu3  ;;  %1409 = vadd.xlane.f32.xlu0 %v1408_v18  ;;  %2006 = vadd.xlane.f32.xlu1 %v1961_v55  ;;  %v1303_v34 = vmul.f32 %v1271_v3, %v1175_v44  ;;  %v2469_v48 = vadd.f32 -0.5, %v1207_v5  ;;  %vm3659_vm3 = vcmp.lt.f32.partialorder %v1207_v5, 1.0  ;;  %4612 = vst [vmem:[#allocation50_spill] sm:$0xff] %v3665_v17  ;;  %v2569_v55 = vceil.f32 %v3355_v35  ;;  %v2820_v3 = vld [vmem:[%s2999_s20 + $0x70] sm:$0xff] }
 0x191   : > { %v3656_v1 = vadd.f32 %v3323_v39, %v754_v42  ;;  %1558 = vmax.xlane.f32.xlu2 %v3653_v4  ;;  %v2574_v17 = vceil.f32 %v3365_v60 }
 0x192   : > { %v712_v50 = vpop.f32.mrf.mxu2  ;;  %v1367_v42 = vsel %vm3659_vm3, %v1303_v34, %v2469_v48  ;;  %v3692_v34 = vsel %vm3333_vm5, %v3641_v52, -1e+30 }
 0x193   : > { %4608 = vst [vmem:[#allocation48_spill] sm:$0xff] %v3656_v1  ;;  %v1144_v10 = vsub.f32 %v3656_v1, %v2819_v24  ;;  %v3670_v18 = vadd.f32 %v3323_v39, %v712_v50  ;;  %v2575_v50 = vfloor.f32 %v3365_v60  ;;  %v3694_v48 = vpop.xlane.xlu1 %1532  ;;  %v1459_v43 = vsel %vm342_vm0, %v1367_v42, 0.0 }
 0x194   : > { %4614 = vst [vmem:[#allocation52_spill] sm:$0xff] %v3692_v34  ;;  %v2571_v60 = vsel %vm2568_vm8, %v2569_v55, %v2570_v63  ;;  %v3720_v63 = vsel %vm3333_vm5, %v3656_v1, -1e+30  ;;  %vm2598_vm8 = vcmp.lt.s32.totalorder %v3455_v28, 0 }
 0x195   : > { %v1176_v44 = vsel %vm1112_vm6, %v1144_v10, 0.0  ;;  %v1127_v5 = vsub.f32 %v3670_v18, %v2820_v3  ;;  %v3687_v10 = vsel %vm3333_vm5, %v3670_v18, -1e+30  ;;  %v2572_v38 = vcvt.f32.s32 %v2571_v60  ;;  %4618 = vst [vmem:[#allocation54_spill] sm:$0xff] %v3720_v63 }
 0x196   : > { %v1208_v54 = vand.u32 2147483647, %v1176_v44  ;;  %v1272_v24 = vmul.f32 0.5, %v1176_v44  ;;  %4613 = vst [vmem:[#allocation51_spill] sm:$0xff] %v3687_v10  ;;  %v3705_v0 = vpop.xlane.xlu0 %1980 }
 0x197   : > { %v1159_v46 = vsel %vm1112_vm6, %v1127_v5, 0.0  ;;  %4617 = vst [vmem:[#allocation53_spill] sm:$0xff] %v3705_v0 }
 0x198   : > { %1560 = vmax.xlane.f32.xlu0 %v3687_v10  ;;  %1592 = vmax.xlane.f32.xlu1 %v3692_v34  ;;  %v1304_v3 = vmul.f32 %v1272_v24, %v1176_v44  ;;  %v2470_v5 = vadd.f32 -0.5, %v1208_v54  ;;  %vm3700_vm7 = vcmp.lt.f32.partialorder %v1208_v54, 1.0  ;;  %v1191_v52 = vand.u32 2147483647, %v1159_v46 }
 0x199   : > { %1460 = vadd.xlane.f32.xlu2 %v1459_v43  ;;  %v1255_v61 = vmul.f32 0.5, %v1159_v46  ;;  %v2576_v24 = vsel %vm2573_vm4, %v2574_v17, %v2575_v50  ;;  %v2581_v17 = vsel %vm2578_vm10, %v2579_v25, %v2580_v20  ;;  %vm2593_vm10 = vcmp.lt.s32.totalorder %v3434_v13, 0 }
 0x19a   : > { %v714_v15 = vpop.f32.mrf.mxu2  ;;  %vm1223_vm9 = vcmp.lt.f32.partialorder %v1191_v52, 1.0  ;;  %v1368_v43 = vsel %vm3700_vm7, %v1304_v3, %v2470_v5  ;;  %v2453_v54 = vadd.f32 -0.5, %v1191_v52  ;;  %v2577_v35 = vcvt.f32.s32 %v2576_v24  ;;  %v2822_v5 = vld [vmem:[%s2999_s20 + $0x80] sm:$0xff] }
 0x19b   : > { %v715_v10 = vadd.f32 %v3323_v39, %v714_v15  ;;  %v1371_v42 = vpop.xlane.xlu2 %1370  ;;  %v1287_v44 = vmul.f32 %v1255_v61, %v1159_v46  ;;  %v1462_v0 = vsel %vm342_vm0, %v1368_v43, 0.0  ;;  %v1596_v61 = vsub.f32 %v3348_v14, %v3694_v48  ;;  %v3726_v11 = vpop.xlane.xlu1 %1982 }
 0x19c   : > { %v1899_v46 = vadd.s32 4, %v2577_v35  ;;  %v1465_v50 = vmul.f32 %v3241_v23, %v1371_v42  ;;  %v2582_v35 = vcvt.f32.s32 %v2581_v17 }
 0x19d   : > { %v1128_v34 = vsub.f32 %v715_v10, %v2821_v45  ;;  %v1351_v4 = vsel %vm1223_vm9, %v1287_v44, %v2453_v54  ;;  %v1628_v55 = vmul.f32 1.442695, %v1596_v61 }
 0x19e   : > { %v1411_v15 = vsel %vm342_vm0, %v1351_v4, 0.0  ;;  %v1898_v4 = vadd.s32 4, %v2572_v38  ;;  %vm1931_vm11 = vcmp.eq.s32.totalorder %v3003_v33, %v1899_v46  ;;  %v1900_v42 = vadd.s32 4, %v2582_v35 }
 0x19f   : > { %v1160_v45 = vsel %vm1112_vm6, %v1128_v34, 0.0  ;;  %v1963_v54 = vsel %vm1931_vm11, %v715_v10, 0.0  ;;  %2685 = vpow2.f32 %v1628_v55  ;;  %v2823_v55 = vld [vmem:[%s2999_s20 + $0x88] sm:$0xff] }
 0x1a0   : > { %1463 = vadd.xlane.f32.xlu0 %v1462_v0  ;;  %1412 = vadd.xlane.f32.xlu1 %v1411_v15  ;;  %v1192_v44 = vand.u32 2147483647, %v1160_v45  ;;  %v1256_v24 = vmul.f32 0.5, %v1160_v45  ;;  %v3740_v15 = vsel %vm3333_vm5, %v715_v10, -1e+30  ;;  %vm1930_vm12 = vcmp.eq.s32.totalorder %v3003_v33, %v1898_v4 }
 0x1a1   : > { %1594 = vmax.xlane.f32.xlu2 %v3720_v63  ;;  %v1962_v23 = vsel %vm1930_vm12, %v3670_v18, 0.0  ;;  %vm1932_vm14 = vcmp.eq.s32.totalorder %v3003_v33, %v1900_v42 }
 0x1a2   : > { %v717_v60 = vpop.f32.mrf.mxu2  ;;  %v1288_v20 = vmul.f32 %v1256_v24, %v1160_v45  ;;  %v2454_v38 = vadd.f32 -0.5, %v1192_v44  ;;  %vm3749_vm13 = vcmp.lt.f32.partialorder %v1192_v44, 1.0 }
 0x1a3   : > { %v3729_v0 = vadd.f32 %v3323_v39, %v717_v60  ;;  %v1374_v14 = vpop.xlane.xlu0 %1373  ;;  %v3731_v52 = vpop.xlane.xlu2 %1534 }
 0x1a4   : > { %v1466_v3 = vmul.f32 %v3247_v27, %v1374_v14  ;;  %v1597_v25 = vsub.f32 %v3399_v31, %v3731_v52 }
 0x1a5   : > { %v1129_v34 = vsub.f32 %v3729_v0, %v2822_v5  ;;  %v2686_v5 = vpop.eup %2685  ;;  %v1964_v44 = vsel %vm1932_vm14, %v3729_v0, 0.0 }
 0x1a6   : > { %v2109_v43 = vadd.f32 %v1466_v3, %v1465_v50  ;;  %v1630_v45 = vmul.f32 1.442695, %v1597_v25  ;;  %v1352_v3 = vsel %vm3749_vm13, %v1288_v20, %v2454_v38  ;;  %vm2603_vm13 = vcmp.lt.s32.totalorder %v3496_v32, 0 }
 0x1a7   : > { %v1161_v27 = vsel %vm1112_vm6, %v1129_v34, 0.0  ;;  %v1414_v24 = vsel %vm342_vm0, %v1352_v3, 0.0 }
 0x1a8   : > { %2010 = vadd.xlane.f32.xlu0 %v1963_v54  ;;  %1562 = vmax.xlane.f32.xlu1 %v3740_v15  ;;  %v1193_v31 = vand.u32 2147483647, %v1161_v27  ;;  %v1257_v17 = vmul.f32 0.5, %v1161_v27  ;;  %2687 = vpow2.f32 %v1630_v45  ;;  %v2590_v45 = vfloor.f32 %v3429_v21 }
 0x1a9   : > { %2008 = vadd.xlane.f32.xlu2 %v1962_v23 }
 0x1aa   : > { %v719_v10 = vpop.f32.mrf.mxu2  ;;  %v1289_v35 = vmul.f32 %v1257_v17, %v1161_v27  ;;  %v2455_v54 = vadd.f32 -0.5, %v1193_v31  ;;  %vm3772_vm15 = vcmp.lt.f32.partialorder %v1193_v31, 1.0  ;;  %v2589_v31 = vceil.f32 %v3429_v21 }
 0x1ab   : > { %v3754_v60 = vadd.f32 %v3323_v39, %v719_v10  ;;  %v3756_v18 = vpop.xlane.xlu0 %1536  ;;  %v1377_v46 = vpop.xlane.xlu1 %1376  ;;  %v2584_v39 = vceil.f32 %v3389_v22  ;;  %v2595_v21 = vfloor.f32 %v3434_v13 }
 0x1ac   : > { %v1467_v14 = vmul.f32 %v3253_v30, %v1377_v46  ;;  %v3759_v4 = vpop.xlane.xlu2 %1984  ;;  %v2585_v30 = vfloor.f32 %v3389_v22  ;;  %v1353_v27 = vsel %vm3772_vm15, %v1289_v35, %v2455_v54 }
 0x1ad   : > { %v1130_v50 = vsub.f32 %v3754_v60, %v2823_v55 }
 0x1ae   : > { %v2110_v34 = vadd.f32 %v2109_v43, %v1467_v14  ;;  %v2586_v42 = vsel %vm2583_vm1, %v2584_v39, %v2585_v30  ;;  %v2688_v17 = vpop.eup %2687  ;;  %v2591_v43 = vsel %vm2588_vm2, %v2589_v31, %v2590_v45  ;;  %vm2613_vm2 = vcmp.lt.s32.totalorder %v3514_v8, 0 }
 0x1af   : > { %v1162_v23 = vsel %vm1112_vm6, %v1130_v50, 0.0  ;;  %v1417_v50 = vsel %vm342_vm0, %v1353_v27, 0.0  ;;  %v2587_v3 = vcvt.f32.s32 %v2586_v42  ;;  %v2825_v42 = vld [vmem:[%s2999_s20 + $0x90] sm:$0xff] }
 0x1b0   : > { %2012 = vadd.xlane.f32.xlu1 %v1964_v44  ;;  %1692 = vadd.xlane.f32.xlu0 %v2686_v5  ;;  %v1194_v61 = vand.u32 2147483647, %v1162_v23  ;;  %v1258_v46 = vmul.f32 0.5, %v1162_v23  ;;  %v3790_v5 = vsel %vm3333_vm5, %v3729_v0, -1e+30  ;;  %v1598_v0 = vsub.f32 %v3418_v2, %v3756_v18 }
 0x1b1   : > { %1415 = vadd.xlane.f32.xlu2 %v1414_v24  ;;  %v3817_v2 = vsel %vm3333_vm5, %v3754_v60, -1e+30 }
 0x1b2   : > { %v722_v25 = vpop.f32.mrf.mxu2  ;;  %v1290_v39 = vmul.f32 %v1258_v46, %v1162_v23  ;;  %v2456_v44 = vadd.f32 -0.5, %v1194_v61  ;;  %vm3800_vm3 = vcmp.lt.f32.partialorder %v1194_v61, 1.0  ;;  %v1901_v23 = vadd.s32 4, %v2587_v3 }
 0x1b3   : > { %v3777_v20 = vpop.xlane.xlu0 %1986  ;;  %v3779_v38 = vpop.xlane.xlu1 %1538  ;;  %v1632_v46 = vmul.f32 1.442695, %v1598_v0 }
 0x1b4   : > { %v1380_v10 = vpop.xlane.xlu2 %1379  ;;  %vm1933_vm4 = vcmp.eq.s32.totalorder %v3003_v33, %v1901_v23 }
 0x1b5   : > { %v1468_v14 = vmul.f32 %v3261_v36, %v1380_v10  ;;  %v3796_v36 = vld [vmem:[%s4483_s4] ss:$0 sm:$0xff]  ;;  %v1965_v45 = vsel %vm1933_vm4, %v3754_v60, 0.0  ;;  %2689 = vpow2.f32 %v1632_v46  ;;  %vm2608_vm4 = vcmp.lt.s32.totalorder %v3499_v51, 0 }
 0x1b7   : > { %v2111_v55 = vadd.f32 %v2110_v34, %v1468_v14  ;;  %v723_v34 = vadd.f32 %v3796_v36, %v722_v25  ;;  %v1354_v25 = vsel %vm3800_vm3, %v1290_v39, %v2456_v44 }
 0x1b8   : > { %1418 = vadd.xlane.f32.xlu0 %v1417_v50  ;;  %1694 = vadd.xlane.f32.xlu1 %v2688_v17  ;;  %v2592_v17 = vcvt.f32.s32 %v2591_v43  ;;  %v1420_v31 = vsel %vm342_vm0, %v1354_v25, 0.0  ;;  %v2826_v43 = vld [vmem:[%s2999_s20 + $0x98] sm:$0xff] }
 0x1b9   : > { %1564 = vmax.xlane.f32.xlu2 %v3790_v5  ;;  %v1131_v61 = vsub.f32 %v723_v34, %v2825_v42 }
 0x1ba   : > { %v724_v24 = vpop.f32.mrf.mxu2  ;;  %v1902_v44 = vadd.s32 4, %v2592_v17  ;;  %v3844_v17 = vsel %vm3333_vm5, %v723_v34, -1e+30 }
 0x1bb   : > { %v1383_v35 = vpop.xlane.xlu0 %1382  ;;  %v3806_v54 = vpop.xlane.xlu1 %1988  ;;  %v3828_v50 = vadd.f32 %v3796_v36, %v724_v24 }
 0x1bc   : > { %v1469_v10 = vmul.f32 %v3266_v40, %v1383_v35  ;;  %v3809_v27 = vpop.xlane.xlu2 %1540  ;;  %v1599_v40 = vsub.f32 %v3444_v37, %v3779_v38  ;;  %vm1934_vm7 = vcmp.eq.s32.totalorder %v3003_v33, %v1902_v44 }
 0x1bd   : > { %v1600_v3 = vsub.f32 %v3478_v12, %v3809_v27  ;;  %v1132_v24 = vsub.f32 %v3828_v50, %v2826_v43  ;;  %v2599_v12 = vceil.f32 %v3455_v28  ;;  %v1966_v46 = vsel %vm1934_vm7, %v723_v34, 0.0  ;;  %v2827_v43 = vld [vmem:[%s2999_s20 + $0xa0] sm:$0xff] }
 0x1be   : > { %v2112_v14 = vadd.f32 %v2111_v55, %v1469_v10  ;;  %v1163_v55 = vsel %vm1112_vm6, %v1131_v61, 0.0  ;;  %v1634_v0 = vmul.f32 1.442695, %v1599_v40  ;;  %v2600_v61 = vfloor.f32 %v3455_v28 }
 0x1bf   : > { %v1259_v23 = vmul.f32 0.5, %v1163_v55  ;;  %v1636_v10 = vmul.f32 1.442695, %v1600_v3  ;;  %v1195_v25 = vand.u32 2147483647, %v1163_v55  ;;  %v2594_v28 = vceil.f32 %v3434_v13 }
 0x1c0   : > { %1566 = vmax.xlane.f32.xlu0 %v3817_v2  ;;  %1421 = vadd.xlane.f32.xlu1 %v1420_v31  ;;  %2691 = vpow2.f32 %v1634_v0 }
 0x1c1   : > { %2014 = vadd.xlane.f32.xlu2 %v1965_v45  ;;  %v1291_v31 = vmul.f32 %v1259_v23, %v1163_v55  ;;  %2693 = vpow2.f32 %v1636_v10  ;;  %v2457_v45 = vadd.f32 -0.5, %v1195_v25  ;;  %vm3853_vm9 = vcmp.lt.f32.partialorder %v1195_v25, 1.0 }
 0x1c2   : > { %v727_v39 = vpop.f32.mrf.mxu2  ;;  %v2601_v55 = vsel %vm2598_vm8, %v2599_v12, %v2600_v61 }
 0x1c3   : > { %v3832_v37 = vpop.xlane.xlu0 %1542  ;;  %v1386_v30 = vpop.xlane.xlu1 %1385  ;;  %v3851_v40 = vadd.f32 %v3796_v36, %v727_v39  ;;  %v1355_v10 = vsel %vm3853_vm9, %v1291_v31, %v2457_v45 }
 0x1c4   : > { %v1470_v60 = vmul.f32 %v3274_v47, %v1386_v30  ;;  %v3835_v35 = vpop.xlane.xlu2 %1990  ;;  %v2690_v47 = vpop.eup %2689  ;;  %v1423_v12 = vsel %vm342_vm0, %v1355_v10, 0.0 }
 0x1c6   : > { %v2113_v42 = vadd.f32 %v2112_v14, %v1470_v60  ;;  %v1164_v14 = vsel %vm1112_vm6, %v1132_v24, 0.0  ;;  %v1133_v24 = vsub.f32 %v3851_v40, %v2827_v43  ;;  %v2692_v25 = vpop.eup %2691 }
 0x1c7   : > { %v1196_v60 = vand.u32 2147483647, %v1164_v14  ;;  %v1260_v23 = vmul.f32 0.5, %v1164_v14 }
 0x1c8   : > { %2016 = vadd.xlane.f32.xlu0 %v1966_v46  ;;  %1568 = vmax.xlane.f32.xlu1 %v3844_v17  ;;  %v2602_v46 = vcvt.f32.s32 %v2601_v55 }
 0x1c9   : > { %1696 = vadd.xlane.f32.xlu2 %v2690_v47  ;;  %v2694_v47 = vpop.eup %2693  ;;  %v1292_v61 = vmul.f32 %v1260_v23, %v1164_v14  ;;  %v2458_v22 = vadd.f32 -0.5, %v1196_v60  ;;  %vm3872_vm11 = vcmp.lt.f32.partialorder %v1196_v60, 1.0  ;;  %v2604_v60 = vceil.f32 %v3496_v32 }
 0x1ca   : > { %v729_v34 = vpop.f32.mrf.mxu2  ;;  %v1904_v3 = vadd.s32 4, %v2602_v46 }
 0x1cb   : > { %v3857_v44 = vpop.xlane.xlu0 %1992  ;;  %v3859_v30 = vpop.xlane.xlu1 %1544  ;;  %v1356_v23 = vsel %vm3872_vm11, %v1292_v61, %v2458_v22  ;;  %v1601_v61 = vsub.f32 %v3493_v56, %v3832_v37  ;;  %v3913_v56 = vsel %vm3333_vm5, %v3851_v40, -1e+30 }
 0x1cc   : > { %v1389_v0 = vpop.xlane.xlu2 %1388  ;;  %vm1936_vm12 = vcmp.eq.s32.totalorder %v3003_v33, %v1904_v3  ;;  %v1426_v46 = vsel %vm342_vm0, %v1356_v23, 0.0 }
 0x1cd   : > { %v1471_v39 = vmul.f32 %v3283_v59, %v1389_v0  ;;  %v1165_v59 = vsel %vm1112_vm6, %v1133_v24, 0.0  ;;  %v2596_v0 = vsel %vm2593_vm10, %v2594_v28, %v2595_v21  ;;  %v1968_v21 = vsel %vm1936_vm12, %v3851_v40, 0.0 }
 0x1ce   : > { %v1261_v24 = vmul.f32 0.5, %v1165_v59  ;;  %v2597_v28 = vcvt.f32.s32 %v2596_v0 }
 0x1cf   : > { %v2114_v1 = vadd.f32 %v2113_v42, %v1471_v39  ;;  %v1197_v39 = vand.u32 2147483647, %v1165_v59 }
 0x1d0   : > { %1698 = vadd.xlane.f32.xlu0 %v2692_v25  ;;  %1700 = vadd.xlane.f32.xlu1 %v2694_v47  ;;  %v2605_v25 = vfloor.f32 %v3496_v32  ;;  %v1293_v22 = vmul.f32 %v1261_v24, %v1165_v59 }
 0x1d1   : > { %1424 = vadd.xlane.f32.xlu2 %v1423_v12  ;;  %v2459_v47 = vadd.f32 -0.5, %v1197_v39  ;;  %vm3896_vm14 = vcmp.lt.f32.partialorder %v1197_v39, 1.0  ;;  %v2828_v39 = vld [vmem:[%s2999_s20 + $0xa8] sm:$0xff] }
 0x1d2   : > { %v732_v45 = vpop.f32.mrf.mxu2  ;;  %v2606_v0 = vsel %vm2603_vm13, %v2604_v60, %v2605_v25 }
 0x1d3   : > { %v1392_v55 = vpop.xlane.xlu0 %1391  ;;  %v3876_v42 = vpop.xlane.xlu1 %1994  ;;  %v2607_v32 = vcvt.f32.s32 %v2606_v0 }
 0x1d4   : > { %v1472_v43 = vmul.f32 %v3289_v62, %v1392_v55  ;;  %v3879_v14 = vpop.xlane.xlu2 %1546  ;;  %v3891_v62 = vsel %vm3333_vm5, %v3828_v50, -1e+30  ;;  %v1903_v55 = vadd.s32 4, %v2597_v28  ;;  %v3924_v28 = vadd.f32 %v3796_v36, %v732_v45 }
 0x1d5   : > { %v1603_v40 = vsub.f32 %v3556_v29, %v3879_v14 }
 0x1d6   : > { %v2115_v10 = vadd.f32 %v2114_v1, %v1472_v43  ;;  %v730_v1 = vadd.f32 %v3796_v36, %v729_v34  ;;  %v1357_v34 = vsel %vm3896_vm14, %v1293_v22, %v2459_v47  ;;  %vm1935_vm15 = vcmp.eq.s32.totalorder %v3003_v33, %v1903_v55 }
 0x1d7   : > { %v1429_v60 = vsel %vm342_vm0, %v1357_v34, 0.0  ;;  %v1967_v25 = vsel %vm1935_vm15, %v3828_v50, 0.0  ;;  %v1905_v22 = vadd.s32 4, %v2607_v32  ;;  %v1642_v0 = vmul.f32 1.442695, %v1603_v40 }
 0x1d8   : > { %1427 = vadd.xlane.f32.xlu0 %v1426_v46  ;;  %2020 = vadd.xlane.f32.xlu1 %v1968_v21  ;;  %v1134_v24 = vsub.f32 %v730_v1, %v2828_v39  ;;  %v1638_v46 = vmul.f32 1.442695, %v1601_v61  ;;  %v2614_v34 = vceil.f32 %v3514_v8  ;;  %v2615_v32 = vfloor.f32 %v3514_v8 }
 0x1d9   : > { %1570 = vmax.xlane.f32.xlu2 %v3891_v62  ;;  %vm1937_vm1 = vcmp.eq.s32.totalorder %v3003_v33, %v1905_v22  ;;  %v2609_v8 = vceil.f32 %v3499_v51 }
 0x1da   : > { %v734_v59 = vpop.f32.mrf.mxu2  ;;  %2695 = vpow2.f32 %v1638_v46  ;;  %v3940_v46 = vsel %vm3333_vm5, %v730_v1, -1e+30 }
 0x1db   : > { %v3902_v31 = vpop.xlane.xlu0 %1548  ;;  %v1395_v3 = vpop.xlane.xlu1 %1394 }
 0x1dc   : > { %v1473_v43 = vmul.f32 %v3296_v9, %v1395_v3  ;;  %v3905_v23 = vpop.xlane.xlu2 %1996  ;;  %v1602_v9 = vsub.f32 %v3531_v6, %v3859_v30  ;;  %v2829_v3 = vld [vmem:[%s2999_s20 + $0xb0] sm:$0xff] }
 0x1dd   : > { %v1135_v55 = vsub.f32 %v3924_v28, %v2829_v3 }
 0x1de   : > { %v2116_v21 = vadd.f32 %v2115_v10, %v1473_v43  ;;  %v1166_v10 = vsel %vm1112_vm6, %v1134_v24, 0.0  ;;  %v1640_v12 = vmul.f32 1.442695, %v1602_v9  ;;  %v1969_v24 = vsel %vm1937_vm1, %v730_v1, 0.0 }
 0x1df   : > { %v1262_v50 = vmul.f32 0.5, %v1166_v10  ;;  %v1198_v43 = vand.u32 2147483647, %v1166_v10  ;;  %v1167_v9 = vsel %vm1112_vm6, %v1135_v55, 0.0  ;;  %v2830_v55 = vld [vmem:[%s2999_s20 + $0xb8] sm:$0xff] }
 0x1e0   : > { %1572 = vmax.xlane.f32.xlu0 %v3913_v56  ;;  %1430 = vadd.xlane.f32.xlu1 %v1429_v60  ;;  %v2696_v60 = vpop.eup %2695  ;;  %2697 = vpow2.f32 %v1640_v12  ;;  %v2616_v12 = vsel %vm2613_vm2, %v2614_v34, %v2615_v32  ;;  %v1263_v3 = vmul.f32 0.5, %v1167_v9  ;;  %v2610_v34 = vfloor.f32 %v3499_v51 }
 0x1e1   : > { %2018 = vadd.xlane.f32.xlu2 %v1967_v25  ;;  %2699 = vpow2.f32 %v1642_v0  ;;  %v2460_v25 = vadd.f32 -0.5, %v1198_v43  ;;  %vm3949_vm3 = vcmp.lt.f32.partialorder %v1198_v43, 1.0 }
 0x1e2   : > { %v737_v29 = vpop.f32.mrf.mxu2 }
 0x1e3   : > { %v3928_v47 = vpop.xlane.xlu0 %1998  ;;  %v3930_v6 = vpop.xlane.xlu1 %1550 }
 0x1e4   : > { %v1398_v61 = vpop.xlane.xlu2 %1397 }
 0x1e5   : > { %v1474_v45 = vmul.f32 %v3307_v19, %v1398_v61  ;;  %v1294_v19 = vmul.f32 %v1262_v50, %v1166_v10  ;;  %v1199_v50 = vand.u32 2147483647, %v1167_v9 }
 0x1e7   : > { %v2117_v39 = vadd.f32 %v2116_v21, %v1474_v45  ;;  %v3947_v21 = vadd.f32 %v3796_v36, %v734_v59  ;;  %v1358_v0 = vsel %vm3949_vm3, %v1294_v19, %v2460_v25  ;;  %v2698_v45 = vpop.eup %2697  ;;  %v2461_v13 = vadd.f32 -0.5, %v1199_v50 }
 0x1e8   : > { %2022 = vadd.xlane.f32.xlu0 %v1969_v24  ;;  %1574 = vmax.xlane.f32.xlu1 %v3940_v46  ;;  %v2617_v24 = vcvt.f32.s32 %v2616_v12  ;;  %vm1231_vm7 = vcmp.lt.f32.partialorder %v1199_v50, 1.0  ;;  %v2611_v12 = vsel %vm2608_vm4, %v2609_v8, %v2610_v34 }
 0x1e9   : > { %1702 = vadd.xlane.f32.xlu2 %v2696_v60  ;;  %v1136_v59 = vsub.f32 %v3947_v21, %v2830_v55  ;;  %v2700_v60 = vpop.eup %2699  ;;  %v2612_v50 = vcvt.f32.s32 %v2611_v12  ;;  %v2831_v12 = vld [vmem:[%s2999_s20 + $0xc0] sm:$0xff]  ;;  %v4010_v51 = vsel %vm3333_vm5, %v3947_v21, -1e+30 }
 0x1ea   : > { %v739_v32 = vpop.f32.mrf.mxu2 }
 0x1eb   : > { %v1401_v40 = vpop.xlane.xlu0 %1400  ;;  %v3953_v22 = vpop.xlane.xlu1 %2000  ;;  %v1168_v19 = vsel %vm1112_vm6, %v1136_v59, 0.0  ;;  %v3987_v34 = vadd.f32 %v3796_v36, %v739_v32 }
 0x1ec   : > { %4633 = vst [vmem:[#allocation55_spill] sm:$0xff] %v3953_v22  ;;  %v1475_v10 = vmul.f32 %v3314_v26, %v1401_v40  ;;  %v3956_v61 = vpop.xlane.xlu2 %1552  ;;  %v1432_v26 = vsel %vm342_vm0, %v1358_v0, 0.0  ;;  %v1295_v40 = vmul.f32 %v1263_v3, %v1167_v9  ;;  %v1264_v9 = vmul.f32 0.5, %v1168_v19 }
 0x1ee   : > { %v2118_v43 = vadd.f32 %v2117_v39, %v1475_v10  ;;  %v1907_v39 = vadd.s32 4, %v2617_v24  ;;  %v1359_v0 = vsel %vm1231_vm7, %v1295_v40, %v2461_v13  ;;  %v3977_v24 = vadd.f32 %v3796_v36, %v737_v29 }
 0x1ef   : > { %v1296_v13 = vmul.f32 %v1264_v9, %v1168_v19 }
 0x1f0   : > { %1704 = vadd.xlane.f32.xlu0 %v2698_v45  ;;  %1706 = vadd.xlane.f32.xlu1 %v2700_v60  ;;  %v1200_v45 = vand.u32 2147483647, %v1168_v19  ;;  %vm1939_vm8 = vcmp.eq.s32.totalorder %v3003_v33, %v1907_v39  ;;  %v1435_v60 = vsel %vm342_vm0, %v1359_v0, 0.0 }
 0x1f1   : > { %1433 = vadd.xlane.f32.xlu2 %v1432_v26  ;;  %v1971_v59 = vsel %vm1939_vm8, %v3947_v21, 0.0  ;;  %v1604_v26 = vsub.f32 %v3569_v58, %v3902_v31  ;;  %v1606_v21 = vsub.f32 %v3598_v53, %v3956_v61 }
 0x1f2   : > { %v2462_v8 = vadd.f32 -0.5, %v1200_v45  ;;  %vm3990_vm9 = vcmp.lt.f32.partialorder %v1200_v45, 1.0  ;;  %v742_v40 = vpop.f32.mrf.mxu2  ;;  %v2832_v45 = vld [vmem:[%s2999_s20 + $0xc8] sm:$0xff] }
 0x1f3   : > { %v3968_v25 = vpop.xlane.xlu0 %1554  ;;  %v1404_v1 = vpop.xlane.xlu1 %1403  ;;  %v1138_v9 = vsub.f32 %v3987_v34, %v2832_v45  ;;  %v1644_v58 = vmul.f32 1.442695, %v1604_v26  ;;  %v2833_v45 = vld [vmem:[%s2999_s20 + $0xd0] sm:$0xff] }
 0x1f4   : > { %4634 = vst [vmem:[#allocation56_spill] sm:$0xff] %v3968_v25  ;;  %v1476_v10 = vmul.f32 %v3329_v49, %v1404_v1  ;;  %v3971_v55 = vpop.xlane.xlu2 %2002  ;;  %v3982_v49 = vsel %vm3333_vm5, %v3924_v28, -1e+30  ;;  %v1906_v1 = vadd.s32 4, %v2612_v50 }
 0x1f5   : > { %4635 = vst [vmem:[#allocation57_spill] sm:$0xff] %v3971_v55 }
 0x1f6   : > { %v2119_v3 = vadd.f32 %v2118_v43, %v1476_v10  ;;  %v1605_v43 = vsub.f32 %v3583_v57, %v3930_v6  ;;  %v1137_v57 = vsub.f32 %v3977_v24, %v2831_v12  ;;  %v1360_v10 = vsel %vm3990_vm9, %v1296_v13, %v2462_v8 }
 0x1f7   : > { %vm1938_vm10 = vcmp.eq.s32.totalorder %v3003_v33, %v1906_v1  ;;  %v1438_v50 = vsel %vm342_vm0, %v1360_v10, 0.0  ;;  %v4642_v1 = vld [vmem:[#allocation17_spill] sm:$0xff] }
 0x1f8   : > { %1436 = vadd.xlane.f32.xlu0 %v1435_v60  ;;  %2026 = vadd.xlane.f32.xlu1 %v1971_v59  ;;  %v1646_v0 = vmul.f32 1.442695, %v1605_v43  ;;  %v1169_v13 = vsel %vm1112_vm6, %v1137_v57, 0.0  ;;  %v1970_v8 = vsel %vm1938_vm10, %v3924_v28, 0.0 }
 0x1f9   : > { %1576 = vmax.xlane.f32.xlu2 %v3982_v49  ;;  %v1265_v10 = vmul.f32 0.5, %v1169_v13 }
 0x1fa   : > { %2701 = vpow2.f32 %v1646_v0  ;;  %v744_v26 = vpop.f32.mrf.mxu2  ;;  %v1648_v0 = vmul.f32 1.442695, %v1606_v21 }
 0x1fb   : > { %v3996_v39 = vpop.xlane.xlu0 %2004  ;;  %v3998_v19 = vpop.xlane.xlu1 %1556  ;;  %2703 = vpow2.f32 %v1644_v58  ;;  %v4035_v58 = vsel %vm3333_vm5, %v3977_v24, -1e+30 }
 0x1fc   : > { %4638 = vst [vmem:[#allocation58_spill] sm:$0xff] %v3996_v39  ;;  %v1407_v32 = vpop.xlane.xlu2 %1406  ;;  %2705 = vpow2.f32 %v1648_v0 }
 0x1fd   : > { %4639 = vst [vmem:[#allocation59_spill] sm:$0xff] %v3998_v19  ;;  %v1477_v60 = vmul.f32 %v3343_v7, %v1407_v32  ;;  %v1170_v7 = vsel %vm1112_vm6, %v1138_v9, 0.0  ;;  %v1201_v9 = vand.u32 2147483647, %v1169_v13 }
 0x1fe   : > { %v1202_v57 = vand.u32 2147483647, %v1170_v7  ;;  %v1266_v32 = vmul.f32 0.5, %v1170_v7 }
 0x1ff   : > { %v2120_v59 = vadd.f32 %v2119_v3, %v1477_v60  ;;  %v4023_v3 = vadd.f32 %v3796_v36, %v742_v40  ;;  %vm1233_vm12 = vcmp.lt.f32.partialorder %v1201_v9, 1.0 }
 0x200   : > { %1578 = vmax.xlane.f32.xlu0 %v4010_v51  ;;  %1439 = vadd.xlane.f32.xlu1 %v1438_v50  ;;  %v2702_v60 = vpop.eup %2701  ;;  %vm1234_vm11 = vcmp.lt.f32.partialorder %v1202_v57, 1.0 }
 0x201   : > { %4640 = vst [vmem:[#allocation60_spill] sm:$0xff] %v4023_v3  ;;  %2024 = vadd.xlane.f32.xlu2 %v1970_v8  ;;  %v1139_v53 = vsub.f32 %v4023_v3, %v2833_v45  ;;  %v2704_v50 = vpop.eup %2703  ;;  %v1298_v8 = vmul.f32 %v1266_v32, %v1170_v7 }
 0x202   : > { %v747_v32 = vpop.f32.mrf.mxu2 }
 0x203   : > { %v1410_v43 = vpop.xlane.xlu0 %1409  ;;  %v4025_v29 = vpop.xlane.xlu1 %2006  ;;  %v1171_v21 = vsel %vm1112_vm6, %v1139_v53, 0.0 }
 0x204   : > { %4641 = vst [vmem:[#allocation61_spill] sm:$0xff] %v4025_v29  ;;  %v1478_v28 = vmul.f32 %v4642_v1, %v1410_v43  ;;  %v4028_v12 = vpop.xlane.xlu2 %1558  ;;  %v2464_v43 = vadd.f32 -0.5, %v1202_v57  ;;  %v1297_v1 = vmul.f32 %v1265_v10, %v1169_v13  ;;  %v1203_v29 = vand.u32 2147483647, %v1171_v21  ;;  %v2706_v13 = vpop.eup %2705 }
 0x205   : > { %4643 = vst [vmem:[#allocation17_spill] sm:$0xff] %v4028_v12  ;;  %v1267_v63 = vmul.f32 0.5, %v1171_v21 }
 0x206   : > { %v2121_v40 = vadd.f32 %v2120_v59, %v1478_v28  ;;  %v2463_v59 = vadd.f32 -0.5, %v1201_v9  ;;  %v2465_v53 = vadd.f32 -0.5, %v1203_v29  ;;  %v4049_v9 = vadd.f32 %v3796_v36, %v744_v26 }
 0x207   : > { %v1299_v0 = vmul.f32 %v1267_v63, %v1171_v21  ;;  %vm4056_vm13 = vcmp.lt.f32.partialorder %v1203_v29, 1.0 }
 0x208   : > { %1710 = vadd.xlane.f32.xlu0 %v2702_v60  ;;  %1580 = vmax.xlane.f32.xlu1 %v4035_v58  ;;  %v1362_v60 = vsel %vm1234_vm11, %v1298_v8, %v2464_v43  ;;  %v1361_v7 = vsel %vm1233_vm12, %v1297_v1, %v2463_v59  ;;  %4647 = vst [vmem:[#allocation65_spill] sm:$0xff] %v4049_v9  ;;  %v4652_v59 = vld [vmem:[#allocation40_spill] sm:$0xff] }
 0x209   : > { %1708 = vadd.xlane.f32.xlu2 %v2704_v50  ;;  %v1444_v10 = vsel %vm342_vm0, %v1362_v60, 0.0  ;;  %v1441_v57 = vsel %vm342_vm0, %v1361_v7, 0.0  ;;  %v4648_v50 = vld [vmem:[#allocation42_spill] sm:$0xff]  ;;  %v4054_v43 = vadd.f32 %v3796_v36, %v747_v32  ;;  %v1607_v60 = vsub.f32 %v4652_v59, %v3968_v25  ;;  %v4654_v7 = vld [vmem:[#allocation19_spill] sm:$0xff]  ;;  %v2834_v32 = vld [vmem:[%s2999_s20 + $0xd8] sm:$0xff] }
 0x20a   : > { %v1608_v8 = vsub.f32 %v4648_v50, %v3998_v19  ;;  %v2835_v50 = vld [vmem:[%s2999_s20 + $0xe0] sm:$0xff]  ;;  %v4076_v59 = vsel %vm3333_vm5, %v4023_v3, -1e+30 }
 0x20b   : > { %v4040_v28 = vpop.xlane.xlu0 %1560  ;;  %v4042_v45 = vpop.xlane.xlu1 %1592  ;;  %4649 = vst [vmem:[#allocation42_spill] sm:$0xff] %v4054_v43  ;;  %v1650_v55 = vmul.f32 1.442695, %v1607_v60 }
 0x20c   : > { %4644 = vst [vmem:[#allocation62_spill] sm:$0xff] %v4040_v28  ;;  %v4044_v41 = vpop.xlane.xlu2 %1460  ;;  %v1652_v29 = vmul.f32 1.442695, %v1608_v8  ;;  %v4657_v8 = vld [vmem:[#allocation47_spill] sm:$0xff] }
 0x20d   : > { %4645 = vst [vmem:[#allocation63_spill] sm:$0xff] %v4042_v45  ;;  %v1609_v1 = vsub.f32 %v4657_v8, %v4028_v12 }
 0x20e   : > { %4646 = vst [vmem:[#allocation64_spill] sm:$0xff] %v4044_v41  ;;  %v1141_v41 = vsub.f32 %v4054_v43, %v2835_v50  ;;  %2707 = vpow2.f32 %v1652_v29 }
 0x20f   : > { %2709 = vpow2.f32 %v1650_v55  ;;  %v1654_v29 = vmul.f32 1.442695, %v1609_v1  ;;  %v4661_v1 = vld [vmem:[#allocation52_spill] sm:$0xff] }
 0x210   : > { %1445 = vadd.xlane.f32.xlu0 %v1444_v10  ;;  %1712 = vadd.xlane.f32.xlu1 %v2706_v13  ;;  %v1363_v10 = vsel %vm4056_vm13, %v1299_v0, %v2465_v53  ;;  %v4083_v0 = vsel %vm3333_vm5, %v3987_v34, -1e+30  ;;  %v1626_v3 = vsub.f32 %v4661_v1, %v4042_v45  ;;  %v4668_v1 = vld [vmem:[#allocation39_spill] sm:$0xff] }
 0x211   : > { %1442 = vadd.xlane.f32.xlu2 %v1441_v57  ;;  %v1140_v57 = vsub.f32 %v4049_v9, %v2834_v32  ;;  %4656 = vst [vmem:[#allocation66_spill] sm:$0xff] %v4083_v0  ;;  %2711 = vpow2.f32 %v1654_v29  ;;  %v2619_v45 = vceil.f32 %v4668_v1  ;;  %v2620_v25 = vfloor.f32 %v4668_v1 }
 0x212   : > { %vm2618_vm1 = vcmp.lt.s32.totalorder %v4668_v1, 0  ;;  %vm1040_vm13 = vcmp.gt.f32.partialorder %v4668_v1, 0.0 }
 0x213   : > { %v4062_v63 = vpop.xlane.xlu0 %1463  ;;  %v1413_v21 = vpop.xlane.xlu1 %1412  ;;  %v1172_v53 = vsel %vm1112_vm6, %v1140_v57, 0.0 }
 0x214   : > { %4653 = vst [vmem:[#allocation40_spill] sm:$0xff] %v4062_v63  ;;  %v1479_v26 = vmul.f32 %v4654_v7, %v1413_v21  ;;  %v4065_v13 = vpop.xlane.xlu2 %1594  ;;  %v1447_v21 = vsel %vm342_vm0, %v1363_v10, 0.0  ;;  %v1204_v50 = vand.u32 2147483647, %v1172_v53  ;;  %v1268_v57 = vmul.f32 0.5, %v1172_v53  ;;  %v2708_v63 = vpop.eup %2707 }
 0x215   : > { %4655 = vst [vmem:[#allocation19_spill] sm:$0xff] %v4065_v13  ;;  %v2710_v8 = vpop.eup %2709 }
 0x216   : > { %v2122_v39 = vadd.f32 %v2121_v40, %v1479_v26  ;;  %v1173_v40 = vsel %vm1112_vm6, %v1141_v41, 0.0  ;;  %v4101_v41 = vsel %vm3333_vm5, %v4049_v9, -1e+30  ;;  %v2466_v12 = vadd.f32 -0.5, %v1204_v50 }
 0x217   : > { %v1205_v10 = vand.u32 2147483647, %v1173_v40  ;;  %v1269_v32 = vmul.f32 0.5, %v1173_v40  ;;  %4660 = vst [vmem:[#allocation68_spill] sm:$0xff] %v4101_v41  ;;  %vm4113_vm15 = vcmp.lt.f32.partialorder %v1204_v50, 1.0  ;;  %v2712_v19 = vpop.eup %2711 }
 0x218   : > { %1584 = vmax.xlane.f32.xlu0 %v4076_v59  ;;  %1448 = vadd.xlane.f32.xlu1 %v1447_v21  ;;  %v749_v21 = vpop.f32.mrf.mxu2 }
 0x219   : > { %1582 = vmax.xlane.f32.xlu2 %v4083_v0  ;;  %v1301_v55 = vmul.f32 %v1269_v32, %v1173_v40  ;;  %v4105_v13 = vadd.f32 %v3796_v36, %v749_v21  ;;  %vm4109_vm14 = vcmp.lt.f32.partialorder %v1205_v10, 1.0  ;;  %v1688_v21 = vmul.f32 1.442695, %v1626_v3 }
 0x21b   : > { %v4092_v60 = vpop.xlane.xlu0 %2010  ;;  %v4094_v7 = vpop.xlane.xlu1 %1562 }
 0x21c   : > { %4658 = vst [vmem:[#allocation47_spill] sm:$0xff] %v4092_v60  ;;  %v4096_v26 = vpop.xlane.xlu2 %2008  ;;  %v2467_v60 = vadd.f32 -0.5, %v1205_v10  ;;  %v4667_v10 = vld [vmem:[#allocation21_spill] sm:$0xff] }
 0x21d   : > { %4659 = vst [vmem:[#allocation67_spill] sm:$0xff] %v4096_v26  ;;  %v1300_v26 = vmul.f32 %v1268_v57, %v1172_v53  ;;  %v2836_v57 = vld [vmem:[%s2999_s20 + $0xe8] sm:$0xff] }
 0x21e   : > { %v1365_v36 = vsel %vm4109_vm14, %v1301_v55, %v2467_v60  ;;  %v1142_v29 = vsub.f32 %v4105_v13, %v2836_v57  ;;  %v4670_v57 = vld [vmem:[#allocation23_spill] sm:$0xff] }
 0x21f   : > { %v1364_v50 = vsel %vm4113_vm15, %v1300_v26, %v2466_v12  ;;  %v1453_v60 = vsel %vm342_vm0, %v1365_v36, 0.0 }
 0x220   : > { %1716 = vadd.xlane.f32.xlu0 %v2708_v63  ;;  %1586 = vmax.xlane.f32.xlu1 %v4101_v41  ;;  %v1450_v3 = vsel %vm342_vm0, %v1364_v50, 0.0  ;;  %v1174_v12 = vsel %vm1112_vm6, %v1142_v29, 0.0  ;;  %v4142_v29 = vsel %vm3333_vm5, %v4105_v13, -1e+30 }
 0x221   : > { %1714 = vadd.xlane.f32.xlu2 %v2710_v8 }
 0x223   : > { %v1693_v40 = vpop.xlane.xlu0 %1692  ;;  %v4117_v32 = vpop.xlane.xlu1 %2012 }
 0x224   : > { %4666 = vst [vmem:[#allocation52_spill] sm:$0xff] %v4117_v32  ;;  %2713 = vlog2.f32 %v1693_v40  ;;  %v1416_v53 = vpop.xlane.xlu2 %1415  ;;  %v4669_v32 = vld [vmem:[#allocation38_spill] sm:$0xff] }
 0x225   : > { %v1480_v8 = vmul.f32 %v4667_v10, %v1416_v53  ;;  %v2624_v40 = vceil.f32 %v4669_v32  ;;  %v2625_v41 = vfloor.f32 %v4669_v32  ;;  %vm2623_vm2 = vcmp.lt.s32.totalorder %v4669_v32, 0 }
 0x226   : > { %2715 = vpow2.f32 %v1688_v21  ;;  %v2621_v53 = vsel %vm2618_vm1, %v2619_v45, %v2620_v25  ;;  %v1611_v25 = vsub.f32 %v3740_v15, %v4094_v7  ;;  %v4150_v45 = vsel %vm3333_vm5, %v4054_v43, -1e+30  ;;  %v4678_v43 = vld [vmem:[#allocation5_spill] sm:$0xff] }
 0x227   : > { %v2123_v9 = vadd.f32 %v2122_v39, %v1480_v8  ;;  %v2626_v39 = vsel %vm2623_vm2, %v2624_v40, %v2625_v41  ;;  %v1270_v8 = vmul.f32 0.5, %v1174_v12  ;;  %v2622_v22 = vcvt.f32.s32 %v2621_v53 }
 0x228   : > { %1454 = vadd.xlane.f32.xlu0 %v1453_v60  ;;  %1718 = vadd.xlane.f32.xlu1 %v2712_v19  ;;  %v1206_v19 = vand.u32 2147483647, %v1174_v12  ;;  %v2627_v21 = vcvt.f32.s32 %v2626_v39  ;;  %vm921_vm3 = vcmp.ge.f32.partialorder %v4678_v43, 0.0  ;;  %vm1041_vm14 = vcmp.gt.f32.partialorder %v4669_v32, 0.0 }
 0x229   : > { %1451 = vadd.xlane.f32.xlu2 %v1450_v3  ;;  %v1302_v41 = vmul.f32 %v1270_v8, %v1174_v12 }
 0x22a   : > { %v2714_v26 = vpop.eup %2713  ;;  %v2468_v40 = vadd.f32 -0.5, %v1206_v19  ;;  %vm4156_vm6 = vcmp.lt.f32.partialorder %v1206_v19, 1.0  ;;  %v1909_v39 = vadd.s32 4, %v2627_v21 }
 0x22b   : > { %v1419_v55 = vpop.xlane.xlu0 %1418  ;;  %v1695_v63 = vpop.xlane.xlu1 %1694  ;;  %v1757_v50 = vmul.f32 0.6931472, %v2714_v26 }
 0x22c   : > { %v1481_v36 = vmul.f32 %v4670_v57, %v1419_v55  ;;  %2717 = vlog2.f32 %v1695_v63  ;;  %v4137_v10 = vpop.xlane.xlu2 %1564  ;;  %v2716_v0 = vpop.eup %2715  ;;  %v4674_v55 = vld [vmem:[#allocation51_spill] sm:$0xff]  ;;  %v1908_v63 = vadd.s32 4, %v2622_v22  ;;  %v4675_v57 = vld [vmem:[#allocation2_spill] sm:$0xff]  ;;  %v1366_v19 = vsel %vm4156_vm6, %v1302_v41, %v2468_v40 }
 0x22d   : > { %4671 = vst [vmem:[#allocation21_spill] sm:$0xff] %v4137_v10  ;;  %v1612_v3 = vsub.f32 %v3790_v5, %v4137_v10  ;;  %v1610_v16 = vsub.f32 %v4674_v55, %v4040_v28  ;;  %vm920_vm5 = vcmp.ge.f32.partialorder %v4675_v57, 0.0  ;;  %v4676_v5 = vld [vmem:[#allocation24_spill] sm:$0xff]  ;;  %vm1941_vm7 = vcmp.eq.s32.totalorder %v3003_v33, %v1909_v39 }
 0x22e   : > { %v2124_v60 = vadd.f32 %v2123_v9, %v1481_v36  ;;  %v1820_v9 = vadd.f32 %v1757_v50, %v3694_v48  ;;  %v1658_v48 = vmul.f32 1.442695, %v1611_v25  ;;  %v4677_v50 = vld [vmem:[#allocation53_spill] sm:$0xff]  ;;  %vm1940_vm4 = vcmp.eq.s32.totalorder %v3003_v33, %v1908_v63 }
 0x22f   : > { %v1656_v55 = vmul.f32 1.442695, %v1610_v16  ;;  %v1972_v25 = vsel %vm1940_vm4, %v3977_v24, 0.0  ;;  %v1456_v26 = vsel %vm342_vm0, %v1366_v19, 0.0  ;;  %v4679_v41 = vmov 0.0  }
 0x230   : > { %1590 = vmax.xlane.f32.xlu0 %v4142_v29  ;;  %1752 = vadd.xlane.f32.xlu1 %v2716_v0  ;;  %v2044_v10 = vsub.f32 %v1820_v9, %v4677_v50  ;;  %2719 = vpow2.f32 %v1658_v48  ;;  %v2375_v43 = vsel %vm920_vm5, 1.0, %v4679_v41 }
 0x231   : > { %1588 = vmax.xlane.f32.xlu2 %v4150_v45 }
 0x232   : > { %v2718_v15 = vpop.eup %2717  ;;  %v2076_v40 = vmul.f32 %v2375_v43, %v2044_v10 }
 0x233   : > { %v1759_v53 = vmul.f32 0.6931472, %v2718_v15  ;;  %v4162_v0 = vpop.xlane.xlu0 %1566  ;;  %v1422_v12 = vpop.xlane.xlu1 %1421  ;;  %v1660_v15 = vmul.f32 1.442695, %v1612_v3 }
 0x234   : > { %v1482_v36 = vmul.f32 %v4676_v5, %v1422_v12  ;;  %v4166_v8 = vpop.xlane.xlu2 %2014 }
 0x235   : > { %v1821_v22 = vadd.f32 %v1759_v53, %v3731_v52  ;;  %v2376_v52 = vsel %vm921_vm3, 1.0, %v4679_v41  ;;  %2721 = vpow2.f32 %v1660_v15  ;;  %v4681_v15 = vld [vmem:[#allocation3_spill] sm:$0xff] }
 0x236   : > { %v2125_v28 = vadd.f32 %v2124_v60, %v1482_v36  ;;  %v1973_v60 = vsel %vm1941_vm7, %v3987_v34, 0.0  ;;  %2723 = vpow2.f32 %v1656_v55  ;;  %v2720_v34 = vpop.eup %2719  ;;  %vm922_vm0 = vcmp.ge.f32.partialorder %v4681_v15, 0.0 }
 0x237   : > { %v2045_v21 = vsub.f32 %v1821_v22, %v3726_v11  ;;  %v1613_v11 = vsub.f32 %v3817_v2, %v4162_v0  ;;  %v2377_v43 = vsel %vm922_vm0, 1.0, %v4679_v41 }
 0x238   : > { %2028 = vadd.xlane.f32.xlu0 %v1972_v25  ;;  %1457 = vadd.xlane.f32.xlu1 %v1456_v26 }
 0x239   : > { %v2077_v9 = vmul.f32 %v2376_v52, %v2045_v21  ;;  %2030 = vadd.xlane.f32.xlu2 %v1973_v60  ;;  %v1662_v12 = vmul.f32 1.442695, %v1613_v11 }
 0x23b   : > { %v2147_v24 = vadd.f32 %v2077_v9, %v2076_v40  ;;  %v4185_v3 = vpop.xlane.xlu0 %2016  ;;  %v4187_v16 = vpop.xlane.xlu1 %1568 }
 0x23c   : > { %v1614_v63 = vsub.f32 %v3844_v17, %v4187_v16  ;;  %v1697_v53 = vpop.xlane.xlu2 %1696  ;;  %v2722_v39 = vpop.eup %2721  ;;  %v4680_v17 = vld [vmem:[#allocation27_spill] sm:$0xff] }
 0x23d   : > { %2725 = vlog2.f32 %v1697_v53  ;;  %v2724_v48 = vpop.eup %2723 }
 0x23e   : > { %v1664_v10 = vmul.f32 1.442695, %v1614_v63 }
 0x240   : > { %2727 = vpow2.f32 %v1664_v10  ;;  %1722 = vadd.xlane.f32.xlu0 %v2720_v34  ;;  %1724 = vadd.xlane.f32.xlu1 %v2722_v39 }
 0x241   : > { %1720 = vadd.xlane.f32.xlu2 %v2724_v48  ;;  %2729 = vpow2.f32 %v1662_v12  ;;  %v4682_v12 = vld [vmem:[#allocation29_spill] sm:$0xff] }
 0x243   : > { %v2726_v2 = vpop.eup %2725  ;;  %v1699_v57 = vpop.xlane.xlu0 %1698 }
 0x244   : > { %v1701_v5 = vpop.xlane.xlu1 %1700  ;;  %v1761_v36 = vmul.f32 0.6931472, %v2726_v2  ;;  %2731 = vlog2.f32 %v1699_v57  ;;  %v1425_v19 = vpop.xlane.xlu2 %1424 }
 0x245   : > { %2733 = vlog2.f32 %v1701_v5  ;;  %v1483_v50 = vmul.f32 %v4680_v17, %v1425_v19  ;;  %v4684_v5 = vld [vmem:[#allocation4_spill] sm:$0xff] }
 0x246   : > { %v2728_v22 = vpop.eup %2727  ;;  %v1822_v55 = vadd.f32 %v1761_v36, %v3756_v18  ;;  %vm924_vm9 = vcmp.ge.f32.partialorder %v4684_v5, 0.0 }
 0x247   : > { %v2126_v21 = vadd.f32 %v2125_v28, %v1483_v50  ;;  %v2730_v25 = vpop.eup %2729  ;;  %v4683_v28 = vld [vmem:[#allocation6_spill] sm:$0xff]  ;;  %v2379_v50 = vsel %vm924_vm9, 1.0, %v4679_v41 }
 0x248   : > { %v2046_v26 = vsub.f32 %v1822_v55, %v3759_v4  ;;  %1728 = vadd.xlane.f32.xlu0 %v2728_v22  ;;  %vm923_vm8 = vcmp.ge.f32.partialorder %v4683_v28, 0.0 }
 0x249   : > { %1726 = vadd.xlane.f32.xlu2 %v2730_v25  ;;  %v2378_v36 = vsel %vm923_vm8, 1.0, %v4679_v41 }
 0x24a   : > { %v2732_v52 = vpop.eup %2731  ;;  %v2078_v60 = vmul.f32 %v2377_v43, %v2046_v26 }
 0x24b   : > { %v2734_v40 = vpop.eup %2733  ;;  %v1763_v9 = vmul.f32 0.6931472, %v2732_v52  ;;  %v1428_v11 = vpop.xlane.xlu0 %1427 }
 0x24c   : > { %v4196_v63 = vpop.xlane.xlu1 %2020  ;;  %v2148_v53 = vadd.f32 %v2147_v24, %v2078_v60  ;;  %v1765_v34 = vmul.f32 0.6931472, %v2734_v40  ;;  %v1484_v10 = vmul.f32 %v4682_v12, %v1428_v11  ;;  %v4199_v18 = vpop.xlane.xlu2 %1570 }
 0x24d   : > { %v1823_v4 = vadd.f32 %v1763_v9, %v3779_v38  ;;  %v1615_v39 = vsub.f32 %v3891_v62, %v4199_v18 }
 0x24e   : > { %v1824_v48 = vadd.f32 %v1765_v34, %v3809_v27  ;;  %v2127_v2 = vadd.f32 %v2126_v21, %v1484_v10 }
 0x24f   : > { %v2047_v57 = vsub.f32 %v1823_v4, %v3777_v20  ;;  %v1666_v24 = vmul.f32 1.442695, %v1615_v39  ;;  %v4685_v20 = vld [vmem:[#allocation30_spill] sm:$0xff]  ;;  %v4686_v4 = vld [vmem:[#allocation33_spill] sm:$0xff] }
 0x250   : > { %v2048_v19 = vsub.f32 %v1824_v48, %v3806_v54 }
 0x251   : > { %v2079_v17 = vmul.f32 %v2378_v36, %v2047_v57  ;;  %2735 = vpow2.f32 %v1666_v24 }
 0x252   : > { %v2080_v22 = vmul.f32 %v2379_v50, %v2048_v19 }
 0x253   : > { %v2149_v38 = vadd.f32 %v2148_v53, %v2079_v17  ;;  %v4211_v15 = vpop.xlane.xlu0 %1572 }
 0x254   : > { %v1431_v62 = vpop.xlane.xlu1 %1430  ;;  %v1616_v27 = vsub.f32 %v3913_v56, %v4211_v15  ;;  %v4216_v21 = vpop.xlane.xlu2 %2018 }
 0x255   : > { %v1485_v55 = vmul.f32 %v4685_v20, %v1431_v62  ;;  %v2150_v25 = vadd.f32 %v2149_v38, %v2080_v22  ;;  %v4688_v20 = vld [vmem:[#allocation35_spill] sm:$0xff] }
 0x256   : > { %v1668_v26 = vmul.f32 1.442695, %v1616_v27 }
 0x257   : > { %v2128_v43 = vadd.f32 %v2127_v2, %v1485_v55  ;;  %v2736_v54 = vpop.eup %2735  ;;  %v4687_v2 = vld [vmem:[#allocation7_spill] sm:$0xff] }
 0x258   : > { %2737 = vpow2.f32 %v1668_v26  ;;  %1730 = vadd.xlane.f32.xlu1 %v2736_v54  ;;  %vm925_vm10 = vcmp.ge.f32.partialorder %v4687_v2, 0.0 }
 0x259   : > { %v2380_v24 = vsel %vm925_vm10, 1.0, %v4679_v41 }
 0x25b   : > { %v4218_v52 = vpop.xlane.xlu0 %2022 }
 0x25c   : > { %v4220_v60 = vpop.xlane.xlu1 %1574  ;;  %v1703_v9 = vpop.xlane.xlu2 %1702 }
 0x25d   : > { %v1617_v40 = vsub.f32 %v3940_v46, %v4220_v60  ;;  %2739 = vlog2.f32 %v1703_v9 }
 0x25e   : > { %v2738_v56 = vpop.eup %2737 }
 0x25f   : > { %v1670_v11 = vmul.f32 1.442695, %v1617_v40  ;;  %1732 = vadd.xlane.f32.xlu2 %v2738_v56  ;;  %v4690_v56 = vld [vmem:[#allocation9_spill] sm:$0xff] }
 0x260   : > { %vm927_vm12 = vcmp.ge.f32.partialorder %v4690_v56, 0.0 }
 0x261   : > { %2741 = vpow2.f32 %v1670_v11 }
 0x263   : > { %v2740_v53 = vpop.eup %2739  ;;  %v1705_v34 = vpop.xlane.xlu0 %1704 }
 0x264   : > { %v1707_v12 = vpop.xlane.xlu1 %1706  ;;  %v1767_v10 = vmul.f32 0.6931472, %v2740_v53  ;;  %2743 = vlog2.f32 %v1705_v34  ;;  %v1434_v28 = vpop.xlane.xlu2 %1433 }
 0x265   : > { %2745 = vlog2.f32 %v1707_v12  ;;  %v1486_v39 = vmul.f32 %v4686_v4, %v1434_v28  ;;  %v2382_v12 = vsel %vm927_vm12, 1.0, %v4679_v41 }
 0x266   : > { %v1825_v46 = vadd.f32 %v1767_v10, %v3832_v37  ;;  %v4689_v37 = vld [vmem:[#allocation8_spill] sm:$0xff] }
 0x267   : > { %v2742_v48 = vpop.eup %2741  ;;  %v2129_v57 = vadd.f32 %v2128_v43, %v1486_v39  ;;  %vm926_vm11 = vcmp.ge.f32.partialorder %v4689_v37, 0.0 }
 0x268   : > { %1734 = vadd.xlane.f32.xlu0 %v2742_v48  ;;  %v2049_v5 = vsub.f32 %v1825_v46, %v3835_v35  ;;  %v2381_v11 = vsel %vm926_vm11, 1.0, %v4679_v41 }
 0x26a   : > { %v2744_v36 = vpop.eup %2743  ;;  %v2081_v19 = vmul.f32 %v2380_v24, %v2049_v5 }
 0x26b   : > { %v2746_v17 = vpop.eup %2745  ;;  %v1769_v50 = vmul.f32 0.6931472, %v2744_v36  ;;  %v1437_v38 = vpop.xlane.xlu0 %1436 }
 0x26c   : > { %v4229_v22 = vpop.xlane.xlu1 %2026  ;;  %v2151_v62 = vadd.f32 %v2150_v25, %v2081_v19  ;;  %v1771_v27 = vmul.f32 0.6931472, %v2746_v17  ;;  %v1487_v55 = vmul.f32 %v4688_v20, %v1437_v38  ;;  %v4232_v26 = vpop.xlane.xlu2 %1576 }
 0x26d   : > { %v1826_v43 = vadd.f32 %v1769_v50, %v3859_v30  ;;  %v1618_v35 = vsub.f32 %v3982_v49, %v4232_v26 }
 0x26e   : > { %v1827_v54 = vadd.f32 %v1771_v27, %v3879_v14  ;;  %v2130_v40 = vadd.f32 %v2129_v57, %v1487_v55  ;;  %v4258_v55 = vsel %vm1040_vm13, 1.0, %v4679_v41 }
 0x26f   : > { %v2050_v9 = vsub.f32 %v1826_v43, %v3857_v44  ;;  %v1672_v25 = vmul.f32 1.442695, %v1618_v35  ;;  %v4691_v44 = vld [vmem:[#allocation36_spill] sm:$0xff] }
 0x270   : > { %v2051_v53 = vsub.f32 %v1827_v54, %v3876_v42  ;;  %v4692_v54 = vld [vmem:[#allocation10_spill] sm:$0xff] }
 0x271   : > { %v2082_v34 = vmul.f32 %v2381_v11, %v2050_v9  ;;  %2747 = vpow2.f32 %v1672_v25  ;;  %vm928_vm15 = vcmp.ge.f32.partialorder %v4692_v54, 0.0  ;;  %v4265_v9 = vsel %vm1041_vm14, 1.0, %v4679_v41  ;;  %v4693_v11 = vld [vmem:[#allocation11_spill] sm:$0xff] }
 0x272   : > { %v2083_v10 = vmul.f32 %v2382_v12, %v2051_v53  ;;  %vm929_vm1 = vcmp.ge.f32.partialorder %v4693_v11, 0.0  ;;  %v2383_v12 = vsel %vm928_vm15, 1.0, %v4679_v41 }
 0x273   : > { %v2152_v30 = vadd.f32 %v2151_v62, %v2082_v34  ;;  %v4244_v28 = vpop.xlane.xlu0 %1578  ;;  %v4694_v34 = vld [vmem:[#allocation43_spill] sm:$0xff] }
 0x274   : > { %v1440_v49 = vpop.xlane.xlu1 %1439  ;;  %v1619_v14 = vsub.f32 %v4010_v51, %v4244_v28  ;;  %v4249_v39 = vpop.xlane.xlu2 %2024  ;;  %vm1042_vm2 = vcmp.gt.f32.partialorder %v4694_v34, 0.0  ;;  %vm2628_vm5 = vcmp.lt.s32.totalorder %v4694_v34, 0 }
 0x275   : > { %v1488_v4 = vmul.f32 %v4691_v44, %v1440_v49  ;;  %v2153_v48 = vadd.f32 %v2152_v30, %v2083_v10  ;;  %v2384_v49 = vsel %vm929_vm1, 1.0, %v4679_v41 }
 0x276   : > { %v1674_v2 = vmul.f32 1.442695, %v1619_v14 }
 0x277   : > { %v2131_v46 = vadd.f32 %v2130_v40, %v1488_v4  ;;  %v2748_v42 = vpop.eup %2747  ;;  %v4277_v4 = vsel %vm1042_vm2, 1.0, %v4679_v41 }
 0x278   : > { %2749 = vpow2.f32 %v1674_v2  ;;  %1736 = vadd.xlane.f32.xlu1 %v2748_v42 }
 0x27b   : > { %v1711_v57 = vpop.xlane.xlu0 %1710 }
 0x27c   : > { %v4251_v5 = vpop.xlane.xlu1 %1580  ;;  %2751 = vlog2.f32 %v1711_v57  ;;  %v1709_v36 = vpop.xlane.xlu2 %1708 }
 0x27d   : > { %v1620_v24 = vsub.f32 %v4035_v58, %v4251_v5  ;;  %2753 = vlog2.f32 %v1709_v36 }
 0x27e   : > { %v2750_v51 = vpop.eup %2749 }
 0x27f   : > { %v1676_v19 = vmul.f32 1.442695, %v1620_v24  ;;  %1738 = vadd.xlane.f32.xlu2 %v2750_v51  ;;  %v4695_v24 = vld [vmem:[#allocation12_spill] sm:$0xff]  ;;  %v4696_v51 = vld [vmem:[#allocation66_spill] sm:$0xff] }
 0x280   : > { %vm930_vm6 = vcmp.ge.f32.partialorder %v4695_v24, 0.0 }
 0x281   : > { %2755 = vpow2.f32 %v1676_v19 }
 0x282   : > { %v2752_v17 = vpop.eup %2751 }
 0x283   : > { %v2754_v50 = vpop.eup %2753  ;;  %v1775_v38 = vmul.f32 0.6931472, %v2752_v17  ;;  %v1446_v62 = vpop.xlane.xlu0 %1445 }
 0x284   : > { %v1713_v27 = vpop.xlane.xlu1 %1712  ;;  %v1773_v20 = vmul.f32 0.6931472, %v2754_v50  ;;  %v1443_v58 = vpop.xlane.xlu2 %1442  ;;  %v1490_v56 = vmul.f32 %v4265_v9, %v1446_v62  ;;  %v4697_v62 = vld [vmem:[#allocation55_spill] sm:$0xff] }
 0x285   : > { %2757 = vlog2.f32 %v1713_v27  ;;  %v1829_v37 = vadd.f32 %v1775_v38, %v3930_v6  ;;  %v1489_v43 = vmul.f32 %v4258_v55, %v1443_v58 }
 0x286   : > { %v1828_v40 = vadd.f32 %v1773_v20, %v3902_v31  ;;  %v2385_v20 = vsel %vm930_vm6, 1.0, %v4679_v41 }
 0x287   : > { %v2756_v35 = vpop.eup %2755  ;;  %v2132_v25 = vadd.f32 %v2131_v46, %v1489_v43  ;;  %v2053_v53 = vsub.f32 %v1829_v37, %v3928_v47 }
 0x288   : > { %1740 = vadd.xlane.f32.xlu1 %v2756_v35  ;;  %v2052_v6 = vsub.f32 %v1828_v40, %v3905_v23 }
 0x289   : > { %v2133_v30 = vadd.f32 %v2132_v25, %v1490_v56  ;;  %v2085_v46 = vmul.f32 %v2384_v49, %v2053_v53  ;;  %v2629_v56 = vceil.f32 %v4694_v34  ;;  %v2630_v25 = vfloor.f32 %v4694_v34  ;;  %v4700_v49 = vld [vmem:[#allocation41_spill] sm:$0xff] }
 0x28a   : > { %v2084_v31 = vmul.f32 %v2383_v12, %v2052_v6  ;;  %v4699_v6 = vld [vmem:[#allocation44_spill] sm:$0xff]  ;;  %vm1044_vm4 = vcmp.gt.f32.partialorder %v4700_v49, 0.0  ;;  %vm2638_vm1 = vcmp.lt.s32.totalorder %v4700_v49, 0 }
 0x28b   : > { %v2758_v10 = vpop.eup %2757  ;;  %v4274_v44 = vpop.xlane.xlu0 %1584  ;;  %vm1043_vm3 = vcmp.gt.f32.partialorder %v4699_v6, 0.0  ;;  %vm2633_vm10 = vcmp.lt.s32.totalorder %v4699_v6, 0 }
 0x28c   : > { %v1777_v14 = vmul.f32 0.6931472, %v2758_v10  ;;  %v1449_v2 = vpop.xlane.xlu1 %1448  ;;  %v2154_v47 = vadd.f32 %v2153_v48, %v2084_v31  ;;  %v1622_v23 = vsub.f32 %v4076_v59, %v4274_v44  ;;  %v4282_v57 = vpop.xlane.xlu2 %1582 }
 0x28d   : > { %v1491_v42 = vmul.f32 %v4277_v4, %v1449_v2  ;;  %v1621_v19 = vsub.f32 %v4696_v51, %v4282_v57 }
 0x28e   : > { %v1830_v36 = vadd.f32 %v1777_v14, %v3956_v61  ;;  %v2155_v17 = vadd.f32 %v2154_v47, %v2085_v46  ;;  %v1680_v50 = vmul.f32 1.442695, %v1622_v23  ;;  %v4698_v61 = vld [vmem:[#allocation68_spill] sm:$0xff]  ;;  %v4300_v47 = vsel %vm1043_vm3, 1.0, %v4679_v41 }
 0x28f   : > { %v2134_v38 = vadd.f32 %v2133_v30, %v1491_v42  ;;  %v1678_v48 = vmul.f32 1.442695, %v1621_v19  ;;  %v2631_v30 = vsel %vm2628_vm5, %v2629_v56, %v2630_v25  ;;  %v4701_v42 = vld [vmem:[#allocation49_spill] sm:$0xff] }
 0x290   : > { %v2054_v27 = vsub.f32 %v1830_v36, %v4697_v62  ;;  %2759 = vpow2.f32 %v1680_v50  ;;  %v2644_v24 = vceil.f32 %v4701_v42  ;;  %v4702_v36 = vld [vmem:[#allocation59_spill] sm:$0xff]  ;;  %v2645_v62 = vfloor.f32 %v4701_v42  ;;  %v4707_v56 = vld [vmem:[#allocation57_spill] sm:$0xff] }
 0x291   : > { %2761 = vpow2.f32 %v1678_v48  ;;  %v4704_v48 = vld [vmem:[#allocation56_spill] sm:$0xff]  ;;  %vm2643_vm0 = vcmp.lt.s32.totalorder %v4701_v42, 0  ;;  %vm1045_vm11 = vcmp.gt.f32.partialorder %v4701_v42, 0.0 }
 0x292   : > { %v2086_v59 = vmul.f32 %v2385_v20, %v2054_v27  ;;  %v4703_v27 = vld [vmem:[#allocation13_spill] sm:$0xff] }
 0x293   : > { %v1717_v37 = vpop.xlane.xlu0 %1716  ;;  %vm931_vm7 = vcmp.ge.f32.partialorder %v4703_v27, 0.0 }
 0x294   : > { %v2156_v58 = vadd.f32 %v2155_v17, %v2086_v59  ;;  %v4290_v43 = vpop.xlane.xlu1 %1586  ;;  %2763 = vlog2.f32 %v1717_v37  ;;  %v1715_v54 = vpop.xlane.xlu2 %1714  ;;  %v2632_v17 = vcvt.f32.s32 %v2631_v30  ;;  %v4309_v59 = vsel %vm1044_vm4, 1.0, %v4679_v41 }
 0x295   : > { %v1623_v35 = vsub.f32 %v4698_v61, %v4290_v43  ;;  %2765 = vlog2.f32 %v1715_v54  ;;  %v4706_v54 = vld [vmem:[#allocation58_spill] sm:$0xff] }
 0x296   : > { %v2760_v40 = vpop.eup %2759 }
 0x297   : > { %v1682_v11 = vmul.f32 1.442695, %v1623_v35  ;;  %v2762_v53 = vpop.eup %2761  ;;  %1744 = vadd.xlane.f32.xlu2 %v2760_v40  ;;  %v4705_v35 = vld [vmem:[#allocation14_spill] sm:$0xff] }
 0x298   : > { %1742 = vadd.xlane.f32.xlu0 %v2762_v53  ;;  %vm932_vm8 = vcmp.ge.f32.partialorder %v4705_v35, 0.0  ;;  %v1910_v53 = vadd.s32 4, %v2632_v17 }
 0x299   : > { %2767 = vpow2.f32 %v1682_v11  ;;  %v2386_v11 = vsel %vm931_vm7, 1.0, %v4679_v41 }
 0x29a   : > { %v2764_v12 = vpop.eup %2763  ;;  %vm1942_vm9 = vcmp.eq.s32.totalorder %v3003_v33, %v1910_v53 }
 0x29b   : > { %v2766_v10 = vpop.eup %2765  ;;  %v1781_v31 = vmul.f32 0.6931472, %v2764_v12  ;;  %v1455_v14 = vpop.xlane.xlu0 %1454 }
 0x29c   : > { %v1719_v2 = vpop.xlane.xlu1 %1718  ;;  %v1779_v46 = vmul.f32 0.6931472, %v2766_v10  ;;  %v1452_v23 = vpop.xlane.xlu2 %1451  ;;  %v1493_v37 = vmul.f32 %v4309_v59, %v1455_v14  ;;  %v2646_v10 = vsel %vm2643_vm0, %v2644_v24, %v2645_v62 }
 0x29d   : > { %v1832_v51 = vadd.f32 %v1781_v31, %v4702_v36  ;;  %v1492_v19 = vmul.f32 %v4300_v47, %v1452_v23  ;;  %v2387_v31 = vsel %vm932_vm8, 1.0, %v4679_v41  ;;  %v2647_v24 = vcvt.f32.s32 %v2646_v10  ;;  %v4712_v10 = vld [vmem:[#allocation46_spill] sm:$0xff] }
 0x29e   : > { %v1831_v20 = vadd.f32 %v1779_v46, %v4704_v48  ;;  %v4708_v48 = vld [vmem:[#allocation60_spill] sm:$0xff]  ;;  %vm1047_vm13 = vcmp.gt.f32.partialorder %v4712_v10, 0.0  ;;  %vm2653_vm6 = vcmp.lt.s32.totalorder %v4712_v10, 0 }
 0x29f   : > { %v2768_v50 = vpop.eup %2767  ;;  %v2135_v61 = vadd.f32 %v2134_v38, %v1492_v19  ;;  %v2056_v40 = vsub.f32 %v1832_v51, %v4706_v54  ;;  %v2634_v19 = vceil.f32 %v4699_v6  ;;  %v1913_v35 = vadd.s32 4, %v2647_v24 }
 0x2a0   : > { %1746 = vadd.xlane.f32.xlu1 %v2768_v50  ;;  %v2055_v25 = vsub.f32 %v1831_v20, %v4707_v56  ;;  %v2635_v50 = vfloor.f32 %v4699_v6 }
 0x2a1   : > { %v2136_v12 = vadd.f32 %v2135_v61, %v1493_v37  ;;  %v2088_v14 = vmul.f32 %v2387_v31, %v2056_v40  ;;  %v4711_v37 = vld [vmem:[#allocation54_spill] sm:$0xff]  ;;  %vm1945_vm14 = vcmp.eq.s32.totalorder %v3003_v33, %v1913_v35 }
 0x2a2   : > { %v2087_v30 = vmul.f32 %v2386_v11, %v2055_v25  ;;  %v2636_v54 = vsel %vm2633_vm10, %v2634_v19, %v2635_v50  ;;  %v4343_v25 = vsel %vm1045_vm11, 1.0, %v4679_v41  ;;  %v4713_v19 = vld [vmem:[#allocation64_spill] sm:$0xff]  ;;  %v1977_v50 = vsel %vm1945_vm14, %v4105_v13, 0.0 }
 0x2a3   : > { %v4318_v46 = vpop.xlane.xlu0 %1590 }
 0x2a4   : > { %v4320_v38 = vpop.xlane.xlu1 %1752  ;;  %v2157_v23 = vadd.f32 %v2156_v58, %v2087_v30  ;;  %v1625_v36 = vsub.f32 %v4142_v29, %v4318_v46  ;;  %v4324_v51 = vpop.xlane.xlu2 %1588  ;;  %v1974_v58 = vsel %vm1942_vm9, %v4708_v48, 0.0  ;;  %v4709_v29 = vld [vmem:[#allocation50_spill] sm:$0xff]  ;;  %v2639_v48 = vceil.f32 %v4700_v49 }
 0x2a5   : > { %v1624_v17 = vsub.f32 %v4150_v45, %v4324_v51  ;;  %vm1046_vm12 = vcmp.gt.f32.partialorder %v4709_v29, 0.0  ;;  %v4710_v45 = vld [vmem:[#allocation19_spill] sm:$0xff]  ;;  %v2649_v40 = vceil.f32 %v4709_v29  ;;  %v2650_v53 = vfloor.f32 %v4709_v29 }
 0x2a6   : > { %v4331_v62 = vadd.f32 %v2157_v23, %v2088_v14  ;;  %v1686_v27 = vmul.f32 1.442695, %v1625_v36  ;;  %v1627_v61 = vsub.f32 %v4711_v37, %v4710_v45  ;;  %v4347_v30 = vsel %vm1046_vm12, 1.0, %v4679_v41 }
 0x2a7   : > { %v1684_v20 = vmul.f32 1.442695, %v1624_v17  ;;  %v2637_v23 = vcvt.f32.s32 %v2636_v54  ;;  %vm2648_vm15 = vcmp.lt.s32.totalorder %v4709_v29, 0  ;;  %v1495_v17 = vmul.f32 %v4347_v30, %v4713_v19 }
 0x2a8   : > { %2032 = vadd.xlane.f32.xlu1 %v1974_v58  ;;  %2769 = vpow2.f32 %v1686_v27  ;;  %v2640_v58 = vfloor.f32 %v4700_v49 }
 0x2a9   : > { %2771 = vpow2.f32 %v1684_v20  ;;  %v4361_v20 = vsel %vm1047_vm13, 1.0, %v4679_v41  ;;  %v1911_v13 = vadd.s32 4, %v2637_v23 }
 0x2aa   : > { %2773 = vlog2.f32 %v1719_v2  ;;  %v1690_v2 = vmul.f32 1.442695, %v1627_v61  ;;  %v4714_v61 = vld [vmem:[#allocation40_spill] sm:$0xff]  ;;  %v2641_v42 = vsel %vm2638_vm1, %v2639_v48, %v2640_v58 }
 0x2ab   : > { %v4340_v56 = vpop.xlane.xlu0 %2028  ;;  %v1496_v35 = vmul.f32 %v4361_v20, %v4714_v61  ;;  %v2655_v61 = vfloor.f32 %v4712_v10  ;;  %vm1943_vm2 = vcmp.eq.s32.totalorder %v3003_v33, %v1911_v13 }
 0x2ac   : > { %v1458_v11 = vpop.xlane.xlu1 %1457  ;;  %v4351_v14 = vpop.xlane.xlu2 %2030  ;;  %2775 = vpow2.f32 %v1690_v2  ;;  %v2642_v2 = vcvt.f32.s32 %v2641_v42 }
 0x2ad   : > { %v1494_v31 = vmul.f32 %v4343_v25, %v1458_v11  ;;  %v2651_v11 = vsel %vm2648_vm15, %v2649_v40, %v2650_v53  ;;  %v4715_v40 = vld [vmem:[#allocation65_spill] sm:$0xff] }
 0x2ae   : > { %v2770_v36 = vpop.eup %2769  ;;  %v2652_v29 = vcvt.f32.s32 %v2651_v11  ;;  %v1975_v53 = vsel %vm1943_vm2, %v4715_v40, 0.0  ;;  %vm944_vm2 = vcmp.ge.f32.partialorder %v4668_v1, 0.0 }
 0x2af   : > { %v2137_v24 = vadd.f32 %v2136_v12, %v1494_v31  ;;  %v2772_v27 = vpop.eup %2771  ;;  %1750 = vadd.xlane.f32.xlu2 %v2770_v36 }
 0x2b0   : > { %2038 = vadd.xlane.f32.xlu1 %v1977_v50  ;;  %v2774_v37 = vpop.eup %2773  ;;  %1748 = vadd.xlane.f32.xlu0 %v2772_v27  ;;  %v2654_v50 = vceil.f32 %v4712_v10  ;;  %v1914_v27 = vadd.s32 4, %v2652_v29 }
 0x2b1   : > { %v2138_v54 = vadd.f32 %v2137_v24, %v1495_v17  ;;  %v1783_v31 = vmul.f32 0.6931472, %v2774_v37  ;;  %v4716_v17 = vld [vmem:[#allocation17_spill] sm:$0xff]  ;;  %v1912_v37 = vadd.s32 4, %v2642_v2  ;;  %v4720_v2 = vld [vmem:[#allocation16_spill] sm:$0xff] }
 0x2b2   : > { %v2776_v23 = vpop.eup %2775  ;;  %v2656_v48 = vsel %vm2653_vm6, %v2654_v50, %v2655_v61  ;;  %vm1946_vm3 = vcmp.eq.s32.totalorder %v3003_v33, %v1914_v27  ;;  %v4719_v50 = vld [vmem:[#allocation45_spill] sm:$0xff]  ;;  %vm934_vm7 = vcmp.ge.f32.partialorder %v4720_v2, 0.0  ;;  %v4722_v27 = vld [vmem:[#allocation42_spill] sm:$0xff]  ;;  %v4727_v2 = vld [vmem:[#allocation20_spill] sm:$0xff]  ;;  %vm945_vm6 = vcmp.ge.f32.partialorder %v4669_v32, 0.0 }
 0x2b3   : > { %v4366_v12 = vadd.f32 %v2138_v54, %v1496_v35  ;;  %v1723_v19 = vpop.xlane.xlu0 %1722  ;;  %v1833_v24 = vadd.f32 %v1783_v31, %v4716_v17  ;;  %v4717_v54 = vld [vmem:[#allocation15_spill] sm:$0xff]  ;;  %v2657_v40 = vcvt.f32.s32 %v2656_v48  ;;  %v1978_v61 = vsel %vm1946_vm3, %v4719_v50, 0.0  ;;  %v4721_v17 = vld [vmem:[#allocation62_spill] sm:$0xff] }
 0x2b4   : > { %v1725_v45 = vpop.xlane.xlu1 %1724  ;;  %2777 = vlog2.f32 %v1723_v19  ;;  %v1721_v36 = vpop.xlane.xlu2 %1720  ;;  %vm933_vm5 = vcmp.ge.f32.partialorder %v4717_v54, 0.0  ;;  %vm1944_vm4 = vcmp.eq.s32.totalorder %v3003_v33, %v1912_v37  ;;  %v4724_v54 = vld [vmem:[#allocation18_spill] sm:$0xff]  ;;  %v2389_v37 = vsel %vm934_vm7, 1.0, %v4679_v41 }
 0x2b5   : > { %2779 = vlog2.f32 %v1725_v45  ;;  %v4718_v45 = vld [vmem:[#allocation61_spill] sm:$0xff]  ;;  %v2388_v29 = vsel %vm933_vm5, 1.0, %v4679_v41  ;;  %vm935_vm0 = vcmp.ge.f32.partialorder %v4724_v54, 0.0  ;;  %vm936_vm8 = vcmp.ge.f32.partialorder %v4727_v2, 0.0 }
 0x2b6   : > { %2781 = vlog2.f32 %v1721_v36  ;;  %v2057_v11 = vsub.f32 %v1833_v24, %v4718_v45  ;;  %v4725_v45 = vld [vmem:[#allocation47_spill] sm:$0xff]  ;;  %vm946_vm5 = vcmp.ge.f32.partialorder %v4694_v34, 0.0  ;;  %v2400_v32 = vsel %vm945_vm6, 1.0, %v4679_v41 }
 0x2b7   : > { %2034 = vadd.xlane.f32.xlu2 %v1975_v53  ;;  %vm947_vm3 = vcmp.ge.f32.partialorder %v4699_v6, 0.0  ;;  %v2401_v34 = vsel %vm946_vm5, 1.0, %v4679_v41 }
 0x2b8   : > { %1754 = vadd.xlane.f32.xlu0 %v2776_v23  ;;  %v2089_v23 = vmul.f32 %v2388_v29, %v2057_v11  ;;  %v2390_v29 = vsel %vm935_vm0, 1.0, %v4679_v41 }
 0x2ba   : > { %v2778_v58 = vpop.eup %2777  ;;  %v2159_v11 = vadd.f32 %v4331_v62, %v2089_v23  ;;  %v4730_v62 = vld [vmem:[#allocation48_spill] sm:$0xff] }
 0x2bb   : > { %v2780_v35 = vpop.eup %2779  ;;  %v1787_v13 = vmul.f32 0.6931472, %v2778_v58  ;;  %v1976_v58 = vsel %vm1944_vm4, %v4722_v27, 0.0  ;;  %vm948_vm4 = vcmp.ge.f32.partialorder %v4700_v49, 0.0 }
 0x2bc   : > { %v2782_v42 = vpop.eup %2781  ;;  %v1789_v19 = vmul.f32 0.6931472, %v2780_v35  ;;  %v1727_v36 = vpop.xlane.xlu2 %1726  ;;  %v4723_v35 = vld [vmem:[#allocation21_spill] sm:$0xff] }
 0x2bd   : > { %v1835_v31 = vadd.f32 %v1787_v13, %v4094_v7  ;;  %v1785_v53 = vmul.f32 0.6931472, %v2782_v42  ;;  %2783 = vlog2.f32 %v1727_v36  ;;  %v1915_v7 = vadd.s32 4, %v2657_v40  ;;  %v4726_v42 = vld [vmem:[#allocation67_spill] sm:$0xff] }
 0x2be   : > { %v1836_v48 = vadd.f32 %v1789_v19, %v4723_v35  ;;  %v2391_v35 = vsel %vm936_vm8, 1.0, %v4679_v41  ;;  %vm951_vm8 = vcmp.ge.f32.partialorder %v4712_v10, 0.0 }
 0x2bf   : > { %v1834_v24 = vadd.f32 %v1785_v53, %v4721_v17  ;;  %2040 = vadd.xlane.f32.xlu2 %v1978_v61  ;;  %v2059_v13 = vsub.f32 %v1835_v31, %v4725_v45  ;;  %v4728_v61 = vld [vmem:[#allocation52_spill] sm:$0xff]  ;;  %v1729_v17 = vpop.xlane.xlu0 %1728  ;;  %vm1947_vm9 = vcmp.eq.s32.totalorder %v3003_v33, %v1915_v7 }
 0x2c0   : > { %2036 = vadd.xlane.f32.xlu0 %v1976_v58  ;;  %v2060_v19 = vsub.f32 %v1836_v48, %v4728_v61  ;;  %v4729_v58 = vld [vmem:[#allocation22_spill] sm:$0xff]  ;;  %2785 = vlog2.f32 %v1729_v17  ;;  %v1979_v23 = vsel %vm1947_vm9, %v4730_v62, 0.0  ;;  %vm2184_vm9 = vcmp.eq.s32.totalorder %v3003_v33, 2 }
 0x2c1   : > { %v2058_v36 = vsub.f32 %v1834_v24, %v4726_v42  ;;  %v2091_v27 = vmul.f32 %v2390_v29, %v2059_v13  ;;  %vm937_vm10 = vcmp.ge.f32.partialorder %v4729_v58, 0.0 }
 0x2c2   : > { %v2092_v45 = vmul.f32 %v2391_v35, %v2060_v19  ;;  %v2392_v48 = vsel %vm937_vm10, 1.0, %v4679_v41  ;;  %v4731_v19 = vld [vmem:[#allocation25_spill] sm:$0xff]  ;;  %v4733_v35 = vld [vmem:[#allocation28_spill] sm:$0xff]  ;;  %vm2146_vm10 = vcmp.eq.s32.totalorder %v3003_v33, 1 }
 0x2c3   : > { %v2784_v50 = vpop.eup %2783  ;;  %v2090_v53 = vmul.f32 %v2389_v37, %v2058_v36  ;;  %vm938_vm11 = vcmp.ge.f32.partialorder %v4731_v19, 0.0  ;;  %vm940_vm13 = vcmp.ge.f32.partialorder %v4733_v35, 0.0 }
 0x2c4   : > { %v1791_v40 = vmul.f32 0.6931472, %v2784_v50  ;;  %v2393_v58 = vsel %vm938_vm11, 1.0, %v4679_v41  ;;  %vm2108_vm11 = vcmp.eq.s32.totalorder %v3003_v33, 0 }
 0x2c5   : > { %v2160_v31 = vadd.f32 %v2159_v11, %v2090_v53 }
 0x2c6   : > { %v1837_v24 = vadd.f32 %v1791_v40, %v4162_v0  ;;  %v2786_v50 = vpop.eup %2785 }
 0x2c7   : > { %v2161_v54 = vadd.f32 %v2160_v31, %v2091_v27  ;;  %v1793_v2 = vmul.f32 0.6931472, %v2786_v50 }
 0x2c8   : > { %v2061_v42 = vsub.f32 %v1837_v24, %v4166_v8  ;;  %2042 = vadd.xlane.f32.xlu0 %v1979_v23  ;;  %v4732_v8 = vld [vmem:[#allocation26_spill] sm:$0xff] }
 0x2c9   : > { %v2162_v36 = vadd.f32 %v2161_v54, %v2092_v45  ;;  %v1838_v29 = vadd.f32 %v1793_v2, %v4187_v16  ;;  %vm939_vm12 = vcmp.ge.f32.partialorder %v4732_v8, 0.0  ;;  %v2395_v45 = vsel %vm940_vm13, 1.0, %v4679_v41 }
 0x2ca   : > { %v2093_v7 = vmul.f32 %v2392_v48, %v2061_v42  ;;  %v2394_v24 = vsel %vm939_vm12, 1.0, %v4679_v41 }
 0x2cb   : > { %v1731_v13 = vpop.xlane.xlu1 %1730  ;;  %v2062_v17 = vsub.f32 %v1838_v29, %v4185_v3 }
 0x2cc   : > { %v2163_v37 = vadd.f32 %v2162_v36, %v2093_v7  ;;  %2787 = vlog2.f32 %v1731_v13 }
 0x2cd   : > { %v2094_v54 = vmul.f32 %v2393_v58, %v2062_v17 }
 0x2cf   : > { %v2164_v62 = vadd.f32 %v2163_v37, %v2094_v54 }
 0x2d2   : > { %v2788_v0 = vpop.eup %2787  ;;  %v1733_v11 = vpop.xlane.xlu2 %1732 }
 0x2d3   : > { %v1795_v53 = vmul.f32 0.6931472, %v2788_v0  ;;  %2789 = vlog2.f32 %v1733_v11 }
 0x2d5   : > { %v1839_v61 = vadd.f32 %v1795_v53, %v4199_v18  ;;  %v4735_v53 = vld [vmem:[#allocation32_spill] sm:$0xff] }
 0x2d6   : > { %vm942_vm15 = vcmp.ge.f32.partialorder %v4735_v53, 0.0 }
 0x2d7   : > { %v2063_v40 = vsub.f32 %v1839_v61, %v4216_v21 }
 0x2d9   : > { %v2790_v27 = vpop.eup %2789  ;;  %v2095_v16 = vmul.f32 %v2394_v24, %v2063_v40  ;;  %v4736_v40 = vld [vmem:[#allocation34_spill] sm:$0xff] }
 0x2da   : > { %v1797_v31 = vmul.f32 0.6931472, %v2790_v27  ;;  %vm943_vm1 = vcmp.ge.f32.partialorder %v4736_v40, 0.0 }
 0x2db   : > { %v2165_v3 = vadd.f32 %v2164_v62, %v2095_v16  ;;  %v1735_v48 = vpop.xlane.xlu0 %1734  ;;  %v4737_v16 = vld [vmem:[#allocation37_spill] sm:$0xff] }
 0x2dc   : > { %v1840_v18 = vadd.f32 %v1797_v31, %v4211_v15  ;;  %2791 = vlog2.f32 %v1735_v48 }
 0x2de   : > { %v2064_v23 = vsub.f32 %v1840_v18, %v4196_v63  ;;  %v4734_v63 = vld [vmem:[#allocation31_spill] sm:$0xff]  ;;  %v2208_v18 = vadd.f32 %v4258_v55, %v4737_v16 }
 0x2df   : > { %vm941_vm14 = vcmp.ge.f32.partialorder %v4734_v63, 0.0 }
 0x2e0   : > { %v2096_v42 = vmul.f32 %v2395_v45, %v2064_v23  ;;  %v2396_v19 = vsel %vm941_vm14, 1.0, %v4679_v41  ;;  %v2209_v23 = vadd.f32 %v4265_v9, %v2208_v18 }
 0x2e2   : > { %v2166_v21 = vadd.f32 %v2165_v3, %v2096_v42  ;;  %v2792_v36 = vpop.eup %2791  ;;  %v2210_v42 = vadd.f32 %v4277_v4, %v2209_v23 }
 0x2e3   : > { %v1799_v13 = vmul.f32 0.6931472, %v2792_v36 }
 0x2e4   : > { %v2211_v48 = vadd.f32 %v4300_v47, %v2210_v42 }
 0x2e5   : > { %v1841_v2 = vadd.f32 %v1799_v13, %v4220_v60  ;;  %v2397_v60 = vsel %vm942_vm15, 1.0, %v4679_v41 }
 0x2e7   : > { %v2065_v37 = vsub.f32 %v1841_v2, %v4218_v52  ;;  %v2398_v52 = vsel %vm943_vm1, 1.0, %v4679_v41  ;;  %v2212_v2 = vadd.f32 %v4309_v59, %v2211_v48 }
 0x2e9   : > { %v2097_v8 = vmul.f32 %v2396_v19, %v2065_v37  ;;  %v2213_v63 = vadd.f32 %v4343_v25, %v2212_v2 }
 0x2eb   : > { %v1737_v7 = vpop.xlane.xlu1 %1736  ;;  %v2167_v31 = vadd.f32 %v2166_v21, %v2097_v8  ;;  %v2214_v25 = vadd.f32 %v4347_v30, %v2213_v63 }
 0x2ec   : > { %2793 = vlog2.f32 %v1737_v7 }
 0x2f2   : > { %v2794_v50 = vpop.eup %2793  ;;  %v1739_v0 = vpop.xlane.xlu2 %1738 }
 0x2f3   : > { %v1801_v11 = vmul.f32 0.6931472, %v2794_v50  ;;  %2795 = vlog2.f32 %v1739_v0 }
 0x2f5   : > { %v1842_v15 = vadd.f32 %v1801_v11, %v4232_v26 }
 0x2f7   : > { %v2066_v29 = vsub.f32 %v1842_v15, %v4249_v39 }
 0x2f9   : > { %v2796_v61 = vpop.eup %2795  ;;  %v2098_v27 = vmul.f32 %v2397_v60, %v2066_v29 }
 0x2fa   : > { %v1803_v17 = vmul.f32 0.6931472, %v2796_v61 }
 0x2fb   : > { %v2168_v24 = vadd.f32 %v2167_v31, %v2098_v27  ;;  %v1741_v54 = vpop.xlane.xlu1 %1740 }
 0x2fc   : > { %v1843_v26 = vadd.f32 %v1803_v17, %v4244_v28  ;;  %2797 = vlog2.f32 %v1741_v54  ;;  %v4738_v54 = vld [vmem:[#allocation49_spill] sm:$0xff] }
 0x2fd   : > { %vm949_vm7 = vcmp.ge.f32.partialorder %v4738_v54, 0.0 }
 0x2fe   : > { %v2067_v58 = vsub.f32 %v1843_v26, %v4229_v22  ;;  %v2215_v26 = vadd.f32 %v4361_v20, %v2214_v25  ;;  %v2403_v20 = vsel %vm948_vm4, 1.0, %v4679_v41  ;;  %v2404_v42 = vsel %vm949_vm7, 1.0, %v4679_v41 }
 0x300   : > { %v2099_v35 = vmul.f32 %v2398_v52, %v2067_v58 }
 0x302   : > { %v2169_v39 = vadd.f32 %v2168_v24, %v2099_v35  ;;  %v2798_v28 = vpop.eup %2797 }
 0x303   : > { %v1805_v21 = vmul.f32 0.6931472, %v2798_v28 }
 0x305   : > { %v1844_v50 = vadd.f32 %v1805_v21, %v4251_v5  ;;  %v4740_v21 = vld [vmem:[#allocation50_spill] sm:$0xff] }
 0x306   : > { %vm950_vm0 = vcmp.ge.f32.partialorder %v4740_v21, 0.0 }
 0x307   : > { %v2068_v11 = vsub.f32 %v1844_v50, %v4340_v56 }
 0x30a   : > { %v1745_v45 = vpop.xlane.xlu2 %1744 }
 0x30b   : > { %v1743_v62 = vpop.xlane.xlu0 %1742 }
 0x30c   : > { %2799 = vlog2.f32 %v1743_v62 }
 0x30d   : > { %2801 = vlog2.f32 %v1745_v45 }
 0x312   : > { %v2800_v22 = vpop.eup %2799 }
 0x313   : > { %v1747_v3 = vpop.xlane.xlu1 %1746  ;;  %v1807_v36 = vmul.f32 0.6931472, %v2800_v22  ;;  %v2802_v13 = vpop.eup %2801 }
 0x314   : > { %2803 = vlog2.f32 %v1747_v3  ;;  %v1809_v4 = vmul.f32 0.6931472, %v2802_v13  ;;  %v4739_v3 = vld [vmem:[#allocation63_spill] sm:$0xff] }
 0x315   : > { %v1845_v0 = vadd.f32 %v1807_v36, %v4282_v57  ;;  %v2399_v57 = vsel %vm944_vm2, 1.0, %v4679_v41 }
 0x316   : > { %v1846_v59 = vadd.f32 %v1809_v4, %v4274_v44  ;;  %v2100_v29 = vmul.f32 %v2399_v57, %v2068_v11 }
 0x317   : > { %v2069_v5 = vsub.f32 %v1845_v0, %v4351_v14 }
 0x318   : > { %v2170_v40 = vadd.f32 %v2169_v39, %v2100_v29 }
 0x319   : > { %v2101_v14 = vmul.f32 %v2400_v32, %v2069_v5 }
 0x31a   : > { %v2804_v9 = vpop.eup %2803 }
 0x31b   : > { %v1811_v15 = vmul.f32 0.6931472, %v2804_v9  ;;  %v2033_v37 = vpop.xlane.xlu1 %2032  ;;  %v2171_v31 = vadd.f32 %v2170_v40, %v2101_v14  ;;  %v2405_v9 = vsel %vm950_vm0, 1.0, %v4679_v41 }
 0x31c   : > { %v2070_v61 = vsub.f32 %v1846_v59, %v2033_v37 }
 0x31e   : > { %v2102_v60 = vmul.f32 %v2401_v34, %v2070_v61 }
 0x320   : > { %v2172_v16 = vadd.f32 %v2171_v31, %v2102_v60 }
 0x322   : > { %v1751_v7 = vpop.xlane.xlu2 %1750 }
 0x323   : > { %v1749_v55 = vpop.xlane.xlu0 %1748  ;;  %2805 = vlog2.f32 %v1751_v7  ;;  %v2039_v24 = vpop.xlane.xlu1 %2038  ;;  %v2140_v7 = vrot.slane %v4366_v12, 4 }
 0x324   : > { %2807 = vlog2.f32 %v1749_v55  ;;  %v4741_v55 = vld [vmem:[#allocation19_spill] sm:$0xff] }
 0x325   : > { %2809 = vlog2.f32 %v4320_v38  ;;  %v1847_v38 = vadd.f32 %v1811_v15, %v4290_v43  ;;  %v2402_v43 = vsel %vm947_vm3, 1.0, %v4679_v41  ;;  %v2141_v15 = vadd.f32 %v2140_v7, %v4366_v12 }
 0x329   : > { %v2806_v47 = vpop.eup %2805 }
 0x32a   : > { %v2808_v53 = vpop.eup %2807  ;;  %v2035_v56 = vpop.xlane.xlu2 %2034  ;;  %v1815_v19 = vmul.f32 0.6931472, %v2806_v47  ;;  %v2406_v47 = vsel %vm951_vm8, 1.0, %v4679_v41 }
 0x32b   : > { %v1755_v1 = vpop.xlane.xlu0 %1754  ;;  %v1813_v8 = vmul.f32 0.6931472, %v2808_v53  ;;  %v2071_v44 = vsub.f32 %v1847_v38, %v2035_v56  ;;  %v2810_v17 = vpop.eup %2809  ;;  %v2142_v53 = vrot.slane %v2141_v15, 2 }
 0x32c   : > { %2811 = vlog2.f32 %v1755_v1  ;;  %v1849_v27 = vadd.f32 %v1815_v19, %v4318_v46  ;;  %v1817_v30 = vmul.f32 0.6931472, %v2810_v17  ;;  %v2216_v46 = vrot.slane %v2215_v26, 4 }
 0x32d   : > { %v2103_v58 = vmul.f32 %v2402_v43, %v2071_v44  ;;  %v1848_v52 = vadd.f32 %v1813_v8, %v4324_v51  ;;  %v2143_v56 = vadd.f32 %v2142_v53, %v2141_v15 }
 0x32e   : > { %v2073_v39 = vsub.f32 %v1849_v27, %v2039_v24  ;;  %v1850_v28 = vadd.f32 %v1817_v30, %v4739_v3  ;;  %v2217_v36 = vadd.f32 %v2216_v46, %v2215_v26 }
 0x32f   : > { %v2173_v45 = vadd.f32 %v2172_v16, %v2103_v58  ;;  %v2144_v38 = vrot.slane %v2143_v56, 1 }
 0x330   : > { %v2105_v51 = vmul.f32 %v2404_v42, %v2073_v39  ;;  %v2218_v11 = vrot.slane %v2217_v36, 2 }
 0x331   : > { %v2145_v32 = vadd.f32 %v2144_v38, %v2143_v56 }
 0x332   : > { %v2812_v6 = vpop.eup %2811  ;;  %v2041_v62 = vpop.xlane.xlu2 %2040  ;;  %v2219_v59 = vadd.f32 %v2218_v11, %v2217_v36 }
 0x333   : > { %v2037_v35 = vpop.xlane.xlu0 %2036  ;;  %v1819_v23 = vmul.f32 0.6931472, %v2812_v6  ;;  %v2074_v48 = vsub.f32 %v1850_v28, %v2041_v62 }
 0x334   : > { %v2072_v18 = vsub.f32 %v1848_v52, %v2037_v35  ;;  %v2220_v1 = vrot.slane %v2219_v59, 1 }
 0x335   : > { %v1851_v50 = vadd.f32 %v1819_v23, %v4741_v55  ;;  %v2106_v0 = vmul.f32 %v2405_v9, %v2074_v48 }
 0x336   : > { %v2104_v49 = vmul.f32 %v2403_v20, %v2072_v18  ;;  %v2221_v19 = vadd.f32 %v2220_v1, %v2219_v59 }
 0x338   : > { %v2174_v22 = vadd.f32 %v2173_v45, %v2104_v49  ;;  %v2222_v25 = vsel %vm2184_vm9, %v2221_v19, 0.0 }
 0x33a   : > { %v2175_v13 = vadd.f32 %v2174_v22, %v2105_v51 }
 0x33b   : > { %v2043_v2 = vpop.xlane.xlu0 %2042 }
 0x33c   : > { %v2075_v4 = vsub.f32 %v1851_v50, %v2043_v2  ;;  %v2176_v63 = vadd.f32 %v2175_v13, %v2106_v0 }
 0x33e   : > { %v2107_v37 = vmul.f32 %v2406_v47, %v2075_v4 }
 0x340   : > { %v2177_v5 = vadd.f32 %v2176_v63, %v2107_v37 }
 0x342   : > { %v2178_v57 = vrot.slane %v2177_v5, 4 }
 0x344   : > { %v2179_v10 = vadd.f32 %v2178_v57, %v2177_v5 }
 0x346   : > { %v2180_v29 = vrot.slane %v2179_v10, 2 }
 0x348   : > { %v2181_v61 = vadd.f32 %v2180_v29, %v2179_v10 }
 0x34a   : > { %v2182_v12 = vrot.slane %v2181_v61, 1 }
 0x34c   : > { %v2183_v41 = vadd.f32 %v2182_v12, %v2181_v61 }
 0x34e   : > { %v2223_v14 = vsel %vm2146_vm10, %v2183_v41, %v2222_v25 }
 0x34f   : > { %v2224_v8 = vsel %vm2108_vm11, %v2145_v32, %v2223_v14 }
 0x350   : > { %2227 = vst [vmem:[%s299_s16] sm:$0xff] %v2224_v8 }
 0x351 PF: > { %s16_s23 = sadd.s32 1, %s2859_s23   ;;  %s4742_s21 = smov %s2855_s22 }
 0x352   : > { %p13_p6 = scmp.ge.s32.totalorder %s16_s23, 4   ;;  %s4743_s22 = smov %s4745_s24 }
 0x354   :  { %15 = sbr.rel (!%p13_p6) target bundleno = 2 (0x2), region = 81 }

</bundles_post_ra>
